<compile_context>
chip_gen: v6e
topology: v6e:2x2x1
jax: 0.10.0
libtpu: 0.0.40
codegen_flags: <defaults>
</compile_context>

<pallas_src>
import math
import functools

import jax
import jax.numpy as jnp
from jax.experimental import pallas as pl
from jax.experimental.pallas import tpu as pltpu

PAD = 0  # Constants.PAD


# ----------------------------- fused forward kernel -----------------------------

def _fused_decoder_kernel(
    # per-batch / shared inputs
    onehot_ref,        # (1, L, V)  bf16  one-hot(tgt_seq)
    pos_ref,           # (L, D)     f32   positional embeddings
    eg_ref, eb_ref,    # (1, D)     f32   embedding LayerNorm gamma / beta
    npm_ref,           # (1, L, 1)  f32   non-pad mask
    bias_ref,          # (1, 1, L)  f32   self-attn key-pad additive bias
    enc_ref,           # (1, Le, D) f32   encoder output
    wemb_ref,          # (V, D)     bf16  word embedding table
    # stacked per-layer weights (leading dim = n_layers)
    wqkv_ref, bqkv_ref,          # (NL, D, 3D) bf16 / (NL, 1, 3D) f32
    wo_s_ref, bo_s_ref,          # (NL, D, D)  / (NL, 1, D)
    ln1g_ref, ln1b_ref,          # (NL, 1, D)
    wq_c_ref, bq_c_ref,          # (NL, D, D)  / (NL, 1, D)
    wkv_c_ref, bkv_c_ref,        # (NL, D, 2D) / (NL, 1, 2D)
    wo_c_ref, bo_c_ref,          # (NL, D, D)  / (NL, 1, D)
    ln2g_ref, ln2b_ref,          # (NL, 1, D)
    w1_ref, b1_ref,              # (NL, D, FF) / (NL, 1, FF)
    w2_ref, b2_ref,              # (NL, FF, D) / (NL, 1, D)
    ln3g_ref, ln3b_ref,          # (NL, 1, D)
    # outputs
    out_ref,           # (1, L, D) f32  last layer output (res[-1])
    embs_ref,          # (1, L, D) f32  embedded hidden states ("embs" placeholder)
    *, num_heads, eps):

    f32 = jnp.float32
    bf16 = jnp.bfloat16
    D = out_ref.shape[-1]
    dh = D // num_heads
    scale = 1.0 / math.sqrt(dh)
    n_layers = wqkv_ref.shape[0]

    def layernorm(y, g, b):
        mu = jnp.mean(y, axis=-1, keepdims=True)
        var = jnp.mean(jnp.square(y - mu), axis=-1, keepdims=True)
        return (y - mu) * jax.lax.rsqrt(var + eps) * g + b

    def mha(q, k, v, bias):
        # q: (Lq, D) f32, k/v: (Lk, D) f32, bias: (1, Lk) f32 key-pad bias or None.
        # Heads are static lane slices; per-head outputs concatenated back along lanes
        # so the context stays lane-dense (Lq, D) for the out-projection.
        outs = []
        for h in range(num_heads):
            sl = slice(h * dh, (h + 1) * dh)
            qh = q[:, sl].astype(bf16)
            kh = k[:, sl].astype(bf16)
            vh = v[:, sl].astype(bf16)
            s = jax.lax.dot_general(qh, kh, (((1,), (1,)), ((), ())),
                                    preferred_element_type=f32) * scale   # (Lq, Lk)
            if bias is not None:
                s = s + bias
            s = s - jnp.max(s, axis=-1, keepdims=True)
            p = jnp.exp(s)
            inv = pl.reciprocal(jnp.sum(p, axis=-1, keepdims=True), approx=True)
            outs.append(jnp.dot((p * inv).astype(bf16), vh,
                                preferred_element_type=f32))              # (Lq, dh)
        return jnp.concatenate(outs, axis=-1)                             # (Lq, D)

    # ---- embedding: one-hot gather on the MXU + positional add + LayerNorm ----
    word = jnp.dot(onehot_ref[0], wemb_ref[...], preferred_element_type=f32)  # (L, D)
    x = layernorm(word + pos_ref[...], eg_ref[...], eb_ref[...])
    # TODO(synk): BertLayer's layer_outputs[1] ("embs") source is not in the given
    # module; the embedded hidden states are returned in its place.
    embs_ref[0] = x.astype(embs_ref.dtype)

    npm = npm_ref[0]                       # (L, 1)  non-pad mask
    slf_bias = bias_ref[0]                 # (1, L)  key-pad additive bias
    enc = enc_ref[0].astype(bf16)          # (Le, D)

    # ---- decoder layers (statically unrolled, everything VMEM-resident) ----
    for l in range(n_layers):
        # masked self-attention (fused QKV) + out-proj + residual + LN + pad-mask
        qkv = jnp.dot(x.astype(bf16), wqkv_ref[l],
                      preferred_element_type=f32) + bqkv_ref[l]           # (L, 3D)
        ctx = mha(qkv[:, 0:D], qkv[:, D:2 * D], qkv[:, 2 * D:3 * D], slf_bias)
        y = jnp.dot(ctx.astype(bf16), wo_s_ref[l],
                    preferred_element_type=f32) + bo_s_ref[l] + x
        x = layernorm(y, ln1g_ref[l], ln1b_ref[l]) * npm

        # cross-attention to enc_output (fused KV; bias is all-zero in the module -> skipped)
        q = jnp.dot(x.astype(bf16), wq_c_ref[l],
                    preferred_element_type=f32) + bq_c_ref[l]             # (L, D)
        kv = jnp.dot(enc, wkv_c_ref[l],
                     preferred_element_type=f32) + bkv_c_ref[l]           # (Le, 2D)
        ctx = mha(q, kv[:, 0:D], kv[:, D:2 * D], None)
        y = jnp.dot(ctx.astype(bf16), wo_c_ref[l],
                    preferred_element_type=f32) + bo_c_ref[l] + x
        x = layernorm(y, ln2g_ref[l], ln2b_ref[l]) * npm

        # feed-forward + residual + LN + pad-mask
        # TODO(synk): torch BERT intermediates typically use exact erf GELU; the tanh
        # approximation is used here (small numeric drift).
        h1 = jnp.dot(x.astype(bf16), w1_ref[l],
                     preferred_element_type=f32) + b1_ref[l]              # (L, FF)
        h1 = jax.nn.gelu(h1, approximate=True)
        y = jnp.dot(h1.astype(bf16), w2_ref[l],
                    preferred_element_type=f32) + b2_ref[l] + x
        x = layernorm(y, ln3g_ref[l], ln3b_ref[l]) * npm

    out_ref[0] = x.astype(out_ref.dtype)


# ----------------------------- wrapper -----------------------------

_LAYER_KEYS = ("wqkv", "bqkv", "wo_s", "bo_s", "ln1_g", "ln1_b",
               "wq_c", "bq_c", "wkv_c", "bkv_c", "wo_c", "bo_c", "ln2_g", "ln2_b",
               "w1", "b1", "w2", "b2", "ln3_g", "ln3_b")


def bert_decoder_forward(params, tgt_seq, enc_output, *, num_heads):
    """NARFormer path of BertDecoder.forward (verb=False, no mlm targets / signals)."""
    emb, lyr = params["embedding"], params["layers"]
    B, L = tgt_seq.shape
    V, D = emb["word_emb"].shape
    Le = enc_output.shape[1]

    # get_attn_key_pad_mask(seq_k=tgt_seq, seq_q=tgt_seq) -> per-key additive bias
    # (NARFormer: key-pad mask only, NO causal mask).
    slf_bias = jnp.where((tgt_seq == PAD)[:, None, :], -1e9, 0.0).astype(jnp.float32)
    # get_non_pad_mask(tgt_seq)
    npm = (tgt_seq != PAD).astype(jnp.float32)[:, :, None]
    # in-kernel embedding gather is a one-hot MXU matmul (exact for a one-hot LHS).
    # TODO(synk): for large vocabularies switch to a scalar-prefetch pl.Element gather.
    onehot = jax.nn.one_hot(tgt_seq, V, dtype=jnp.bfloat16)
    pos = emb["pos_emb"][:L]
    # src_seq = ones(...) -> attend_to_enc_output_mask is all-False -> zero bias -> omitted.
    # enhance_input == 0, signals None, pos_attention False -> plain embedding path.

    layer_args = tuple(lyr[k] for k in _LAYER_KEYS)

    per_b3 = lambda b: (b, 0, 0)
    full2 = lambda b: (0, 0)
    full3 = lambda b: (0, 0, 0)

    kernel = functools.partial(_fused_decoder_kernel, num_heads=num_heads, eps=1e-12)

    out, embs = pl.pallas_call(
        kernel,
        out_shape=(jax.ShapeDtypeStruct((B, L, D), jnp.float32),
                   jax.ShapeDtypeStruct((B, L, D), jnp.float32)),
        grid=(B,),
        in_specs=[
            pl.BlockSpec((1, L, V), per_b3),          # onehot
            pl.BlockSpec((L, D), full2),              # pos emb
            pl.BlockSpec((1, D), full2),              # emb LN gamma
            pl.BlockSpec((1, D), full2),              # emb LN beta
            pl.BlockSpec((1, L, 1), per_b3),          # non-pad mask
            pl.BlockSpec((1, 1, L), per_b3),          # self-attn key-pad bias
            pl.BlockSpec((1, Le, D), per_b3),         # enc_output
            pl.BlockSpec((V, D), full2),              # word embedding table
        ] + [pl.BlockSpec(a.shape, full3) for a in layer_args],
        out_specs=(pl.BlockSpec((1, L, D), per_b3),
                   pl.BlockSpec((1, L, D), per_b3)),
        compiler_params=pltpu.CompilerParams(
            dimension_semantics=("parallel",)),       # B>=2 -> both v7x TensorCores
    )(onehot, pos, emb["ln_g"].reshape(1, D), emb["ln_b"].reshape(1, D),
      npm, slf_bias, enc_output, emb["word_emb"], *layer_args)

    res = [out]           # torch forward keeps only res[-1]
    # additional_feats is None and position_embeddings is None -> (res, embs)
    return res, embs


# ----------------------------- pure-JAX reference (for validation) -----------------------------

def _reference_forward(params, tgt_seq, enc_output, *, num_heads, eps=1e-12):
    emb, lyr = params["embedding"], params["layers"]
    V, D = emb["word_emb"].shape
    B, L = tgt_seq.shape
    H, dh = num_heads, D // num_heads
    scale = 1.0 / math.sqrt(dh)
    NL = lyr["wqkv"].shape[0]
    bf16, f32 = jnp.bfloat16, jnp.float32

    def mm(a, w):  # same bf16-operand / f32-accumulate contract as the kernel
        return jnp.dot(a.astype(bf16), w.astype(bf16), preferred_element_type=f32)

    def ln(y, g, b):
        mu = y.mean(-1, keepdims=True)
        var = ((y - mu) ** 2).mean(-1, keepdims=True)
        return (y - mu) / jnp.sqrt(var + eps) * g.reshape(1, 1, D) + b.reshape(1, 1, D)

    def split(t):  # (B, S, D) -> (B, H, S, dh)
        return t.reshape(B, -1, H, dh).transpose(0, 2, 1, 3)

    def mha(q, k, v, bias):
        s = jnp.einsum("bhqd,bhkd->bhqk", q.astype(bf16), k.astype(bf16),
                       preferred_element_type=f32) * scale
        if bias is not None:
            s = s + bias[:, None, :, :]
        p = jax.nn.softmax(s, axis=-1)
        o = jnp.einsum("bhqk,bhkd->bhqd", p.astype(bf16), v.astype(bf16),
                       preferred_element_type=f32)
        return o.transpose(0, 2, 1, 3).reshape(B, -1, D)

    npm = (tgt_seq != PAD).astype(f32)[:, :, None]
    bias = jnp.where((tgt_seq == PAD)[:, None, :], -1e9, 0.0).astype(f32)

    x = emb["word_emb"].astype(f32)[tgt_seq] + emb["pos_emb"][:L][None]
    x = ln(x, emb["ln_g"], emb["ln_b"])
    embs = x
    for l in range(NL):
        qkv = mm(x, lyr["wqkv"][l]) + lyr["bqkv"][l]
        q, k, v = (split(qkv[..., i * D:(i + 1) * D]) for i in range(3))
        ctx = mha(q, k, v, bias)
        x = ln(mm(ctx, lyr["wo_s"][l]) + lyr["bo_s"][l] + x,
               lyr["ln1_g"][l], lyr["ln1_b"][l]) * npm
        q = split(mm(x, lyr["wq_c"][l]) + lyr["bq_c"][l])
        kv = mm(enc_output, lyr["wkv_c"][l]) + lyr["bkv_c"][l]
        ctx = mha(q, split(kv[..., :D]), split(kv[..., D:]), None)
        x = ln(mm(ctx, lyr["wo_c"][l]) + lyr["bo_c"][l] + x,
               lyr["ln2_g"][l], lyr["ln2_b"][l]) * npm
        h1 = jax.nn.gelu(mm(x, lyr["w1"][l]) + lyr["b1"][l], approximate=True)
        x = ln(mm(h1, lyr["w2"][l]) + lyr["b2"][l] + x,
               lyr["ln3_g"][l], lyr["ln3_b"][l]) * npm
    return [x], embs


# ----------------------------- parameter init -----------------------------

def init_params(key, vocab_size, dim_hidden, dim_ff, max_pos, n_layers):
    D, FF, NL = dim_hidden, dim_ff, n_layers
    ks = jax.random.split(key, 9)

    def w(k, shape):  # bf16 weights: half the HBM/VMEM bytes, native MXU operand dtype
        return (jax.random.normal(k, shape, jnp.float32) * 0.02).astype(jnp.bfloat16)

    zeros = lambda s: jnp.zeros(s, jnp.float32)
    ones = lambda s: jnp.ones(s, jnp.float32)

    params = {
        "embedding": {
            "word_emb": w(ks[0], (vocab_size, D)),
            "pos_emb": jax.random.normal(ks[1], (max_pos, D), jnp.float32) * 0.02,
            "ln_g": ones((D,)), "ln_b": zeros((D,)),
        },
        # Per-layer weights stacked along a leading layer axis so the whole decoder
        # is a single pallas_call with one ref per parameter kind.
        "layers": {
            "wqkv": w(ks[2], (NL, D, 3 * D)),  "bqkv": zeros((NL, 1, 3 * D)),
            "wo_s": w(ks[3], (NL, D, D)),      "bo_s": zeros((NL, 1, D)),
            "ln1_g": ones((NL, 1, D)),         "ln1_b": zeros((NL, 1, D)),
            "wq_c": w(ks[4], (NL, D, D)),      "bq_c": zeros((NL, 1, D)),
            "wkv_c": w(ks[5], (NL, D, 2 * D)), "bkv_c": zeros((NL, 1, 2 * D)),
            "wo_c": w(ks[6], (NL, D, D)),      "bo_c": zeros((NL, 1, D)),
            "ln2_g": ones((NL, 1, D)),         "ln2_b": zeros((NL, 1, D)),
            "w1": w(ks[7], (NL, D, FF)),       "b1": zeros((NL, 1, FF)),
            "w2": w(ks[8], (NL, FF, D)),       "b2": zeros((NL, 1, D)),
            "ln3_g": ones((NL, 1, D)),         "ln3_b": zeros((NL, 1, D)),
        },
    }
    # NOTE: self.linear (dim_hidden -> vocab_size) exists in __init__ but is never
    # applied in the torch forward, so it is intentionally omitted.
    return params


# ----------------------------- main -----------------------------

if __name__ == "__main__":
    # Lane-dense small config: hidden a multiple of 128, FFN a multiple of 128.
    B, L, D = 2, 8, 128        # batch, target seq len, hidden dim
    V, H, FF = 64, 4, 512      # vocab, heads, intermediate
    L_ENC = 8                  # encoder (visual) sequence length
    N_LAYERS = 2               # num_hidden_layers_decoder
    MAX_POS = 32

    key = jax.random.PRNGKey(0)
    k_param, k_tok, k_enc = jax.random.split(key, 3)

    params = init_params(k_param, V, D, FF, max_pos=MAX_POS, n_layers=N_LAYERS)

    tgt_seq = jax.random.randint(k_tok, (B, L), 1, V, dtype=jnp.int32)
    tgt_seq = tgt_seq.at[0, -2:].set(PAD)   # some PAD tokens at the tail
    tgt_seq = tgt_seq.at[1, -3:].set(PAD)

    enc_output = jax.random.normal(k_enc, (B, L_ENC, D), jnp.float32)

    fwd = jax.jit(functools.partial(bert_decoder_forward, num_heads=H))
    res, embs = fwd(params, tgt_seq, enc_output)
    jax.block_until_ready((res, embs))

    assert res[0].shape == (B, L, D)
    assert embs.shape == (B, L, D)
    assert bool(jnp.all(jnp.isfinite(res[0])))

    # validate against a pure-JAX reference with the same bf16-operand contract
    ref_res, ref_embs = _reference_forward(params, tgt_seq, enc_output, num_heads=H)
    err_out = float(jnp.max(jnp.abs(res[0] - ref_res[0])))
    err_emb = float(jnp.max(jnp.abs(embs - ref_embs)))
    assert err_out < 2e-2, f"output mismatch vs reference: {err_out}"
    assert err_emb < 2e-2, f"embs mismatch vs reference: {err_emb}"

    print("KERNEL_OK")
</pallas_src>

<mosaic_0001>
module attributes {stable_mosaic.version = 11 : i64} {
  func.func @_fused_decoder_kernel(%arg0: i32, %arg1: memref<1x8x64xbf16, #tpu.memory_space<vmem>>, %arg2: memref<8x128xf32, #tpu.memory_space<vmem>>, %arg3: memref<1x128xf32, #tpu.memory_space<vmem>>, %arg4: memref<1x128xf32, #tpu.memory_space<vmem>>, %arg5: memref<1x8x1xf32, #tpu.memory_space<vmem>>, %arg6: memref<1x1x8xf32, #tpu.memory_space<vmem>>, %arg7: memref<1x8x128xf32, #tpu.memory_space<vmem>>, %arg8: memref<64x128xbf16, #tpu.memory_space<vmem>>, %arg9: memref<2x128x384xbf16, #tpu.memory_space<vmem>>, %arg10: memref<2x1x384xf32, #tpu.memory_space<vmem>>, %arg11: memref<2x128x128xbf16, #tpu.memory_space<vmem>>, %arg12: memref<2x1x128xf32, #tpu.memory_space<vmem>>, %arg13: memref<2x1x128xf32, #tpu.memory_space<vmem>>, %arg14: memref<2x1x128xf32, #tpu.memory_space<vmem>>, %arg15: memref<2x128x128xbf16, #tpu.memory_space<vmem>>, %arg16: memref<2x1x128xf32, #tpu.memory_space<vmem>>, %arg17: memref<2x128x256xbf16, #tpu.memory_space<vmem>>, %arg18: memref<2x1x256xf32, #tpu.memory_space<vmem>>, %arg19: memref<2x128x128xbf16, #tpu.memory_space<vmem>>, %arg20: memref<2x1x128xf32, #tpu.memory_space<vmem>>, %arg21: memref<2x1x128xf32, #tpu.memory_space<vmem>>, %arg22: memref<2x1x128xf32, #tpu.memory_space<vmem>>, %arg23: memref<2x128x512xbf16, #tpu.memory_space<vmem>>, %arg24: memref<2x1x512xf32, #tpu.memory_space<vmem>>, %arg25: memref<2x512x128xbf16, #tpu.memory_space<vmem>>, %arg26: memref<2x1x128xf32, #tpu.memory_space<vmem>>, %arg27: memref<2x1x128xf32, #tpu.memory_space<vmem>>, %arg28: memref<2x1x128xf32, #tpu.memory_space<vmem>>, %arg29: memref<1x8x128xf32, #tpu.memory_space<vmem>>, %arg30: memref<1x8x128xf32, #tpu.memory_space<vmem>>) attributes {dimension_semantics = [#tpu.dimension_semantics<parallel>], iteration_bounds = array<i64: 2>, scalar_prefetch = 0 : i64, scratch_operands = 0 : i64, tpu.core_type = #tpu.core_type<tc>, window_params = [{transform_indices = @transform_0, window_bounds = array<i64: 1, 8, 64>}, {pipeline_mode = #tpu.pipeline_mode<synchronous>, transform_indices = @transform_1, window_bounds = array<i64: 8, 128>}, {pipeline_mode = #tpu.pipeline_mode<synchronous>, transform_indices = @transform_2, window_bounds = array<i64: 1, 128>}, {pipeline_mode = #tpu.pipeline_mode<synchronous>, transform_indices = @transform_3, window_bounds = array<i64: 1, 128>}, {transform_indices = @transform_4, window_bounds = array<i64: 1, 8, 1>}, {transform_indices = @transform_5, window_bounds = array<i64: 1, 1, 8>}, {transform_indices = @transform_6, window_bounds = array<i64: 1, 8, 128>}, {pipeline_mode = #tpu.pipeline_mode<synchronous>, transform_indices = @transform_7, window_bounds = array<i64: 64, 128>}, {pipeline_mode = #tpu.pipeline_mode<synchronous>, transform_indices = @transform_8, window_bounds = array<i64: 2, 128, 384>}, {pipeline_mode = #tpu.pipeline_mode<synchronous>, transform_indices = @transform_9, window_bounds = array<i64: 2, 1, 384>}, {pipeline_mode = #tpu.pipeline_mode<synchronous>, transform_indices = @transform_10, window_bounds = array<i64: 2, 128, 128>}, {pipeline_mode = #tpu.pipeline_mode<synchronous>, transform_indices = @transform_11, window_bounds = array<i64: 2, 1, 128>}, {pipeline_mode = #tpu.pipeline_mode<synchronous>, transform_indices = @transform_12, window_bounds = array<i64: 2, 1, 128>}, {pipeline_mode = #tpu.pipeline_mode<synchronous>, transform_indices = @transform_13, window_bounds = array<i64: 2, 1, 128>}, {pipeline_mode = #tpu.pipeline_mode<synchronous>, transform_indices = @transform_14, window_bounds = array<i64: 2, 128, 128>}, {pipeline_mode = #tpu.pipeline_mode<synchronous>, transform_indices = @transform_15, window_bounds = array<i64: 2, 1, 128>}, {pipeline_mode = #tpu.pipeline_mode<synchronous>, transform_indices = @transform_16, window_bounds = array<i64: 2, 128, 256>}, {pipeline_mode = #tpu.pipeline_mode<synchronous>, transform_indices = @transform_17, window_bounds = array<i64: 2, 1, 256>}, {pipeline_mode = #tpu.pipeline_mode<synchronous>, transform_indices = @transform_18, window_bounds = array<i64: 2, 128, 128>}, {pipeline_mode = #tpu.pipeline_mode<synchronous>, transform_indices = @transform_19, window_bounds = array<i64: 2, 1, 128>}, {pipeline_mode = #tpu.pipeline_mode<synchronous>, transform_indices = @transform_20, window_bounds = array<i64: 2, 1, 128>}, {pipeline_mode = #tpu.pipeline_mode<synchronous>, transform_indices = @transform_21, window_bounds = array<i64: 2, 1, 128>}, {pipeline_mode = #tpu.pipeline_mode<synchronous>, transform_indices = @transform_22, window_bounds = array<i64: 2, 128, 512>}, {pipeline_mode = #tpu.pipeline_mode<synchronous>, transform_indices = @transform_23, window_bounds = array<i64: 2, 1, 512>}, {pipeline_mode = #tpu.pipeline_mode<synchronous>, transform_indices = @transform_24, window_bounds = array<i64: 2, 512, 128>}, {pipeline_mode = #tpu.pipeline_mode<synchronous>, transform_indices = @transform_25, window_bounds = array<i64: 2, 1, 128>}, {pipeline_mode = #tpu.pipeline_mode<synchronous>, transform_indices = @transform_26, window_bounds = array<i64: 2, 1, 128>}, {pipeline_mode = #tpu.pipeline_mode<synchronous>, transform_indices = @transform_27, window_bounds = array<i64: 2, 1, 128>}, {transform_indices = @transform_28, window_bounds = array<i64: 1, 8, 128>}, {transform_indices = @transform_29, window_bounds = array<i64: 1, 8, 128>}]} {
    %c0 = arith.constant 0 : index
    %c0_0 = arith.constant 0 : index
    %c0_1 = arith.constant 0 : index
    %0 = vector.load %arg1[%c0, %c0_0, %c0_1] : memref<1x8x64xbf16, #tpu.memory_space<vmem>>, vector<1x8x64xbf16>
    %1 = vector.shape_cast %0 : vector<1x8x64xbf16> to vector<8x64xbf16>
    %c0_2 = arith.constant 0 : index
    %c0_3 = arith.constant 0 : index
    %2 = vector.load %arg8[%c0_2, %c0_3] : memref<64x128xbf16, #tpu.memory_space<vmem>>, vector<64x128xbf16>
    %cst = arith.constant dense<0.000000e+00> : vector<8x128xf32>
    %3 = tpu.matmul %1, %2, %cst {dimension_numbers = #tpu.dot_dimension_numbers<[1], [0], [0], [1], [0, 0, 1, 1], [], []>} : vector<8x64xbf16>, vector<64x128xbf16>, vector<8x128xf32> -> vector<8x128xf32>
    %c0_4 = arith.constant 0 : index
    %c0_5 = arith.constant 0 : index
    %4 = vector.load %arg2[%c0_4, %c0_5] : memref<8x128xf32, #tpu.memory_space<vmem>>, vector<8x128xf32>
    %5 = arith.addf %3, %4 : vector<8x128xf32>
    %c0_6 = arith.constant 0 : index
    %c0_7 = arith.constant 0 : index
    %6 = vector.load %arg3[%c0_6, %c0_7] : memref<1x128xf32, #tpu.memory_space<vmem>>, vector<1x128xf32>
    %c0_8 = arith.constant 0 : index
    %c0_9 = arith.constant 0 : index
    %7 = vector.load %arg4[%c0_8, %c0_9] : memref<1x128xf32, #tpu.memory_space<vmem>>, vector<1x128xf32>
    %cst_10 = arith.constant dense<0.000000e+00> : vector<8xf32>
    %8 = vector.multi_reduction <add>, %5, %cst_10 [1] : vector<8x128xf32> to vector<8xf32>
    %9 = vector.shape_cast %8 : vector<8xf32> to vector<8x1xf32>
    %cst_11 = arith.constant 1.280000e+02 : f32
    %10 = vector.broadcast %cst_11 : f32 to vector<8x1xf32>
    %11 = arith.divf %9, %10 : vector<8x1xf32>
    %12 = vector.broadcast %11 : vector<8x1xf32> to vector<8x128xf32>
    %13 = arith.subf %5, %12 : vector<8x128xf32>
    %14 = arith.mulf %13, %13 : vector<8x128xf32>
    %cst_12 = arith.constant dense<0.000000e+00> : vector<8xf32>
    %15 = vector.multi_reduction <add>, %14, %cst_12 [1] : vector<8x128xf32> to vector<8xf32>
    %16 = vector.shape_cast %15 : vector<8xf32> to vector<8x1xf32>
    %cst_13 = arith.constant 1.280000e+02 : f32
    %17 = vector.broadcast %cst_13 : f32 to vector<8x1xf32>
    %18 = arith.divf %16, %17 : vector<8x1xf32>
    %19 = vector.broadcast %11 : vector<8x1xf32> to vector<8x128xf32>
    %20 = arith.subf %5, %19 : vector<8x128xf32>
    %cst_14 = arith.constant 9.99999996E-13 : f32
    %21 = vector.broadcast %cst_14 : f32 to vector<8x1xf32>
    %22 = arith.addf %18, %21 : vector<8x1xf32>
    %23 = math.rsqrt %22 : vector<8x1xf32>
    %24 = vector.broadcast %23 : vector<8x1xf32> to vector<8x128xf32>
    %25 = arith.mulf %20, %24 : vector<8x128xf32>
    %26 = vector.broadcast %6 : vector<1x128xf32> to vector<8x128xf32>
    %27 = arith.mulf %25, %26 : vector<8x128xf32>
    %28 = vector.broadcast %7 : vector<1x128xf32> to vector<8x128xf32>
    %29 = arith.addf %27, %28 : vector<8x128xf32>
    %c0_15 = arith.constant 0 : index
    %c0_16 = arith.constant 0 : index
    %c0_17 = arith.constant 0 : index
    %30 = vector.load %arg30[%c0_15, %c0_16, %c0_17] : memref<1x8x128xf32, #tpu.memory_space<vmem>>, vector<1x8x128xf32>
    %31 = vector.shape_cast %30 : vector<1x8x128xf32> to vector<8x128xf32>
    %32 = vector.shape_cast %29 : vector<8x128xf32> to vector<1x8x128xf32>
    tpu.vector_store %arg30[%c0_15, %c0_16, %c0_17], %32 {strides = array<i32>} : memref<1x8x128xf32, #tpu.memory_space<vmem>>, vector<1x8x128xf32>,
    %c0_18 = arith.constant 0 : index
    %c0_19 = arith.constant 0 : index
    %c0_20 = arith.constant 0 : index
    %33 = vector.load %arg5[%c0_18, %c0_19, %c0_20] : memref<1x8x1xf32, #tpu.memory_space<vmem>>, vector<1x8x1xf32>
    %34 = vector.shape_cast %33 : vector<1x8x1xf32> to vector<8x1xf32>
    %c0_21 = arith.constant 0 : index
    %c0_22 = arith.constant 0 : index
    %c0_23 = arith.constant 0 : index
    %35 = vector.load %arg6[%c0_21, %c0_22, %c0_23] : memref<1x1x8xf32, #tpu.memory_space<vmem>>, vector<1x1x8xf32>
    %36 = vector.shape_cast %35 : vector<1x1x8xf32> to vector<1x8xf32>
    %c0_24 = arith.constant 0 : index
    %c0_25 = arith.constant 0 : index
    %c0_26 = arith.constant 0 : index
    %37 = vector.load %arg7[%c0_24, %c0_25, %c0_26] : memref<1x8x128xf32, #tpu.memory_space<vmem>>, vector<1x8x128xf32>
    %38 = vector.shape_cast %37 : vector<1x8x128xf32> to vector<8x128xf32>
    %39 = arith.truncf %38 : vector<8x128xf32> to vector<8x128xbf16>
    %40 = arith.truncf %29 : vector<8x128xf32> to vector<8x128xbf16>
    %c0_27 = arith.constant 0 : index
    %c0_28 = arith.constant 0 : index
    %c0_29 = arith.constant 0 : index
    %41 = vector.load %arg9[%c0_27, %c0_28, %c0_29] : memref<2x128x384xbf16, #tpu.memory_space<vmem>>, vector<1x128x384xbf16>
    %42 = vector.shape_cast %41 : vector<1x128x384xbf16> to vector<128x384xbf16>
    %cst_30 = arith.constant dense<0.000000e+00> : vector<8x384xf32>
    %43 = tpu.matmul %40, %42, %cst_30 {dimension_numbers = #tpu.dot_dimension_numbers<[1], [0], [0], [1], [0, 0, 1, 1], [], []>} : vector<8x128xbf16>, vector<128x384xbf16>, vector<8x384xf32> -> vector<8x384xf32>
    %c0_31 = arith.constant 0 : index
    %c0_32 = arith.constant 0 : index
    %c0_33 = arith.constant 0 : index
    %44 = vector.load %arg10[%c0_31, %c0_32, %c0_33] : memref<2x1x384xf32, #tpu.memory_space<vmem>>, vector<1x1x384xf32>
    %45 = vector.shape_cast %44 : vector<1x1x384xf32> to vector<1x384xf32>
    %46 = vector.broadcast %45 : vector<1x384xf32> to vector<8x384xf32>
    %47 = arith.addf %43, %46 : vector<8x384xf32>
    %48 = vector.extract_strided_slice %47 {offsets = [0, 0], sizes = [8, 128], strides = [1, 1]} : vector<8x384xf32> to vector<8x128xf32>
    %49 = vector.extract_strided_slice %47 {offsets = [0, 128], sizes = [8, 128], strides = [1, 1]} : vector<8x384xf32> to vector<8x128xf32>
    %50 = vector.extract_strided_slice %47 {offsets = [0, 256], sizes = [8, 128], strides = [1, 1]} : vector<8x384xf32> to vector<8x128xf32>
    %51 = vector.extract_strided_slice %48 {offsets = [0, 0], sizes = [8, 32], strides = [1, 1]} : vector<8x128xf32> to vector<8x32xf32>
    %52 = arith.truncf %51 : vector<8x32xf32> to vector<8x32xbf16>
    %53 = vector.extract_strided_slice %49 {offsets = [0, 0], sizes = [8, 32], strides = [1, 1]} : vector<8x128xf32> to vector<8x32xf32>
    %54 = arith.truncf %53 : vector<8x32xf32> to vector<8x32xbf16>
    %55 = vector.extract_strided_slice %50 {offsets = [0, 0], sizes = [8, 32], strides = [1, 1]} : vector<8x128xf32> to vector<8x32xf32>
    %56 = arith.truncf %55 : vector<8x32xf32> to vector<8x32xbf16>
    %cst_34 = arith.constant dense<0.000000e+00> : vector<8x8xf32>
    %57 = tpu.matmul %52, %54, %cst_34 {dimension_numbers = #tpu.dot_dimension_numbers<[1], [1], [0], [0], [0, 0, 1, 0], [], []>} : vector<8x32xbf16>, vector<8x32xbf16>, vector<8x8xf32> -> vector<8x8xf32>
    %cst_35 = arith.constant 0.176776692 : f32
    %58 = vector.broadcast %cst_35 : f32 to vector<8x8xf32>
    %59 = arith.mulf %57, %58 : vector<8x8xf32>
    %60 = vector.broadcast %36 : vector<1x8xf32> to vector<8x8xf32>
    %61 = arith.addf %59, %60 : vector<8x8xf32>
    %cst_36 = arith.constant dense<0xFF800000> : vector<8xf32>
    %62 = vector.multi_reduction <maximumf>, %61, %cst_36 [1] : vector<8x8xf32> to vector<8xf32>
    %63 = vector.shape_cast %62 : vector<8xf32> to vector<8x1xf32>
    %64 = vector.broadcast %63 : vector<8x1xf32> to vector<8x8xf32>
    %65 = arith.subf %61, %64 : vector<8x8xf32>
    %66 = math.exp %65 : vector<8x8xf32>
    %cst_37 = arith.constant dense<0.000000e+00> : vector<8xf32>
    %67 = vector.multi_reduction <add>, %66, %cst_37 [1] : vector<8x8xf32> to vector<8xf32>
    %68 = vector.shape_cast %67 : vector<8xf32> to vector<8x1xf32>
    %69 = tpu.reciprocal %68 {approx = true} : vector<8x1xf32> -> vector<8x1xf32>
    %70 = vector.broadcast %69 : vector<8x1xf32> to vector<8x8xf32>
    %71 = arith.mulf %66, %70 : vector<8x8xf32>
    %72 = arith.truncf %71 : vector<8x8xf32> to vector<8x8xbf16>
    %cst_38 = arith.constant dense<0.000000e+00> : vector<8x32xf32>
    %73 = tpu.matmul %72, %56, %cst_38 {dimension_numbers = #tpu.dot_dimension_numbers<[1], [0], [0], [1], [0, 0, 1, 1], [], []>} : vector<8x8xbf16>, vector<8x32xbf16>, vector<8x32xf32> -> vector<8x32xf32>
    %74 = vector.extract_strided_slice %48 {offsets = [0, 32], sizes = [8, 32], strides = [1, 1]} : vector<8x128xf32> to vector<8x32xf32>
    %75 = arith.truncf %74 : vector<8x32xf32> to vector<8x32xbf16>
    %76 = vector.extract_strided_slice %49 {offsets = [0, 32], sizes = [8, 32], strides = [1, 1]} : vector<8x128xf32> to vector<8x32xf32>
    %77 = arith.truncf %76 : vector<8x32xf32> to vector<8x32xbf16>
    %78 = vector.extract_strided_slice %50 {offsets = [0, 32], sizes = [8, 32], strides = [1, 1]} : vector<8x128xf32> to vector<8x32xf32>
    %79 = arith.truncf %78 : vector<8x32xf32> to vector<8x32xbf16>
    %cst_39 = arith.constant dense<0.000000e+00> : vector<8x8xf32>
    %80 = tpu.matmul %75, %77, %cst_39 {dimension_numbers = #tpu.dot_dimension_numbers<[1], [1], [0], [0], [0, 0, 1, 0], [], []>} : vector<8x32xbf16>, vector<8x32xbf16>, vector<8x8xf32> -> vector<8x8xf32>
    %cst_40 = arith.constant 0.176776692 : f32
    %81 = vector.broadcast %cst_40 : f32 to vector<8x8xf32>
    %82 = arith.mulf %80, %81 : vector<8x8xf32>
    %83 = vector.broadcast %36 : vector<1x8xf32> to vector<8x8xf32>
    %84 = arith.addf %82, %83 : vector<8x8xf32>
    %cst_41 = arith.constant dense<0xFF800000> : vector<8xf32>
    %85 = vector.multi_reduction <maximumf>, %84, %cst_41 [1] : vector<8x8xf32> to vector<8xf32>
    %86 = vector.shape_cast %85 : vector<8xf32> to vector<8x1xf32>
    %87 = vector.broadcast %86 : vector<8x1xf32> to vector<8x8xf32>
    %88 = arith.subf %84, %87 : vector<8x8xf32>
    %89 = math.exp %88 : vector<8x8xf32>
    %cst_42 = arith.constant dense<0.000000e+00> : vector<8xf32>
    %90 = vector.multi_reduction <add>, %89, %cst_42 [1] : vector<8x8xf32> to vector<8xf32>
    %91 = vector.shape_cast %90 : vector<8xf32> to vector<8x1xf32>
    %92 = tpu.reciprocal %91 {approx = true} : vector<8x1xf32> -> vector<8x1xf32>
    %93 = vector.broadcast %92 : vector<8x1xf32> to vector<8x8xf32>
    %94 = arith.mulf %89, %93 : vector<8x8xf32>
    %95 = arith.truncf %94 : vector<8x8xf32> to vector<8x8xbf16>
    %cst_43 = arith.constant dense<0.000000e+00> : vector<8x32xf32>
    %96 = tpu.matmul %95, %79, %cst_43 {dimension_numbers = #tpu.dot_dimension_numbers<[1], [0], [0], [1], [0, 0, 1, 1], [], []>} : vector<8x8xbf16>, vector<8x32xbf16>, vector<8x32xf32> -> vector<8x32xf32>
    %97 = vector.extract_strided_slice %48 {offsets = [0, 64], sizes = [8, 32], strides = [1, 1]} : vector<8x128xf32> to vector<8x32xf32>
    %98 = arith.truncf %97 : vector<8x32xf32> to vector<8x32xbf16>
    %99 = vector.extract_strided_slice %49 {offsets = [0, 64], sizes = [8, 32], strides = [1, 1]} : vector<8x128xf32> to vector<8x32xf32>
    %100 = arith.truncf %99 : vector<8x32xf32> to vector<8x32xbf16>
    %101 = vector.extract_strided_slice %50 {offsets = [0, 64], sizes = [8, 32], strides = [1, 1]} : vector<8x128xf32> to vector<8x32xf32>
    %102 = arith.truncf %101 : vector<8x32xf32> to vector<8x32xbf16>
    %cst_44 = arith.constant dense<0.000000e+00> : vector<8x8xf32>
    %103 = tpu.matmul %98, %100, %cst_44 {dimension_numbers = #tpu.dot_dimension_numbers<[1], [1], [0], [0], [0, 0, 1, 0], [], []>} : vector<8x32xbf16>, vector<8x32xbf16>, vector<8x8xf32> -> vector<8x8xf32>
    %cst_45 = arith.constant 0.176776692 : f32
    %104 = vector.broadcast %cst_45 : f32 to vector<8x8xf32>
    %105 = arith.mulf %103, %104 : vector<8x8xf32>
    %106 = vector.broadcast %36 : vector<1x8xf32> to vector<8x8xf32>
    %107 = arith.addf %105, %106 : vector<8x8xf32>
    %cst_46 = arith.constant dense<0xFF800000> : vector<8xf32>
    %108 = vector.multi_reduction <maximumf>, %107, %cst_46 [1] : vector<8x8xf32> to vector<8xf32>
    %109 = vector.shape_cast %108 : vector<8xf32> to vector<8x1xf32>
    %110 = vector.broadcast %109 : vector<8x1xf32> to vector<8x8xf32>
    %111 = arith.subf %107, %110 : vector<8x8xf32>
    %112 = math.exp %111 : vector<8x8xf32>
    %cst_47 = arith.constant dense<0.000000e+00> : vector<8xf32>
    %113 = vector.multi_reduction <add>, %112, %cst_47 [1] : vector<8x8xf32> to vector<8xf32>
    %114 = vector.shape_cast %113 : vector<8xf32> to vector<8x1xf32>
    %115 = tpu.reciprocal %114 {approx = true} : vector<8x1xf32> -> vector<8x1xf32>
    %116 = vector.broadcast %115 : vector<8x1xf32> to vector<8x8xf32>
    %117 = arith.mulf %112, %116 : vector<8x8xf32>
    %118 = arith.truncf %117 : vector<8x8xf32> to vector<8x8xbf16>
    %cst_48 = arith.constant dense<0.000000e+00> : vector<8x32xf32>
    %119 = tpu.matmul %118, %102, %cst_48 {dimension_numbers = #tpu.dot_dimension_numbers<[1], [0], [0], [1], [0, 0, 1, 1], [], []>} : vector<8x8xbf16>, vector<8x32xbf16>, vector<8x32xf32> -> vector<8x32xf32>
    %120 = vector.extract_strided_slice %48 {offsets = [0, 96], sizes = [8, 32], strides = [1, 1]} : vector<8x128xf32> to vector<8x32xf32>
    %121 = arith.truncf %120 : vector<8x32xf32> to vector<8x32xbf16>
    %122 = vector.extract_strided_slice %49 {offsets = [0, 96], sizes = [8, 32], strides = [1, 1]} : vector<8x128xf32> to vector<8x32xf32>
    %123 = arith.truncf %122 : vector<8x32xf32> to vector<8x32xbf16>
    %124 = vector.extract_strided_slice %50 {offsets = [0, 96], sizes = [8, 32], strides = [1, 1]} : vector<8x128xf32> to vector<8x32xf32>
    %125 = arith.truncf %124 : vector<8x32xf32> to vector<8x32xbf16>
    %cst_49 = arith.constant dense<0.000000e+00> : vector<8x8xf32>
    %126 = tpu.matmul %121, %123, %cst_49 {dimension_numbers = #tpu.dot_dimension_numbers<[1], [1], [0], [0], [0, 0, 1, 0], [], []>} : vector<8x32xbf16>, vector<8x32xbf16>, vector<8x8xf32> -> vector<8x8xf32>
    %cst_50 = arith.constant 0.176776692 : f32
    %127 = vector.broadcast %cst_50 : f32 to vector<8x8xf32>
    %128 = arith.mulf %126, %127 : vector<8x8xf32>
    %129 = vector.broadcast %36 : vector<1x8xf32> to vector<8x8xf32>
    %130 = arith.addf %128, %129 : vector<8x8xf32>
    %cst_51 = arith.constant dense<0xFF800000> : vector<8xf32>
    %131 = vector.multi_reduction <maximumf>, %130, %cst_51 [1] : vector<8x8xf32> to vector<8xf32>
    %132 = vector.shape_cast %131 : vector<8xf32> to vector<8x1xf32>
    %133 = vector.broadcast %132 : vector<8x1xf32> to vector<8x8xf32>
    %134 = arith.subf %130, %133 : vector<8x8xf32>
    %135 = math.exp %134 : vector<8x8xf32>
    %cst_52 = arith.constant dense<0.000000e+00> : vector<8xf32>
    %136 = vector.multi_reduction <add>, %135, %cst_52 [1] : vector<8x8xf32> to vector<8xf32>
    %137 = vector.shape_cast %136 : vector<8xf32> to vector<8x1xf32>
    %138 = tpu.reciprocal %137 {approx = true} : vector<8x1xf32> -> vector<8x1xf32>
    %139 = vector.broadcast %138 : vector<8x1xf32> to vector<8x8xf32>
    %140 = arith.mulf %135, %139 : vector<8x8xf32>
    %141 = arith.truncf %140 : vector<8x8xf32> to vector<8x8xbf16>
    %cst_53 = arith.constant dense<0.000000e+00> : vector<8x32xf32>
    %142 = tpu.matmul %141, %125, %cst_53 {dimension_numbers = #tpu.dot_dimension_numbers<[1], [0], [0], [1], [0, 0, 1, 1], [], []>} : vector<8x8xbf16>, vector<8x32xbf16>, vector<8x32xf32> -> vector<8x32xf32>
    %143 = tpu.concatenate %73, %96, %119, %142 in 1 : vector<8x32xf32>, vector<8x32xf32>, vector<8x32xf32>, vector<8x32xf32> -> vector<8x128xf32>
    %144 = arith.truncf %143 : vector<8x128xf32> to vector<8x128xbf16>
    %c0_54 = arith.constant 0 : index
    %c0_55 = arith.constant 0 : index
    %c0_56 = arith.constant 0 : index
    %145 = vector.load %arg11[%c0_54, %c0_55, %c0_56] : memref<2x128x128xbf16, #tpu.memory_space<vmem>>, vector<1x128x128xbf16>
    %146 = vector.shape_cast %145 : vector<1x128x128xbf16> to vector<128x128xbf16>
    %cst_57 = arith.constant dense<0.000000e+00> : vector<8x128xf32>
    %147 = tpu.matmul %144, %146, %cst_57 {dimension_numbers = #tpu.dot_dimension_numbers<[1], [0], [0], [1], [0, 0, 1, 1], [], []>} : vector<8x128xbf16>, vector<128x128xbf16>, vector<8x128xf32> -> vector<8x128xf32>
    %c0_58 = arith.constant 0 : index
    %c0_59 = arith.constant 0 : index
    %c0_60 = arith.constant 0 : index
    %148 = vector.load %arg12[%c0_58, %c0_59, %c0_60] : memref<2x1x128xf32, #tpu.memory_space<vmem>>, vector<1x1x128xf32>
    %149 = vector.shape_cast %148 : vector<1x1x128xf32> to vector<1x128xf32>
    %150 = vector.broadcast %149 : vector<1x128xf32> to vector<8x128xf32>
    %151 = arith.addf %147, %150 : vector<8x128xf32>
    %152 = arith.addf %151, %29 : vector<8x128xf32>
    %c0_61 = arith.constant 0 : index
    %c0_62 = arith.constant 0 : index
    %c0_63 = arith.constant 0 : index
    %153 = vector.load %arg13[%c0_61, %c0_62, %c0_63] : memref<2x1x128xf32, #tpu.memory_space<vmem>>, vector<1x1x128xf32>
    %154 = vector.shape_cast %153 : vector<1x1x128xf32> to vector<1x128xf32>
    %c0_64 = arith.constant 0 : index
    %c0_65 = arith.constant 0 : index
    %c0_66 = arith.constant 0 : index
    %155 = vector.load %arg14[%c0_64, %c0_65, %c0_66] : memref<2x1x128xf32, #tpu.memory_space<vmem>>, vector<1x1x128xf32>
    %156 = vector.shape_cast %155 : vector<1x1x128xf32> to vector<1x128xf32>
    %cst_67 = arith.constant dense<0.000000e+00> : vector<8xf32>
    %157 = vector.multi_reduction <add>, %152, %cst_67 [1] : vector<8x128xf32> to vector<8xf32>
    %158 = vector.shape_cast %157 : vector<8xf32> to vector<8x1xf32>
    %cst_68 = arith.constant 1.280000e+02 : f32
    %159 = vector.broadcast %cst_68 : f32 to vector<8x1xf32>
    %160 = arith.divf %158, %159 : vector<8x1xf32>
    %161 = vector.broadcast %160 : vector<8x1xf32> to vector<8x128xf32>
    %162 = arith.subf %152, %161 : vector<8x128xf32>
    %163 = arith.mulf %162, %162 : vector<8x128xf32>
    %cst_69 = arith.constant dense<0.000000e+00> : vector<8xf32>
    %164 = vector.multi_reduction <add>, %163, %cst_69 [1] : vector<8x128xf32> to vector<8xf32>
    %165 = vector.shape_cast %164 : vector<8xf32> to vector<8x1xf32>
    %cst_70 = arith.constant 1.280000e+02 : f32
    %166 = vector.broadcast %cst_70 : f32 to vector<8x1xf32>
    %167 = arith.divf %165, %166 : vector<8x1xf32>
    %168 = vector.broadcast %160 : vector<8x1xf32> to vector<8x128xf32>
    %169 = arith.subf %152, %168 : vector<8x128xf32>
    %cst_71 = arith.constant 9.99999996E-13 : f32
    %170 = vector.broadcast %cst_71 : f32 to vector<8x1xf32>
    %171 = arith.addf %167, %170 : vector<8x1xf32>
    %172 = math.rsqrt %171 : vector<8x1xf32>
    %173 = vector.broadcast %172 : vector<8x1xf32> to vector<8x128xf32>
    %174 = arith.mulf %169, %173 : vector<8x128xf32>
    %175 = vector.broadcast %154 : vector<1x128xf32> to vector<8x128xf32>
    %176 = arith.mulf %174, %175 : vector<8x128xf32>
    %177 = vector.broadcast %156 : vector<1x128xf32> to vector<8x128xf32>
    %178 = arith.addf %176, %177 : vector<8x128xf32>
    %179 = vector.broadcast %34 : vector<8x1xf32> to vector<8x128xf32>
    %180 = arith.mulf %178, %179 : vector<8x128xf32>
    %181 = arith.truncf %180 : vector<8x128xf32> to vector<8x128xbf16>
    %c0_72 = arith.constant 0 : index
    %c0_73 = arith.constant 0 : index
    %c0_74 = arith.constant 0 : index
    %182 = vector.load %arg15[%c0_72, %c0_73, %c0_74] : memref<2x128x128xbf16, #tpu.memory_space<vmem>>, vector<1x128x128xbf16>
    %183 = vector.shape_cast %182 : vector<1x128x128xbf16> to vector<128x128xbf16>
    %cst_75 = arith.constant dense<0.000000e+00> : vector<8x128xf32>
    %184 = tpu.matmul %181, %183, %cst_75 {dimension_numbers = #tpu.dot_dimension_numbers<[1], [0], [0], [1], [0, 0, 1, 1], [], []>} : vector<8x128xbf16>, vector<128x128xbf16>, vector<8x128xf32> -> vector<8x128xf32>
    %c0_76 = arith.constant 0 : index
    %c0_77 = arith.constant 0 : index
    %c0_78 = arith.constant 0 : index
    %185 = vector.load %arg16[%c0_76, %c0_77, %c0_78] : memref<2x1x128xf32, #tpu.memory_space<vmem>>, vector<1x1x128xf32>
    %186 = vector.shape_cast %185 : vector<1x1x128xf32> to vector<1x128xf32>
    %187 = vector.broadcast %186 : vector<1x128xf32> to vector<8x128xf32>
    %188 = arith.addf %184, %187 : vector<8x128xf32>
    %c0_79 = arith.constant 0 : index
    %c0_80 = arith.constant 0 : index
    %c0_81 = arith.constant 0 : index
    %189 = vector.load %arg17[%c0_79, %c0_80, %c0_81] : memref<2x128x256xbf16, #tpu.memory_space<vmem>>, vector<1x128x256xbf16>
    %190 = vector.shape_cast %189 : vector<1x128x256xbf16> to vector<128x256xbf16>
    %cst_82 = arith.constant dense<0.000000e+00> : vector<8x256xf32>
    %191 = tpu.matmul %39, %190, %cst_82 {dimension_numbers = #tpu.dot_dimension_numbers<[1], [0], [0], [1], [0, 0, 1, 1], [], []>} : vector<8x128xbf16>, vector<128x256xbf16>, vector<8x256xf32> -> vector<8x256xf32>
    %c0_83 = arith.constant 0 : index
    %c0_84 = arith.constant 0 : index
    %c0_85 = arith.constant 0 : index
    %192 = vector.load %arg18[%c0_83, %c0_84, %c0_85] : memref<2x1x256xf32, #tpu.memory_space<vmem>>, vector<1x1x256xf32>
    %193 = vector.shape_cast %192 : vector<1x1x256xf32> to vector<1x256xf32>
    %194 = vector.broadcast %193 : vector<1x256xf32> to vector<8x256xf32>
    %195 = arith.addf %191, %194 : vector<8x256xf32>
    %196 = vector.extract_strided_slice %195 {offsets = [0, 0], sizes = [8, 128], strides = [1, 1]} : vector<8x256xf32> to vector<8x128xf32>
    %197 = vector.extract_strided_slice %195 {offsets = [0, 128], sizes = [8, 128], strides = [1, 1]} : vector<8x256xf32> to vector<8x128xf32>
    %198 = vector.extract_strided_slice %188 {offsets = [0, 0], sizes = [8, 32], strides = [1, 1]} : vector<8x128xf32> to vector<8x32xf32>
    %199 = arith.truncf %198 : vector<8x32xf32> to vector<8x32xbf16>
    %200 = vector.extract_strided_slice %196 {offsets = [0, 0], sizes = [8, 32], strides = [1, 1]} : vector<8x128xf32> to vector<8x32xf32>
    %201 = arith.truncf %200 : vector<8x32xf32> to vector<8x32xbf16>
    %202 = vector.extract_strided_slice %197 {offsets = [0, 0], sizes = [8, 32], strides = [1, 1]} : vector<8x128xf32> to vector<8x32xf32>
    %203 = arith.truncf %202 : vector<8x32xf32> to vector<8x32xbf16>
    %cst_86 = arith.constant dense<0.000000e+00> : vector<8x8xf32>
    %204 = tpu.matmul %199, %201, %cst_86 {dimension_numbers = #tpu.dot_dimension_numbers<[1], [1], [0], [0], [0, 0, 1, 0], [], []>} : vector<8x32xbf16>, vector<8x32xbf16>, vector<8x8xf32> -> vector<8x8xf32>
    %cst_87 = arith.constant 0.176776692 : f32
    %205 = vector.broadcast %cst_87 : f32 to vector<8x8xf32>
    %206 = arith.mulf %204, %205 : vector<8x8xf32>
    %cst_88 = arith.constant dense<0xFF800000> : vector<8xf32>
    %207 = vector.multi_reduction <maximumf>, %206, %cst_88 [1] : vector<8x8xf32> to vector<8xf32>
    %208 = vector.shape_cast %207 : vector<8xf32> to vector<8x1xf32>
    %209 = vector.broadcast %208 : vector<8x1xf32> to vector<8x8xf32>
    %210 = arith.subf %206, %209 : vector<8x8xf32>
    %211 = math.exp %210 : vector<8x8xf32>
    %cst_89 = arith.constant dense<0.000000e+00> : vector<8xf32>
    %212 = vector.multi_reduction <add>, %211, %cst_89 [1] : vector<8x8xf32> to vector<8xf32>
    %213 = vector.shape_cast %212 : vector<8xf32> to vector<8x1xf32>
    %214 = tpu.reciprocal %213 {approx = true} : vector<8x1xf32> -> vector<8x1xf32>
    %215 = vector.broadcast %214 : vector<8x1xf32> to vector<8x8xf32>
    %216 = arith.mulf %211, %215 : vector<8x8xf32>
    %217 = arith.truncf %216 : vector<8x8xf32> to vector<8x8xbf16>
    %cst_90 = arith.constant dense<0.000000e+00> : vector<8x32xf32>
    %218 = tpu.matmul %217, %203, %cst_90 {dimension_numbers = #tpu.dot_dimension_numbers<[1], [0], [0], [1], [0, 0, 1, 1], [], []>} : vector<8x8xbf16>, vector<8x32xbf16>, vector<8x32xf32> -> vector<8x32xf32>
    %219 = vector.extract_strided_slice %188 {offsets = [0, 32], sizes = [8, 32], strides = [1, 1]} : vector<8x128xf32> to vector<8x32xf32>
    %220 = arith.truncf %219 : vector<8x32xf32> to vector<8x32xbf16>
    %221 = vector.extract_strided_slice %196 {offsets = [0, 32], sizes = [8, 32], strides = [1, 1]} : vector<8x128xf32> to vector<8x32xf32>
    %222 = arith.truncf %221 : vector<8x32xf32> to vector<8x32xbf16>
    %223 = vector.extract_strided_slice %197 {offsets = [0, 32], sizes = [8, 32], strides = [1, 1]} : vector<8x128xf32> to vector<8x32xf32>
    %224 = arith.truncf %223 : vector<8x32xf32> to vector<8x32xbf16>
    %cst_91 = arith.constant dense<0.000000e+00> : vector<8x8xf32>
    %225 = tpu.matmul %220, %222, %cst_91 {dimension_numbers = #tpu.dot_dimension_numbers<[1], [1], [0], [0], [0, 0, 1, 0], [], []>} : vector<8x32xbf16>, vector<8x32xbf16>, vector<8x8xf32> -> vector<8x8xf32>
    %cst_92 = arith.constant 0.176776692 : f32
    %226 = vector.broadcast %cst_92 : f32 to vector<8x8xf32>
    %227 = arith.mulf %225, %226 : vector<8x8xf32>
    %cst_93 = arith.constant dense<0xFF800000> : vector<8xf32>
    %228 = vector.multi_reduction <maximumf>, %227, %cst_93 [1] : vector<8x8xf32> to vector<8xf32>
    %229 = vector.shape_cast %228 : vector<8xf32> to vector<8x1xf32>
    %230 = vector.broadcast %229 : vector<8x1xf32> to vector<8x8xf32>
    %231 = arith.subf %227, %230 : vector<8x8xf32>
    %232 = math.exp %231 : vector<8x8xf32>
    %cst_94 = arith.constant dense<0.000000e+00> : vector<8xf32>
    %233 = vector.multi_reduction <add>, %232, %cst_94 [1] : vector<8x8xf32> to vector<8xf32>
    %234 = vector.shape_cast %233 : vector<8xf32> to vector<8x1xf32>
    %235 = tpu.reciprocal %234 {approx = true} : vector<8x1xf32> -> vector<8x1xf32>
    %236 = vector.broadcast %235 : vector<8x1xf32> to vector<8x8xf32>
    %237 = arith.mulf %232, %236 : vector<8x8xf32>
    %238 = arith.truncf %237 : vector<8x8xf32> to vector<8x8xbf16>
    %cst_95 = arith.constant dense<0.000000e+00> : vector<8x32xf32>
    %239 = tpu.matmul %238, %224, %cst_95 {dimension_numbers = #tpu.dot_dimension_numbers<[1], [0], [0], [1], [0, 0, 1, 1], [], []>} : vector<8x8xbf16>, vector<8x32xbf16>, vector<8x32xf32> -> vector<8x32xf32>
    %240 = vector.extract_strided_slice %188 {offsets = [0, 64], sizes = [8, 32], strides = [1, 1]} : vector<8x128xf32> to vector<8x32xf32>
    %241 = arith.truncf %240 : vector<8x32xf32> to vector<8x32xbf16>
    %242 = vector.extract_strided_slice %196 {offsets = [0, 64], sizes = [8, 32], strides = [1, 1]} : vector<8x128xf32> to vector<8x32xf32>
    %243 = arith.truncf %242 : vector<8x32xf32> to vector<8x32xbf16>
    %244 = vector.extract_strided_slice %197 {offsets = [0, 64], sizes = [8, 32], strides = [1, 1]} : vector<8x128xf32> to vector<8x32xf32>
    %245 = arith.truncf %244 : vector<8x32xf32> to vector<8x32xbf16>
    %cst_96 = arith.constant dense<0.000000e+00> : vector<8x8xf32>
    %246 = tpu.matmul %241, %243, %cst_96 {dimension_numbers = #tpu.dot_dimension_numbers<[1], [1], [0], [0], [0, 0, 1, 0], [], []>} : vector<8x32xbf16>, vector<8x32xbf16>, vector<8x8xf32> -> vector<8x8xf32>
    %cst_97 = arith.constant 0.176776692 : f32
    %247 = vector.broadcast %cst_97 : f32 to vector<8x8xf32>
    %248 = arith.mulf %246, %247 : vector<8x8xf32>
    %cst_98 = arith.constant dense<0xFF800000> : vector<8xf32>
    %249 = vector.multi_reduction <maximumf>, %248, %cst_98 [1] : vector<8x8xf32> to vector<8xf32>
    %250 = vector.shape_cast %249 : vector<8xf32> to vector<8x1xf32>
    %251 = vector.broadcast %250 : vector<8x1xf32> to vector<8x8xf32>
    %252 = arith.subf %248, %251 : vector<8x8xf32>
    %253 = math.exp %252 : vector<8x8xf32>
    %cst_99 = arith.constant dense<0.000000e+00> : vector<8xf32>
    %254 = vector.multi_reduction <add>, %253, %cst_99 [1] : vector<8x8xf32> to vector<8xf32>
    %255 = vector.shape_cast %254 : vector<8xf32> to vector<8x1xf32>
    %256 = tpu.reciprocal %255 {approx = true} : vector<8x1xf32> -> vector<8x1xf32>
    %257 = vector.broadcast %256 : vector<8x1xf32> to vector<8x8xf32>
    %258 = arith.mulf %253, %257 : vector<8x8xf32>
    %259 = arith.truncf %258 : vector<8x8xf32> to vector<8x8xbf16>
    %cst_100 = arith.constant dense<0.000000e+00> : vector<8x32xf32>
    %260 = tpu.matmul %259, %245, %cst_100 {dimension_numbers = #tpu.dot_dimension_numbers<[1], [0], [0], [1], [0, 0, 1, 1], [], []>} : vector<8x8xbf16>, vector<8x32xbf16>, vector<8x32xf32> -> vector<8x32xf32>
    %261 = vector.extract_strided_slice %188 {offsets = [0, 96], sizes = [8, 32], strides = [1, 1]} : vector<8x128xf32> to vector<8x32xf32>
    %262 = arith.truncf %261 : vector<8x32xf32> to vector<8x32xbf16>
    %263 = vector.extract_strided_slice %196 {offsets = [0, 96], sizes = [8, 32], strides = [1, 1]} : vector<8x128xf32> to vector<8x32xf32>
    %264 = arith.truncf %263 : vector<8x32xf32> to vector<8x32xbf16>
    %265 = vector.extract_strided_slice %197 {offsets = [0, 96], sizes = [8, 32], strides = [1, 1]} : vector<8x128xf32> to vector<8x32xf32>
    %266 = arith.truncf %265 : vector<8x32xf32> to vector<8x32xbf16>
    %cst_101 = arith.constant dense<0.000000e+00> : vector<8x8xf32>
    %267 = tpu.matmul %262, %264, %cst_101 {dimension_numbers = #tpu.dot_dimension_numbers<[1], [1], [0], [0], [0, 0, 1, 0], [], []>} : vector<8x32xbf16>, vector<8x32xbf16>, vector<8x8xf32> -> vector<8x8xf32>
    %cst_102 = arith.constant 0.176776692 : f32
    %268 = vector.broadcast %cst_102 : f32 to vector<8x8xf32>
    %269 = arith.mulf %267, %268 : vector<8x8xf32>
    %cst_103 = arith.constant dense<0xFF800000> : vector<8xf32>
    %270 = vector.multi_reduction <maximumf>, %269, %cst_103 [1] : vector<8x8xf32> to vector<8xf32>
    %271 = vector.shape_cast %270 : vector<8xf32> to vector<8x1xf32>
    %272 = vector.broadcast %271 : vector<8x1xf32> to vector<8x8xf32>
    %273 = arith.subf %269, %272 : vector<8x8xf32>
    %274 = math.exp %273 : vector<8x8xf32>
    %cst_104 = arith.constant dense<0.000000e+00> : vector<8xf32>
    %275 = vector.multi_reduction <add>, %274, %cst_104 [1] : vector<8x8xf32> to vector<8xf32>
    %276 = vector.shape_cast %275 : vector<8xf32> to vector<8x1xf32>
    %277 = tpu.reciprocal %276 {approx = true} : vector<8x1xf32> -> vector<8x1xf32>
    %278 = vector.broadcast %277 : vector<8x1xf32> to vector<8x8xf32>
    %279 = arith.mulf %274, %278 : vector<8x8xf32>
    %280 = arith.truncf %279 : vector<8x8xf32> to vector<8x8xbf16>
    %cst_105 = arith.constant dense<0.000000e+00> : vector<8x32xf32>
    %281 = tpu.matmul %280, %266, %cst_105 {dimension_numbers = #tpu.dot_dimension_numbers<[1], [0], [0], [1], [0, 0, 1, 1], [], []>} : vector<8x8xbf16>, vector<8x32xbf16>, vector<8x32xf32> -> vector<8x32xf32>
    %282 = tpu.concatenate %218, %239, %260, %281 in 1 : vector<8x32xf32>, vector<8x32xf32>, vector<8x32xf32>, vector<8x32xf32> -> vector<8x128xf32>
    %283 = arith.truncf %282 : vector<8x128xf32> to vector<8x128xbf16>
    %c0_106 = arith.constant 0 : index
    %c0_107 = arith.constant 0 : index
    %c0_108 = arith.constant 0 : index
    %284 = vector.load %arg19[%c0_106, %c0_107, %c0_108] : memref<2x128x128xbf16, #tpu.memory_space<vmem>>, vector<1x128x128xbf16>
    %285 = vector.shape_cast %284 : vector<1x128x128xbf16> to vector<128x128xbf16>
    %cst_109 = arith.constant dense<0.000000e+00> : vector<8x128xf32>
    %286 = tpu.matmul %283, %285, %cst_109 {dimension_numbers = #tpu.dot_dimension_numbers<[1], [0], [0], [1], [0, 0, 1, 1], [], []>} : vector<8x128xbf16>, vector<128x128xbf16>, vector<8x128xf32> -> vector<8x128xf32>
    %c0_110 = arith.constant 0 : index
    %c0_111 = arith.constant 0 : index
    %c0_112 = arith.constant 0 : index
    %287 = vector.load %arg20[%c0_110, %c0_111, %c0_112] : memref<2x1x128xf32, #tpu.memory_space<vmem>>, vector<1x1x128xf32>
    %288 = vector.shape_cast %287 : vector<1x1x128xf32> to vector<1x128xf32>
    %289 = vector.broadcast %288 : vector<1x128xf32> to vector<8x128xf32>
    %290 = arith.addf %286, %289 : vector<8x128xf32>
    %291 = arith.addf %290, %180 : vector<8x128xf32>
    %c0_113 = arith.constant 0 : index
    %c0_114 = arith.constant 0 : index
    %c0_115 = arith.constant 0 : index
    %292 = vector.load %arg21[%c0_113, %c0_114, %c0_115] : memref<2x1x128xf32, #tpu.memory_space<vmem>>, vector<1x1x128xf32>
    %293 = vector.shape_cast %292 : vector<1x1x128xf32> to vector<1x128xf32>
    %c0_116 = arith.constant 0 : index
    %c0_117 = arith.constant 0 : index
    %c0_118 = arith.constant 0 : index
    %294 = vector.load %arg22[%c0_116, %c0_117, %c0_118] : memref<2x1x128xf32, #tpu.memory_space<vmem>>, vector<1x1x128xf32>
    %295 = vector.shape_cast %294 : vector<1x1x128xf32> to vector<1x128xf32>
    %cst_119 = arith.constant dense<0.000000e+00> : vector<8xf32>
    %296 = vector.multi_reduction <add>, %291, %cst_119 [1] : vector<8x128xf32> to vector<8xf32>
    %297 = vector.shape_cast %296 : vector<8xf32> to vector<8x1xf32>
    %cst_120 = arith.constant 1.280000e+02 : f32
    %298 = vector.broadcast %cst_120 : f32 to vector<8x1xf32>
    %299 = arith.divf %297, %298 : vector<8x1xf32>
    %300 = vector.broadcast %299 : vector<8x1xf32> to vector<8x128xf32>
    %301 = arith.subf %291, %300 : vector<8x128xf32>
    %302 = arith.mulf %301, %301 : vector<8x128xf32>
    %cst_121 = arith.constant dense<0.000000e+00> : vector<8xf32>
    %303 = vector.multi_reduction <add>, %302, %cst_121 [1] : vector<8x128xf32> to vector<8xf32>
    %304 = vector.shape_cast %303 : vector<8xf32> to vector<8x1xf32>
    %cst_122 = arith.constant 1.280000e+02 : f32
    %305 = vector.broadcast %cst_122 : f32 to vector<8x1xf32>
    %306 = arith.divf %304, %305 : vector<8x1xf32>
    %307 = vector.broadcast %299 : vector<8x1xf32> to vector<8x128xf32>
    %308 = arith.subf %291, %307 : vector<8x128xf32>
    %cst_123 = arith.constant 9.99999996E-13 : f32
    %309 = vector.broadcast %cst_123 : f32 to vector<8x1xf32>
    %310 = arith.addf %306, %309 : vector<8x1xf32>
    %311 = math.rsqrt %310 : vector<8x1xf32>
    %312 = vector.broadcast %311 : vector<8x1xf32> to vector<8x128xf32>
    %313 = arith.mulf %308, %312 : vector<8x128xf32>
    %314 = vector.broadcast %293 : vector<1x128xf32> to vector<8x128xf32>
    %315 = arith.mulf %313, %314 : vector<8x128xf32>
    %316 = vector.broadcast %295 : vector<1x128xf32> to vector<8x128xf32>
    %317 = arith.addf %315, %316 : vector<8x128xf32>
    %318 = vector.broadcast %34 : vector<8x1xf32> to vector<8x128xf32>
    %319 = arith.mulf %317, %318 : vector<8x128xf32>
    %320 = arith.truncf %319 : vector<8x128xf32> to vector<8x128xbf16>
    %c0_124 = arith.constant 0 : index
    %c0_125 = arith.constant 0 : index
    %c0_126 = arith.constant 0 : index
    %321 = vector.load %arg23[%c0_124, %c0_125, %c0_126] : memref<2x128x512xbf16, #tpu.memory_space<vmem>>, vector<1x128x512xbf16>
    %322 = vector.shape_cast %321 : vector<1x128x512xbf16> to vector<128x512xbf16>
    %cst_127 = arith.constant dense<0.000000e+00> : vector<8x512xf32>
    %323 = tpu.matmul %320, %322, %cst_127 {dimension_numbers = #tpu.dot_dimension_numbers<[1], [0], [0], [1], [0, 0, 1, 1], [], []>} : vector<8x128xbf16>, vector<128x512xbf16>, vector<8x512xf32> -> vector<8x512xf32>
    %c0_128 = arith.constant 0 : index
    %c0_129 = arith.constant 0 : index
    %c0_130 = arith.constant 0 : index
    %324 = vector.load %arg24[%c0_128, %c0_129, %c0_130] : memref<2x1x512xf32, #tpu.memory_space<vmem>>, vector<1x1x512xf32>
    %325 = vector.shape_cast %324 : vector<1x1x512xf32> to vector<1x512xf32>
    %326 = vector.broadcast %325 : vector<1x512xf32> to vector<8x512xf32>
    %327 = arith.addf %323, %326 : vector<8x512xf32>
    %328 = arith.mulf %327, %327 : vector<8x512xf32>
    %329 = arith.mulf %327, %328 : vector<8x512xf32>
    %cst_131 = arith.constant 4.471500e-02 : f32
    %330 = vector.broadcast %cst_131 : f32 to vector<8x512xf32>
    %331 = arith.mulf %330, %329 : vector<8x512xf32>
    %332 = arith.addf %327, %331 : vector<8x512xf32>
    %cst_132 = arith.constant 0.797884583 : f32
    %333 = vector.broadcast %cst_132 : f32 to vector<8x512xf32>
    %334 = arith.mulf %333, %332 : vector<8x512xf32>
    %335 = math.tanh %334 : vector<8x512xf32>
    %cst_133 = arith.constant 1.000000e+00 : f32
    %336 = vector.broadcast %cst_133 : f32 to vector<8x512xf32>
    %337 = arith.addf %336, %335 : vector<8x512xf32>
    %cst_134 = arith.constant 5.000000e-01 : f32
    %338 = vector.broadcast %cst_134 : f32 to vector<8x512xf32>
    %339 = arith.mulf %338, %337 : vector<8x512xf32>
    %340 = arith.mulf %327, %339 : vector<8x512xf32>
    %341 = arith.truncf %340 : vector<8x512xf32> to vector<8x512xbf16>
    %c0_135 = arith.constant 0 : index
    %c0_136 = arith.constant 0 : index
    %c0_137 = arith.constant 0 : index
    %342 = vector.load %arg25[%c0_135, %c0_136, %c0_137] : memref<2x512x128xbf16, #tpu.memory_space<vmem>>, vector<1x512x128xbf16>
    %343 = vector.shape_cast %342 : vector<1x512x128xbf16> to vector<512x128xbf16>
    %cst_138 = arith.constant dense<0.000000e+00> : vector<8x128xf32>
    %344 = tpu.matmul %341, %343, %cst_138 {dimension_numbers = #tpu.dot_dimension_numbers<[1], [0], [0], [1], [0, 0, 1, 1], [], []>} : vector<8x512xbf16>, vector<512x128xbf16>, vector<8x128xf32> -> vector<8x128xf32>
    %c0_139 = arith.constant 0 : index
    %c0_140 = arith.constant 0 : index
    %c0_141 = arith.constant 0 : index
    %345 = vector.load %arg26[%c0_139, %c0_140, %c0_141] : memref<2x1x128xf32, #tpu.memory_space<vmem>>, vector<1x1x128xf32>
    %346 = vector.shape_cast %345 : vector<1x1x128xf32> to vector<1x128xf32>
    %347 = vector.broadcast %346 : vector<1x128xf32> to vector<8x128xf32>
    %348 = arith.addf %344, %347 : vector<8x128xf32>
    %349 = arith.addf %348, %319 : vector<8x128xf32>
    %c0_142 = arith.constant 0 : index
    %c0_143 = arith.constant 0 : index
    %c0_144 = arith.constant 0 : index
    %350 = vector.load %arg27[%c0_142, %c0_143, %c0_144] : memref<2x1x128xf32, #tpu.memory_space<vmem>>, vector<1x1x128xf32>
    %351 = vector.shape_cast %350 : vector<1x1x128xf32> to vector<1x128xf32>
    %c0_145 = arith.constant 0 : index
    %c0_146 = arith.constant 0 : index
    %c0_147 = arith.constant 0 : index
    %352 = vector.load %arg28[%c0_145, %c0_146, %c0_147] : memref<2x1x128xf32, #tpu.memory_space<vmem>>, vector<1x1x128xf32>
    %353 = vector.shape_cast %352 : vector<1x1x128xf32> to vector<1x128xf32>
    %cst_148 = arith.constant dense<0.000000e+00> : vector<8xf32>
    %354 = vector.multi_reduction <add>, %349, %cst_148 [1] : vector<8x128xf32> to vector<8xf32>
    %355 = vector.shape_cast %354 : vector<8xf32> to vector<8x1xf32>
    %cst_149 = arith.constant 1.280000e+02 : f32
    %356 = vector.broadcast %cst_149 : f32 to vector<8x1xf32>
    %357 = arith.divf %355, %356 : vector<8x1xf32>
    %358 = vector.broadcast %357 : vector<8x1xf32> to vector<8x128xf32>
    %359 = arith.subf %349, %358 : vector<8x128xf32>
    %360 = arith.mulf %359, %359 : vector<8x128xf32>
    %cst_150 = arith.constant dense<0.000000e+00> : vector<8xf32>
    %361 = vector.multi_reduction <add>, %360, %cst_150 [1] : vector<8x128xf32> to vector<8xf32>
    %362 = vector.shape_cast %361 : vector<8xf32> to vector<8x1xf32>
    %cst_151 = arith.constant 1.280000e+02 : f32
    %363 = vector.broadcast %cst_151 : f32 to vector<8x1xf32>
    %364 = arith.divf %362, %363 : vector<8x1xf32>
    %365 = vector.broadcast %357 : vector<8x1xf32> to vector<8x128xf32>
    %366 = arith.subf %349, %365 : vector<8x128xf32>
    %cst_152 = arith.constant 9.99999996E-13 : f32
    %367 = vector.broadcast %cst_152 : f32 to vector<8x1xf32>
    %368 = arith.addf %364, %367 : vector<8x1xf32>
    %369 = math.rsqrt %368 : vector<8x1xf32>
    %370 = vector.broadcast %369 : vector<8x1xf32> to vector<8x128xf32>
    %371 = arith.mulf %366, %370 : vector<8x128xf32>
    %372 = vector.broadcast %351 : vector<1x128xf32> to vector<8x128xf32>
    %373 = arith.mulf %371, %372 : vector<8x128xf32>
    %374 = vector.broadcast %353 : vector<1x128xf32> to vector<8x128xf32>
    %375 = arith.addf %373, %374 : vector<8x128xf32>
    %376 = vector.broadcast %34 : vector<8x1xf32> to vector<8x128xf32>
    %377 = arith.mulf %375, %376 : vector<8x128xf32>
    %378 = arith.truncf %377 : vector<8x128xf32> to vector<8x128xbf16>
    %c1 = arith.constant 1 : index
    %c0_153 = arith.constant 0 : index
    %c0_154 = arith.constant 0 : index
    %379 = vector.load %arg9[%c1, %c0_153, %c0_154] : memref<2x128x384xbf16, #tpu.memory_space<vmem>>, vector<1x128x384xbf16>
    %380 = vector.shape_cast %379 : vector<1x128x384xbf16> to vector<128x384xbf16>
    %cst_155 = arith.constant dense<0.000000e+00> : vector<8x384xf32>
    %381 = tpu.matmul %378, %380, %cst_155 {dimension_numbers = #tpu.dot_dimension_numbers<[1], [0], [0], [1], [0, 0, 1, 1], [], []>} : vector<8x128xbf16>, vector<128x384xbf16>, vector<8x384xf32> -> vector<8x384xf32>
    %c1_156 = arith.constant 1 : index
    %c0_157 = arith.constant 0 : index
    %c0_158 = arith.constant 0 : index
    %382 = vector.load %arg10[%c1_156, %c0_157, %c0_158] : memref<2x1x384xf32, #tpu.memory_space<vmem>>, vector<1x1x384xf32>
    %383 = vector.shape_cast %382 : vector<1x1x384xf32> to vector<1x384xf32>
    %384 = vector.broadcast %383 : vector<1x384xf32> to vector<8x384xf32>
    %385 = arith.addf %381, %384 : vector<8x384xf32>
    %386 = vector.extract_strided_slice %385 {offsets = [0, 0], sizes = [8, 128], strides = [1, 1]} : vector<8x384xf32> to vector<8x128xf32>
    %387 = vector.extract_strided_slice %385 {offsets = [0, 128], sizes = [8, 128], strides = [1, 1]} : vector<8x384xf32> to vector<8x128xf32>
    %388 = vector.extract_strided_slice %385 {offsets = [0, 256], sizes = [8, 128], strides = [1, 1]} : vector<8x384xf32> to vector<8x128xf32>
    %389 = vector.extract_strided_slice %386 {offsets = [0, 0], sizes = [8, 32], strides = [1, 1]} : vector<8x128xf32> to vector<8x32xf32>
    %390 = arith.truncf %389 : vector<8x32xf32> to vector<8x32xbf16>
    %391 = vector.extract_strided_slice %387 {offsets = [0, 0], sizes = [8, 32], strides = [1, 1]} : vector<8x128xf32> to vector<8x32xf32>
    %392 = arith.truncf %391 : vector<8x32xf32> to vector<8x32xbf16>
    %393 = vector.extract_strided_slice %388 {offsets = [0, 0], sizes = [8, 32], strides = [1, 1]} : vector<8x128xf32> to vector<8x32xf32>
    %394 = arith.truncf %393 : vector<8x32xf32> to vector<8x32xbf16>
    %cst_159 = arith.constant dense<0.000000e+00> : vector<8x8xf32>
    %395 = tpu.matmul %390, %392, %cst_159 {dimension_numbers = #tpu.dot_dimension_numbers<[1], [1], [0], [0], [0, 0, 1, 0], [], []>} : vector<8x32xbf16>, vector<8x32xbf16>, vector<8x8xf32> -> vector<8x8xf32>
    %cst_160 = arith.constant 0.176776692 : f32
    %396 = vector.broadcast %cst_160 : f32 to vector<8x8xf32>
    %397 = arith.mulf %395, %396 : vector<8x8xf32>
    %398 = vector.broadcast %36 : vector<1x8xf32> to vector<8x8xf32>
    %399 = arith.addf %397, %398 : vector<8x8xf32>
    %cst_161 = arith.constant dense<0xFF800000> : vector<8xf32>
    %400 = vector.multi_reduction <maximumf>, %399, %cst_161 [1] : vector<8x8xf32> to vector<8xf32>
    %401 = vector.shape_cast %400 : vector<8xf32> to vector<8x1xf32>
    %402 = vector.broadcast %401 : vector<8x1xf32> to vector<8x8xf32>
    %403 = arith.subf %399, %402 : vector<8x8xf32>
    %404 = math.exp %403 : vector<8x8xf32>
    %cst_162 = arith.constant dense<0.000000e+00> : vector<8xf32>
    %405 = vector.multi_reduction <add>, %404, %cst_162 [1] : vector<8x8xf32> to vector<8xf32>
    %406 = vector.shape_cast %405 : vector<8xf32> to vector<8x1xf32>
    %407 = tpu.reciprocal %406 {approx = true} : vector<8x1xf32> -> vector<8x1xf32>
    %408 = vector.broadcast %407 : vector<8x1xf32> to vector<8x8xf32>
    %409 = arith.mulf %404, %408 : vector<8x8xf32>
    %410 = arith.truncf %409 : vector<8x8xf32> to vector<8x8xbf16>
    %cst_163 = arith.constant dense<0.000000e+00> : vector<8x32xf32>
    %411 = tpu.matmul %410, %394, %cst_163 {dimension_numbers = #tpu.dot_dimension_numbers<[1], [0], [0], [1], [0, 0, 1, 1], [], []>} : vector<8x8xbf16>, vector<8x32xbf16>, vector<8x32xf32> -> vector<8x32xf32>
    %412 = vector.extract_strided_slice %386 {offsets = [0, 32], sizes = [8, 32], strides = [1, 1]} : vector<8x128xf32> to vector<8x32xf32>
    %413 = arith.truncf %412 : vector<8x32xf32> to vector<8x32xbf16>
    %414 = vector.extract_strided_slice %387 {offsets = [0, 32], sizes = [8, 32], strides = [1, 1]} : vector<8x128xf32> to vector<8x32xf32>
    %415 = arith.truncf %414 : vector<8x32xf32> to vector<8x32xbf16>
    %416 = vector.extract_strided_slice %388 {offsets = [0, 32], sizes = [8, 32], strides = [1, 1]} : vector<8x128xf32> to vector<8x32xf32>
    %417 = arith.truncf %416 : vector<8x32xf32> to vector<8x32xbf16>
    %cst_164 = arith.constant dense<0.000000e+00> : vector<8x8xf32>
    %418 = tpu.matmul %413, %415, %cst_164 {dimension_numbers = #tpu.dot_dimension_numbers<[1], [1], [0], [0], [0, 0, 1, 0], [], []>} : vector<8x32xbf16>, vector<8x32xbf16>, vector<8x8xf32> -> vector<8x8xf32>
    %cst_165 = arith.constant 0.176776692 : f32
    %419 = vector.broadcast %cst_165 : f32 to vector<8x8xf32>
    %420 = arith.mulf %418, %419 : vector<8x8xf32>
    %421 = vector.broadcast %36 : vector<1x8xf32> to vector<8x8xf32>
    %422 = arith.addf %420, %421 : vector<8x8xf32>
    %cst_166 = arith.constant dense<0xFF800000> : vector<8xf32>
    %423 = vector.multi_reduction <maximumf>, %422, %cst_166 [1] : vector<8x8xf32> to vector<8xf32>
    %424 = vector.shape_cast %423 : vector<8xf32> to vector<8x1xf32>
    %425 = vector.broadcast %424 : vector<8x1xf32> to vector<8x8xf32>
    %426 = arith.subf %422, %425 : vector<8x8xf32>
    %427 = math.exp %426 : vector<8x8xf32>
    %cst_167 = arith.constant dense<0.000000e+00> : vector<8xf32>
    %428 = vector.multi_reduction <add>, %427, %cst_167 [1] : vector<8x8xf32> to vector<8xf32>
    %429 = vector.shape_cast %428 : vector<8xf32> to vector<8x1xf32>
    %430 = tpu.reciprocal %429 {approx = true} : vector<8x1xf32> -> vector<8x1xf32>
    %431 = vector.broadcast %430 : vector<8x1xf32> to vector<8x8xf32>
    %432 = arith.mulf %427, %431 : vector<8x8xf32>
    %433 = arith.truncf %432 : vector<8x8xf32> to vector<8x8xbf16>
    %cst_168 = arith.constant dense<0.000000e+00> : vector<8x32xf32>
    %434 = tpu.matmul %433, %417, %cst_168 {dimension_numbers = #tpu.dot_dimension_numbers<[1], [0], [0], [1], [0, 0, 1, 1], [], []>} : vector<8x8xbf16>, vector<8x32xbf16>, vector<8x32xf32> -> vector<8x32xf32>
    %435 = vector.extract_strided_slice %386 {offsets = [0, 64], sizes = [8, 32], strides = [1, 1]} : vector<8x128xf32> to vector<8x32xf32>
    %436 = arith.truncf %435 : vector<8x32xf32> to vector<8x32xbf16>
    %437 = vector.extract_strided_slice %387 {offsets = [0, 64], sizes = [8, 32], strides = [1, 1]} : vector<8x128xf32> to vector<8x32xf32>
    %438 = arith.truncf %437 : vector<8x32xf32> to vector<8x32xbf16>
    %439 = vector.extract_strided_slice %388 {offsets = [0, 64], sizes = [8, 32], strides = [1, 1]} : vector<8x128xf32> to vector<8x32xf32>
    %440 = arith.truncf %439 : vector<8x32xf32> to vector<8x32xbf16>
    %cst_169 = arith.constant dense<0.000000e+00> : vector<8x8xf32>
    %441 = tpu.matmul %436, %438, %cst_169 {dimension_numbers = #tpu.dot_dimension_numbers<[1], [1], [0], [0], [0, 0, 1, 0], [], []>} : vector<8x32xbf16>, vector<8x32xbf16>, vector<8x8xf32> -> vector<8x8xf32>
    %cst_170 = arith.constant 0.176776692 : f32
    %442 = vector.broadcast %cst_170 : f32 to vector<8x8xf32>
    %443 = arith.mulf %441, %442 : vector<8x8xf32>
    %444 = vector.broadcast %36 : vector<1x8xf32> to vector<8x8xf32>
    %445 = arith.addf %443, %444 : vector<8x8xf32>
    %cst_171 = arith.constant dense<0xFF800000> : vector<8xf32>
    %446 = vector.multi_reduction <maximumf>, %445, %cst_171 [1] : vector<8x8xf32> to vector<8xf32>
    %447 = vector.shape_cast %446 : vector<8xf32> to vector<8x1xf32>
    %448 = vector.broadcast %447 : vector<8x1xf32> to vector<8x8xf32>
    %449 = arith.subf %445, %448 : vector<8x8xf32>
    %450 = math.exp %449 : vector<8x8xf32>
    %cst_172 = arith.constant dense<0.000000e+00> : vector<8xf32>
    %451 = vector.multi_reduction <add>, %450, %cst_172 [1] : vector<8x8xf32> to vector<8xf32>
    %452 = vector.shape_cast %451 : vector<8xf32> to vector<8x1xf32>
    %453 = tpu.reciprocal %452 {approx = true} : vector<8x1xf32> -> vector<8x1xf32>
    %454 = vector.broadcast %453 : vector<8x1xf32> to vector<8x8xf32>
    %455 = arith.mulf %450, %454 : vector<8x8xf32>
    %456 = arith.truncf %455 : vector<8x8xf32> to vector<8x8xbf16>
    %cst_173 = arith.constant dense<0.000000e+00> : vector<8x32xf32>
    %457 = tpu.matmul %456, %440, %cst_173 {dimension_numbers = #tpu.dot_dimension_numbers<[1], [0], [0], [1], [0, 0, 1, 1], [], []>} : vector<8x8xbf16>, vector<8x32xbf16>, vector<8x32xf32> -> vector<8x32xf32>
    %458 = vector.extract_strided_slice %386 {offsets = [0, 96], sizes = [8, 32], strides = [1, 1]} : vector<8x128xf32> to vector<8x32xf32>
    %459 = arith.truncf %458 : vector<8x32xf32> to vector<8x32xbf16>
    %460 = vector.extract_strided_slice %387 {offsets = [0, 96], sizes = [8, 32], strides = [1, 1]} : vector<8x128xf32> to vector<8x32xf32>
    %461 = arith.truncf %460 : vector<8x32xf32> to vector<8x32xbf16>
    %462 = vector.extract_strided_slice %388 {offsets = [0, 96], sizes = [8, 32], strides = [1, 1]} : vector<8x128xf32> to vector<8x32xf32>
    %463 = arith.truncf %462 : vector<8x32xf32> to vector<8x32xbf16>
    %cst_174 = arith.constant dense<0.000000e+00> : vector<8x8xf32>
    %464 = tpu.matmul %459, %461, %cst_174 {dimension_numbers = #tpu.dot_dimension_numbers<[1], [1], [0], [0], [0, 0, 1, 0], [], []>} : vector<8x32xbf16>, vector<8x32xbf16>, vector<8x8xf32> -> vector<8x8xf32>
    %cst_175 = arith.constant 0.176776692 : f32
    %465 = vector.broadcast %cst_175 : f32 to vector<8x8xf32>
    %466 = arith.mulf %464, %465 : vector<8x8xf32>
    %467 = vector.broadcast %36 : vector<1x8xf32> to vector<8x8xf32>
    %468 = arith.addf %466, %467 : vector<8x8xf32>
    %cst_176 = arith.constant dense<0xFF800000> : vector<8xf32>
    %469 = vector.multi_reduction <maximumf>, %468, %cst_176 [1] : vector<8x8xf32> to vector<8xf32>
    %470 = vector.shape_cast %469 : vector<8xf32> to vector<8x1xf32>
    %471 = vector.broadcast %470 : vector<8x1xf32> to vector<8x8xf32>
    %472 = arith.subf %468, %471 : vector<8x8xf32>
    %473 = math.exp %472 : vector<8x8xf32>
    %cst_177 = arith.constant dense<0.000000e+00> : vector<8xf32>
    %474 = vector.multi_reduction <add>, %473, %cst_177 [1] : vector<8x8xf32> to vector<8xf32>
    %475 = vector.shape_cast %474 : vector<8xf32> to vector<8x1xf32>
    %476 = tpu.reciprocal %475 {approx = true} : vector<8x1xf32> -> vector<8x1xf32>
    %477 = vector.broadcast %476 : vector<8x1xf32> to vector<8x8xf32>
    %478 = arith.mulf %473, %477 : vector<8x8xf32>
    %479 = arith.truncf %478 : vector<8x8xf32> to vector<8x8xbf16>
    %cst_178 = arith.constant dense<0.000000e+00> : vector<8x32xf32>
    %480 = tpu.matmul %479, %463, %cst_178 {dimension_numbers = #tpu.dot_dimension_numbers<[1], [0], [0], [1], [0, 0, 1, 1], [], []>} : vector<8x8xbf16>, vector<8x32xbf16>, vector<8x32xf32> -> vector<8x32xf32>
    %481 = tpu.concatenate %411, %434, %457, %480 in 1 : vector<8x32xf32>, vector<8x32xf32>, vector<8x32xf32>, vector<8x32xf32> -> vector<8x128xf32>
    %482 = arith.truncf %481 : vector<8x128xf32> to vector<8x128xbf16>
    %c1_179 = arith.constant 1 : index
    %c0_180 = arith.constant 0 : index
    %c0_181 = arith.constant 0 : index
    %483 = vector.load %arg11[%c1_179, %c0_180, %c0_181] : memref<2x128x128xbf16, #tpu.memory_space<vmem>>, vector<1x128x128xbf16>
    %484 = vector.shape_cast %483 : vector<1x128x128xbf16> to vector<128x128xbf16>
    %cst_182 = arith.constant dense<0.000000e+00> : vector<8x128xf32>
    %485 = tpu.matmul %482, %484, %cst_182 {dimension_numbers = #tpu.dot_dimension_numbers<[1], [0], [0], [1], [0, 0, 1, 1], [], []>} : vector<8x128xbf16>, vector<128x128xbf16>, vector<8x128xf32> -> vector<8x128xf32>
    %c1_183 = arith.constant 1 : index
    %c0_184 = arith.constant 0 : index
    %c0_185 = arith.constant 0 : index
    %486 = vector.load %arg12[%c1_183, %c0_184, %c0_185] : memref<2x1x128xf32, #tpu.memory_space<vmem>>, vector<1x1x128xf32>
    %487 = vector.shape_cast %486 : vector<1x1x128xf32> to vector<1x128xf32>
    %488 = vector.broadcast %487 : vector<1x128xf32> to vector<8x128xf32>
    %489 = arith.addf %485, %488 : vector<8x128xf32>
    %490 = arith.addf %489, %377 : vector<8x128xf32>
    %c1_186 = arith.constant 1 : index
    %c0_187 = arith.constant 0 : index
    %c0_188 = arith.constant 0 : index
    %491 = vector.load %arg13[%c1_186, %c0_187, %c0_188] : memref<2x1x128xf32, #tpu.memory_space<vmem>>, vector<1x1x128xf32>
    %492 = vector.shape_cast %491 : vector<1x1x128xf32> to vector<1x128xf32>
    %c1_189 = arith.constant 1 : index
    %c0_190 = arith.constant 0 : index
    %c0_191 = arith.constant 0 : index
    %493 = vector.load %arg14[%c1_189, %c0_190, %c0_191] : memref<2x1x128xf32, #tpu.memory_space<vmem>>, vector<1x1x128xf32>
    %494 = vector.shape_cast %493 : vector<1x1x128xf32> to vector<1x128xf32>
    %cst_192 = arith.constant dense<0.000000e+00> : vector<8xf32>
    %495 = vector.multi_reduction <add>, %490, %cst_192 [1] : vector<8x128xf32> to vector<8xf32>
    %496 = vector.shape_cast %495 : vector<8xf32> to vector<8x1xf32>
    %cst_193 = arith.constant 1.280000e+02 : f32
    %497 = vector.broadcast %cst_193 : f32 to vector<8x1xf32>
    %498 = arith.divf %496, %497 : vector<8x1xf32>
    %499 = vector.broadcast %498 : vector<8x1xf32> to vector<8x128xf32>
    %500 = arith.subf %490, %499 : vector<8x128xf32>
    %501 = arith.mulf %500, %500 : vector<8x128xf32>
    %cst_194 = arith.constant dense<0.000000e+00> : vector<8xf32>
    %502 = vector.multi_reduction <add>, %501, %cst_194 [1] : vector<8x128xf32> to vector<8xf32>
    %503 = vector.shape_cast %502 : vector<8xf32> to vector<8x1xf32>
    %cst_195 = arith.constant 1.280000e+02 : f32
    %504 = vector.broadcast %cst_195 : f32 to vector<8x1xf32>
    %505 = arith.divf %503, %504 : vector<8x1xf32>
    %506 = vector.broadcast %498 : vector<8x1xf32> to vector<8x128xf32>
    %507 = arith.subf %490, %506 : vector<8x128xf32>
    %cst_196 = arith.constant 9.99999996E-13 : f32
    %508 = vector.broadcast %cst_196 : f32 to vector<8x1xf32>
    %509 = arith.addf %505, %508 : vector<8x1xf32>
    %510 = math.rsqrt %509 : vector<8x1xf32>
    %511 = vector.broadcast %510 : vector<8x1xf32> to vector<8x128xf32>
    %512 = arith.mulf %507, %511 : vector<8x128xf32>
    %513 = vector.broadcast %492 : vector<1x128xf32> to vector<8x128xf32>
    %514 = arith.mulf %512, %513 : vector<8x128xf32>
    %515 = vector.broadcast %494 : vector<1x128xf32> to vector<8x128xf32>
    %516 = arith.addf %514, %515 : vector<8x128xf32>
    %517 = vector.broadcast %34 : vector<8x1xf32> to vector<8x128xf32>
    %518 = arith.mulf %516, %517 : vector<8x128xf32>
    %519 = arith.truncf %518 : vector<8x128xf32> to vector<8x128xbf16>
    %c1_197 = arith.constant 1 : index
    %c0_198 = arith.constant 0 : index
    %c0_199 = arith.constant 0 : index
    %520 = vector.load %arg15[%c1_197, %c0_198, %c0_199] : memref<2x128x128xbf16, #tpu.memory_space<vmem>>, vector<1x128x128xbf16>
    %521 = vector.shape_cast %520 : vector<1x128x128xbf16> to vector<128x128xbf16>
    %cst_200 = arith.constant dense<0.000000e+00> : vector<8x128xf32>
    %522 = tpu.matmul %519, %521, %cst_200 {dimension_numbers = #tpu.dot_dimension_numbers<[1], [0], [0], [1], [0, 0, 1, 1], [], []>} : vector<8x128xbf16>, vector<128x128xbf16>, vector<8x128xf32> -> vector<8x128xf32>
    %c1_201 = arith.constant 1 : index
    %c0_202 = arith.constant 0 : index
    %c0_203 = arith.constant 0 : index
    %523 = vector.load %arg16[%c1_201, %c0_202, %c0_203] : memref<2x1x128xf32, #tpu.memory_space<vmem>>, vector<1x1x128xf32>
    %524 = vector.shape_cast %523 : vector<1x1x128xf32> to vector<1x128xf32>
    %525 = vector.broadcast %524 : vector<1x128xf32> to vector<8x128xf32>
    %526 = arith.addf %522, %525 : vector<8x128xf32>
    %c1_204 = arith.constant 1 : index
    %c0_205 = arith.constant 0 : index
    %c0_206 = arith.constant 0 : index
    %527 = vector.load %arg17[%c1_204, %c0_205, %c0_206] : memref<2x128x256xbf16, #tpu.memory_space<vmem>>, vector<1x128x256xbf16>
    %528 = vector.shape_cast %527 : vector<1x128x256xbf16> to vector<128x256xbf16>
    %cst_207 = arith.constant dense<0.000000e+00> : vector<8x256xf32>
    %529 = tpu.matmul %39, %528, %cst_207 {dimension_numbers = #tpu.dot_dimension_numbers<[1], [0], [0], [1], [0, 0, 1, 1], [], []>} : vector<8x128xbf16>, vector<128x256xbf16>, vector<8x256xf32> -> vector<8x256xf32>
    %c1_208 = arith.constant 1 : index
    %c0_209 = arith.constant 0 : index
    %c0_210 = arith.constant 0 : index
    %530 = vector.load %arg18[%c1_208, %c0_209, %c0_210] : memref<2x1x256xf32, #tpu.memory_space<vmem>>, vector<1x1x256xf32>
    %531 = vector.shape_cast %530 : vector<1x1x256xf32> to vector<1x256xf32>
    %532 = vector.broadcast %531 : vector<1x256xf32> to vector<8x256xf32>
    %533 = arith.addf %529, %532 : vector<8x256xf32>
    %534 = vector.extract_strided_slice %533 {offsets = [0, 0], sizes = [8, 128], strides = [1, 1]} : vector<8x256xf32> to vector<8x128xf32>
    %535 = vector.extract_strided_slice %533 {offsets = [0, 128], sizes = [8, 128], strides = [1, 1]} : vector<8x256xf32> to vector<8x128xf32>
    %536 = vector.extract_strided_slice %526 {offsets = [0, 0], sizes = [8, 32], strides = [1, 1]} : vector<8x128xf32> to vector<8x32xf32>
    %537 = arith.truncf %536 : vector<8x32xf32> to vector<8x32xbf16>
    %538 = vector.extract_strided_slice %534 {offsets = [0, 0], sizes = [8, 32], strides = [1, 1]} : vector<8x128xf32> to vector<8x32xf32>
    %539 = arith.truncf %538 : vector<8x32xf32> to vector<8x32xbf16>
    %540 = vector.extract_strided_slice %535 {offsets = [0, 0], sizes = [8, 32], strides = [1, 1]} : vector<8x128xf32> to vector<8x32xf32>
    %541 = arith.truncf %540 : vector<8x32xf32> to vector<8x32xbf16>
    %cst_211 = arith.constant dense<0.000000e+00> : vector<8x8xf32>
    %542 = tpu.matmul %537, %539, %cst_211 {dimension_numbers = #tpu.dot_dimension_numbers<[1], [1], [0], [0], [0, 0, 1, 0], [], []>} : vector<8x32xbf16>, vector<8x32xbf16>, vector<8x8xf32> -> vector<8x8xf32>
    %cst_212 = arith.constant 0.176776692 : f32
    %543 = vector.broadcast %cst_212 : f32 to vector<8x8xf32>
    %544 = arith.mulf %542, %543 : vector<8x8xf32>
    %cst_213 = arith.constant dense<0xFF800000> : vector<8xf32>
    %545 = vector.multi_reduction <maximumf>, %544, %cst_213 [1] : vector<8x8xf32> to vector<8xf32>
    %546 = vector.shape_cast %545 : vector<8xf32> to vector<8x1xf32>
    %547 = vector.broadcast %546 : vector<8x1xf32> to vector<8x8xf32>
    %548 = arith.subf %544, %547 : vector<8x8xf32>
    %549 = math.exp %548 : vector<8x8xf32>
    %cst_214 = arith.constant dense<0.000000e+00> : vector<8xf32>
    %550 = vector.multi_reduction <add>, %549, %cst_214 [1] : vector<8x8xf32> to vector<8xf32>
    %551 = vector.shape_cast %550 : vector<8xf32> to vector<8x1xf32>
    %552 = tpu.reciprocal %551 {approx = true} : vector<8x1xf32> -> vector<8x1xf32>
    %553 = vector.broadcast %552 : vector<8x1xf32> to vector<8x8xf32>
    %554 = arith.mulf %549, %553 : vector<8x8xf32>
    %555 = arith.truncf %554 : vector<8x8xf32> to vector<8x8xbf16>
    %cst_215 = arith.constant dense<0.000000e+00> : vector<8x32xf32>
    %556 = tpu.matmul %555, %541, %cst_215 {dimension_numbers = #tpu.dot_dimension_numbers<[1], [0], [0], [1], [0, 0, 1, 1], [], []>} : vector<8x8xbf16>, vector<8x32xbf16>, vector<8x32xf32> -> vector<8x32xf32>
    %557 = vector.extract_strided_slice %526 {offsets = [0, 32], sizes = [8, 32], strides = [1, 1]} : vector<8x128xf32> to vector<8x32xf32>
    %558 = arith.truncf %557 : vector<8x32xf32> to vector<8x32xbf16>
    %559 = vector.extract_strided_slice %534 {offsets = [0, 32], sizes = [8, 32], strides = [1, 1]} : vector<8x128xf32> to vector<8x32xf32>
    %560 = arith.truncf %559 : vector<8x32xf32> to vector<8x32xbf16>
    %561 = vector.extract_strided_slice %535 {offsets = [0, 32], sizes = [8, 32], strides = [1, 1]} : vector<8x128xf32> to vector<8x32xf32>
    %562 = arith.truncf %561 : vector<8x32xf32> to vector<8x32xbf16>
    %cst_216 = arith.constant dense<0.000000e+00> : vector<8x8xf32>
    %563 = tpu.matmul %558, %560, %cst_216 {dimension_numbers = #tpu.dot_dimension_numbers<[1], [1], [0], [0], [0, 0, 1, 0], [], []>} : vector<8x32xbf16>, vector<8x32xbf16>, vector<8x8xf32> -> vector<8x8xf32>
    %cst_217 = arith.constant 0.176776692 : f32
    %564 = vector.broadcast %cst_217 : f32 to vector<8x8xf32>
    %565 = arith.mulf %563, %564 : vector<8x8xf32>
    %cst_218 = arith.constant dense<0xFF800000> : vector<8xf32>
    %566 = vector.multi_reduction <maximumf>, %565, %cst_218 [1] : vector<8x8xf32> to vector<8xf32>
    %567 = vector.shape_cast %566 : vector<8xf32> to vector<8x1xf32>
    %568 = vector.broadcast %567 : vector<8x1xf32> to vector<8x8xf32>
    %569 = arith.subf %565, %568 : vector<8x8xf32>
    %570 = math.exp %569 : vector<8x8xf32>
    %cst_219 = arith.constant dense<0.000000e+00> : vector<8xf32>
    %571 = vector.multi_reduction <add>, %570, %cst_219 [1] : vector<8x8xf32> to vector<8xf32>
    %572 = vector.shape_cast %571 : vector<8xf32> to vector<8x1xf32>
    %573 = tpu.reciprocal %572 {approx = true} : vector<8x1xf32> -> vector<8x1xf32>
    %574 = vector.broadcast %573 : vector<8x1xf32> to vector<8x8xf32>
    %575 = arith.mulf %570, %574 : vector<8x8xf32>
    %576 = arith.truncf %575 : vector<8x8xf32> to vector<8x8xbf16>
    %cst_220 = arith.constant dense<0.000000e+00> : vector<8x32xf32>
    %577 = tpu.matmul %576, %562, %cst_220 {dimension_numbers = #tpu.dot_dimension_numbers<[1], [0], [0], [1], [0, 0, 1, 1], [], []>} : vector<8x8xbf16>, vector<8x32xbf16>, vector<8x32xf32> -> vector<8x32xf32>
    %578 = vector.extract_strided_slice %526 {offsets = [0, 64], sizes = [8, 32], strides = [1, 1]} : vector<8x128xf32> to vector<8x32xf32>
    %579 = arith.truncf %578 : vector<8x32xf32> to vector<8x32xbf16>
    %580 = vector.extract_strided_slice %534 {offsets = [0, 64], sizes = [8, 32], strides = [1, 1]} : vector<8x128xf32> to vector<8x32xf32>
    %581 = arith.truncf %580 : vector<8x32xf32> to vector<8x32xbf16>
    %582 = vector.extract_strided_slice %535 {offsets = [0, 64], sizes = [8, 32], strides = [1, 1]} : vector<8x128xf32> to vector<8x32xf32>
    %583 = arith.truncf %582 : vector<8x32xf32> to vector<8x32xbf16>
    %cst_221 = arith.constant dense<0.000000e+00> : vector<8x8xf32>
    %584 = tpu.matmul %579, %581, %cst_221 {dimension_numbers = #tpu.dot_dimension_numbers<[1], [1], [0], [0], [0, 0, 1, 0], [], []>} : vector<8x32xbf16>, vector<8x32xbf16>, vector<8x8xf32> -> vector<8x8xf32>
    %cst_222 = arith.constant 0.176776692 : f32
    %585 = vector.broadcast %cst_222 : f32 to vector<8x8xf32>
    %586 = arith.mulf %584, %585 : vector<8x8xf32>
    %cst_223 = arith.constant dense<0xFF800000> : vector<8xf32>
    %587 = vector.multi_reduction <maximumf>, %586, %cst_223 [1] : vector<8x8xf32> to vector<8xf32>
    %588 = vector.shape_cast %587 : vector<8xf32> to vector<8x1xf32>
    %589 = vector.broadcast %588 : vector<8x1xf32> to vector<8x8xf32>
    %590 = arith.subf %586, %589 : vector<8x8xf32>
    %591 = math.exp %590 : vector<8x8xf32>
    %cst_224 = arith.constant dense<0.000000e+00> : vector<8xf32>
    %592 = vector.multi_reduction <add>, %591, %cst_224 [1] : vector<8x8xf32> to vector<8xf32>
    %593 = vector.shape_cast %592 : vector<8xf32> to vector<8x1xf32>
    %594 = tpu.reciprocal %593 {approx = true} : vector<8x1xf32> -> vector<8x1xf32>
    %595 = vector.broadcast %594 : vector<8x1xf32> to vector<8x8xf32>
    %596 = arith.mulf %591, %595 : vector<8x8xf32>
    %597 = arith.truncf %596 : vector<8x8xf32> to vector<8x8xbf16>
    %cst_225 = arith.constant dense<0.000000e+00> : vector<8x32xf32>
    %598 = tpu.matmul %597, %583, %cst_225 {dimension_numbers = #tpu.dot_dimension_numbers<[1], [0], [0], [1], [0, 0, 1, 1], [], []>} : vector<8x8xbf16>, vector<8x32xbf16>, vector<8x32xf32> -> vector<8x32xf32>
    %599 = vector.extract_strided_slice %526 {offsets = [0, 96], sizes = [8, 32], strides = [1, 1]} : vector<8x128xf32> to vector<8x32xf32>
    %600 = arith.truncf %599 : vector<8x32xf32> to vector<8x32xbf16>
    %601 = vector.extract_strided_slice %534 {offsets = [0, 96], sizes = [8, 32], strides = [1, 1]} : vector<8x128xf32> to vector<8x32xf32>
    %602 = arith.truncf %601 : vector<8x32xf32> to vector<8x32xbf16>
    %603 = vector.extract_strided_slice %535 {offsets = [0, 96], sizes = [8, 32], strides = [1, 1]} : vector<8x128xf32> to vector<8x32xf32>
    %604 = arith.truncf %603 : vector<8x32xf32> to vector<8x32xbf16>
    %cst_226 = arith.constant dense<0.000000e+00> : vector<8x8xf32>
    %605 = tpu.matmul %600, %602, %cst_226 {dimension_numbers = #tpu.dot_dimension_numbers<[1], [1], [0], [0], [0, 0, 1, 0], [], []>} : vector<8x32xbf16>, vector<8x32xbf16>, vector<8x8xf32> -> vector<8x8xf32>
    %cst_227 = arith.constant 0.176776692 : f32
    %606 = vector.broadcast %cst_227 : f32 to vector<8x8xf32>
    %607 = arith.mulf %605, %606 : vector<8x8xf32>
    %cst_228 = arith.constant dense<0xFF800000> : vector<8xf32>
    %608 = vector.multi_reduction <maximumf>, %607, %cst_228 [1] : vector<8x8xf32> to vector<8xf32>
    %609 = vector.shape_cast %608 : vector<8xf32> to vector<8x1xf32>
    %610 = vector.broadcast %609 : vector<8x1xf32> to vector<8x8xf32>
    %611 = arith.subf %607, %610 : vector<8x8xf32>
    %612 = math.exp %611 : vector<8x8xf32>
    %cst_229 = arith.constant dense<0.000000e+00> : vector<8xf32>
    %613 = vector.multi_reduction <add>, %612, %cst_229 [1] : vector<8x8xf32> to vector<8xf32>
    %614 = vector.shape_cast %613 : vector<8xf32> to vector<8x1xf32>
    %615 = tpu.reciprocal %614 {approx = true} : vector<8x1xf32> -> vector<8x1xf32>
    %616 = vector.broadcast %615 : vector<8x1xf32> to vector<8x8xf32>
    %617 = arith.mulf %612, %616 : vector<8x8xf32>
    %618 = arith.truncf %617 : vector<8x8xf32> to vector<8x8xbf16>
    %cst_230 = arith.constant dense<0.000000e+00> : vector<8x32xf32>
    %619 = tpu.matmul %618, %604, %cst_230 {dimension_numbers = #tpu.dot_dimension_numbers<[1], [0], [0], [1], [0, 0, 1, 1], [], []>} : vector<8x8xbf16>, vector<8x32xbf16>, vector<8x32xf32> -> vector<8x32xf32>
    %620 = tpu.concatenate %556, %577, %598, %619 in 1 : vector<8x32xf32>, vector<8x32xf32>, vector<8x32xf32>, vector<8x32xf32> -> vector<8x128xf32>
    %621 = arith.truncf %620 : vector<8x128xf32> to vector<8x128xbf16>
    %c1_231 = arith.constant 1 : index
    %c0_232 = arith.constant 0 : index
    %c0_233 = arith.constant 0 : index
    %622 = vector.load %arg19[%c1_231, %c0_232, %c0_233] : memref<2x128x128xbf16, #tpu.memory_space<vmem>>, vector<1x128x128xbf16>
    %623 = vector.shape_cast %622 : vector<1x128x128xbf16> to vector<128x128xbf16>
    %cst_234 = arith.constant dense<0.000000e+00> : vector<8x128xf32>
    %624 = tpu.matmul %621, %623, %cst_234 {dimension_numbers = #tpu.dot_dimension_numbers<[1], [0], [0], [1], [0, 0, 1, 1], [], []>} : vector<8x128xbf16>, vector<128x128xbf16>, vector<8x128xf32> -> vector<8x128xf32>
    %c1_235 = arith.constant 1 : index
    %c0_236 = arith.constant 0 : index
    %c0_237 = arith.constant 0 : index
    %625 = vector.load %arg20[%c1_235, %c0_236, %c0_237] : memref<2x1x128xf32, #tpu.memory_space<vmem>>, vector<1x1x128xf32>
    %626 = vector.shape_cast %625 : vector<1x1x128xf32> to vector<1x128xf32>
    %627 = vector.broadcast %626 : vector<1x128xf32> to vector<8x128xf32>
    %628 = arith.addf %624, %627 : vector<8x128xf32>
    %629 = arith.addf %628, %518 : vector<8x128xf32>
    %c1_238 = arith.constant 1 : index
    %c0_239 = arith.constant 0 : index
    %c0_240 = arith.constant 0 : index
    %630 = vector.load %arg21[%c1_238, %c0_239, %c0_240] : memref<2x1x128xf32, #tpu.memory_space<vmem>>, vector<1x1x128xf32>
    %631 = vector.shape_cast %630 : vector<1x1x128xf32> to vector<1x128xf32>
    %c1_241 = arith.constant 1 : index
    %c0_242 = arith.constant 0 : index
    %c0_243 = arith.constant 0 : index
    %632 = vector.load %arg22[%c1_241, %c0_242, %c0_243] : memref<2x1x128xf32, #tpu.memory_space<vmem>>, vector<1x1x128xf32>
    %633 = vector.shape_cast %632 : vector<1x1x128xf32> to vector<1x128xf32>
    %cst_244 = arith.constant dense<0.000000e+00> : vector<8xf32>
    %634 = vector.multi_reduction <add>, %629, %cst_244 [1] : vector<8x128xf32> to vector<8xf32>
    %635 = vector.shape_cast %634 : vector<8xf32> to vector<8x1xf32>
    %cst_245 = arith.constant 1.280000e+02 : f32
    %636 = vector.broadcast %cst_245 : f32 to vector<8x1xf32>
    %637 = arith.divf %635, %636 : vector<8x1xf32>
    %638 = vector.broadcast %637 : vector<8x1xf32> to vector<8x128xf32>
    %639 = arith.subf %629, %638 : vector<8x128xf32>
    %640 = arith.mulf %639, %639 : vector<8x128xf32>
    %cst_246 = arith.constant dense<0.000000e+00> : vector<8xf32>
    %641 = vector.multi_reduction <add>, %640, %cst_246 [1] : vector<8x128xf32> to vector<8xf32>
    %642 = vector.shape_cast %641 : vector<8xf32> to vector<8x1xf32>
    %cst_247 = arith.constant 1.280000e+02 : f32
    %643 = vector.broadcast %cst_247 : f32 to vector<8x1xf32>
    %644 = arith.divf %642, %643 : vector<8x1xf32>
    %645 = vector.broadcast %637 : vector<8x1xf32> to vector<8x128xf32>
    %646 = arith.subf %629, %645 : vector<8x128xf32>
    %cst_248 = arith.constant 9.99999996E-13 : f32
    %647 = vector.broadcast %cst_248 : f32 to vector<8x1xf32>
    %648 = arith.addf %644, %647 : vector<8x1xf32>
    %649 = math.rsqrt %648 : vector<8x1xf32>
    %650 = vector.broadcast %649 : vector<8x1xf32> to vector<8x128xf32>
    %651 = arith.mulf %646, %650 : vector<8x128xf32>
    %652 = vector.broadcast %631 : vector<1x128xf32> to vector<8x128xf32>
    %653 = arith.mulf %651, %652 : vector<8x128xf32>
    %654 = vector.broadcast %633 : vector<1x128xf32> to vector<8x128xf32>
    %655 = arith.addf %653, %654 : vector<8x128xf32>
    %656 = vector.broadcast %34 : vector<8x1xf32> to vector<8x128xf32>
    %657 = arith.mulf %655, %656 : vector<8x128xf32>
    %658 = arith.truncf %657 : vector<8x128xf32> to vector<8x128xbf16>
    %c1_249 = arith.constant 1 : index
    %c0_250 = arith.constant 0 : index
    %c0_251 = arith.constant 0 : index
    %659 = vector.load %arg23[%c1_249, %c0_250, %c0_251] : memref<2x128x512xbf16, #tpu.memory_space<vmem>>, vector<1x128x512xbf16>
    %660 = vector.shape_cast %659 : vector<1x128x512xbf16> to vector<128x512xbf16>
    %cst_252 = arith.constant dense<0.000000e+00> : vector<8x512xf32>
    %661 = tpu.matmul %658, %660, %cst_252 {dimension_numbers = #tpu.dot_dimension_numbers<[1], [0], [0], [1], [0, 0, 1, 1], [], []>} : vector<8x128xbf16>, vector<128x512xbf16>, vector<8x512xf32> -> vector<8x512xf32>
    %c1_253 = arith.constant 1 : index
    %c0_254 = arith.constant 0 : index
    %c0_255 = arith.constant 0 : index
    %662 = vector.load %arg24[%c1_253, %c0_254, %c0_255] : memref<2x1x512xf32, #tpu.memory_space<vmem>>, vector<1x1x512xf32>
    %663 = vector.shape_cast %662 : vector<1x1x512xf32> to vector<1x512xf32>
    %664 = vector.broadcast %663 : vector<1x512xf32> to vector<8x512xf32>
    %665 = arith.addf %661, %664 : vector<8x512xf32>
    %666 = arith.mulf %665, %665 : vector<8x512xf32>
    %667 = arith.mulf %665, %666 : vector<8x512xf32>
    %cst_256 = arith.constant 4.471500e-02 : f32
    %668 = vector.broadcast %cst_256 : f32 to vector<8x512xf32>
    %669 = arith.mulf %668, %667 : vector<8x512xf32>
    %670 = arith.addf %665, %669 : vector<8x512xf32>
    %cst_257 = arith.constant 0.797884583 : f32
    %671 = vector.broadcast %cst_257 : f32 to vector<8x512xf32>
    %672 = arith.mulf %671, %670 : vector<8x512xf32>
    %673 = math.tanh %672 : vector<8x512xf32>
    %cst_258 = arith.constant 1.000000e+00 : f32
    %674 = vector.broadcast %cst_258 : f32 to vector<8x512xf32>
    %675 = arith.addf %674, %673 : vector<8x512xf32>
    %cst_259 = arith.constant 5.000000e-01 : f32
    %676 = vector.broadcast %cst_259 : f32 to vector<8x512xf32>
    %677 = arith.mulf %676, %675 : vector<8x512xf32>
    %678 = arith.mulf %665, %677 : vector<8x512xf32>
    %679 = arith.truncf %678 : vector<8x512xf32> to vector<8x512xbf16>
    %c1_260 = arith.constant 1 : index
    %c0_261 = arith.constant 0 : index
    %c0_262 = arith.constant 0 : index
    %680 = vector.load %arg25[%c1_260, %c0_261, %c0_262] : memref<2x512x128xbf16, #tpu.memory_space<vmem>>, vector<1x512x128xbf16>
    %681 = vector.shape_cast %680 : vector<1x512x128xbf16> to vector<512x128xbf16>
    %cst_263 = arith.constant dense<0.000000e+00> : vector<8x128xf32>
    %682 = tpu.matmul %679, %681, %cst_263 {dimension_numbers = #tpu.dot_dimension_numbers<[1], [0], [0], [1], [0, 0, 1, 1], [], []>} : vector<8x512xbf16>, vector<512x128xbf16>, vector<8x128xf32> -> vector<8x128xf32>
    %c1_264 = arith.constant 1 : index
    %c0_265 = arith.constant 0 : index
    %c0_266 = arith.constant 0 : index
    %683 = vector.load %arg26[%c1_264, %c0_265, %c0_266] : memref<2x1x128xf32, #tpu.memory_space<vmem>>, vector<1x1x128xf32>
    %684 = vector.shape_cast %683 : vector<1x1x128xf32> to vector<1x128xf32>
    %685 = vector.broadcast %684 : vector<1x128xf32> to vector<8x128xf32>
    %686 = arith.addf %682, %685 : vector<8x128xf32>
    %687 = arith.addf %686, %657 : vector<8x128xf32>
    %c1_267 = arith.constant 1 : index
    %c0_268 = arith.constant 0 : index
    %c0_269 = arith.constant 0 : index
    %688 = vector.load %arg27[%c1_267, %c0_268, %c0_269] : memref<2x1x128xf32, #tpu.memory_space<vmem>>, vector<1x1x128xf32>
    %689 = vector.shape_cast %688 : vector<1x1x128xf32> to vector<1x128xf32>
    %c1_270 = arith.constant 1 : index
    %c0_271 = arith.constant 0 : index
    %c0_272 = arith.constant 0 : index
    %690 = vector.load %arg28[%c1_270, %c0_271, %c0_272] : memref<2x1x128xf32, #tpu.memory_space<vmem>>, vector<1x1x128xf32>
    %691 = vector.shape_cast %690 : vector<1x1x128xf32> to vector<1x128xf32>
    %cst_273 = arith.constant dense<0.000000e+00> : vector<8xf32>
    %692 = vector.multi_reduction <add>, %687, %cst_273 [1] : vector<8x128xf32> to vector<8xf32>
    %693 = vector.shape_cast %692 : vector<8xf32> to vector<8x1xf32>
    %cst_274 = arith.constant 1.280000e+02 : f32
    %694 = vector.broadcast %cst_274 : f32 to vector<8x1xf32>
    %695 = arith.divf %693, %694 : vector<8x1xf32>
    %696 = vector.broadcast %695 : vector<8x1xf32> to vector<8x128xf32>
    %697 = arith.subf %687, %696 : vector<8x128xf32>
    %698 = arith.mulf %697, %697 : vector<8x128xf32>
    %cst_275 = arith.constant dense<0.000000e+00> : vector<8xf32>
    %699 = vector.multi_reduction <add>, %698, %cst_275 [1] : vector<8x128xf32> to vector<8xf32>
    %700 = vector.shape_cast %699 : vector<8xf32> to vector<8x1xf32>
    %cst_276 = arith.constant 1.280000e+02 : f32
    %701 = vector.broadcast %cst_276 : f32 to vector<8x1xf32>
    %702 = arith.divf %700, %701 : vector<8x1xf32>
    %703 = vector.broadcast %695 : vector<8x1xf32> to vector<8x128xf32>
    %704 = arith.subf %687, %703 : vector<8x128xf32>
    %cst_277 = arith.constant 9.99999996E-13 : f32
    %705 = vector.broadcast %cst_277 : f32 to vector<8x1xf32>
    %706 = arith.addf %702, %705 : vector<8x1xf32>
    %707 = math.rsqrt %706 : vector<8x1xf32>
    %708 = vector.broadcast %707 : vector<8x1xf32> to vector<8x128xf32>
    %709 = arith.mulf %704, %708 : vector<8x128xf32>
    %710 = vector.broadcast %689 : vector<1x128xf32> to vector<8x128xf32>
    %711 = arith.mulf %709, %710 : vector<8x128xf32>
    %712 = vector.broadcast %691 : vector<1x128xf32> to vector<8x128xf32>
    %713 = arith.addf %711, %712 : vector<8x128xf32>
    %714 = vector.broadcast %34 : vector<8x1xf32> to vector<8x128xf32>
    %715 = arith.mulf %713, %714 : vector<8x128xf32>
    %c0_278 = arith.constant 0 : index
    %c0_279 = arith.constant 0 : index
    %c0_280 = arith.constant 0 : index
    %716 = vector.load %arg29[%c0_278, %c0_279, %c0_280] : memref<1x8x128xf32, #tpu.memory_space<vmem>>, vector<1x8x128xf32>
    %717 = vector.shape_cast %716 : vector<1x8x128xf32> to vector<8x128xf32>
    %718 = vector.shape_cast %715 : vector<8x128xf32> to vector<1x8x128xf32>
    tpu.vector_store %arg29[%c0_278, %c0_279, %c0_280], %718 {strides = array<i32>} : memref<1x8x128xf32, #tpu.memory_space<vmem>>, vector<1x8x128xf32>,
    return
  }
  func.func @transform_0(%arg0: i32) -> (i32, i32, i32) {
    %c0_i32 = arith.constant 0 : i32
    %c0_i32_0 = arith.constant 0 : i32
    %c0_i32_1 = arith.constant 0 : i32
    return %arg0, %c0_i32, %c0_i32_0 : i32, i32, i32
  }
  func.func @transform_1(%arg0: i32) -> (i32, i32) {
    %c0_i32 = arith.constant 0 : i32
    %c0_i32_0 = arith.constant 0 : i32
    %c0_i32_1 = arith.constant 0 : i32
    return %c0_i32, %c0_i32_0 : i32, i32
  }
  func.func @transform_2(%arg0: i32) -> (i32, i32) {
    %c0_i32 = arith.constant 0 : i32
    %c0_i32_0 = arith.constant 0 : i32
    %c0_i32_1 = arith.constant 0 : i32
    return %c0_i32, %c0_i32_0 : i32, i32
  }
  func.func @transform_3(%arg0: i32) -> (i32, i32) {
    %c0_i32 = arith.constant 0 : i32
    %c0_i32_0 = arith.constant 0 : i32
    %c0_i32_1 = arith.constant 0 : i32
    return %c0_i32, %c0_i32_0 : i32, i32
  }
  func.func @transform_4(%arg0: i32) -> (i32, i32, i32) {
    %c0_i32 = arith.constant 0 : i32
    %c0_i32_0 = arith.constant 0 : i32
    %c0_i32_1 = arith.constant 0 : i32
    return %arg0, %c0_i32, %c0_i32_0 : i32, i32, i32
  }
  func.func @transform_5(%arg0: i32) -> (i32, i32, i32) {
    %c0_i32 = arith.constant 0 : i32
    %c0_i32_0 = arith.constant 0 : i32
    %c0_i32_1 = arith.constant 0 : i32
    return %arg0, %c0_i32, %c0_i32_0 : i32, i32, i32
  }
  func.func @transform_6(%arg0: i32) -> (i32, i32, i32) {
    %c0_i32 = arith.constant 0 : i32
    %c0_i32_0 = arith.constant 0 : i32
    %c0_i32_1 = arith.constant 0 : i32
    return %arg0, %c0_i32, %c0_i32_0 : i32, i32, i32
  }
  func.func @transform_7(%arg0: i32) -> (i32, i32) {
    %c0_i32 = arith.constant 0 : i32
    %c0_i32_0 = arith.constant 0 : i32
    %c0_i32_1 = arith.constant 0 : i32
    return %c0_i32, %c0_i32_0 : i32, i32
  }
  func.func @transform_8(%arg0: i32) -> (i32, i32, i32) {
    %c0_i32 = arith.constant 0 : i32
    %c0_i32_0 = arith.constant 0 : i32
    %c0_i32_1 = arith.constant 0 : i32
    %c0_i32_2 = arith.constant 0 : i32
    return %c0_i32, %c0_i32_0, %c0_i32_1 : i32, i32, i32
  }
  func.func @transform_9(%arg0: i32) -> (i32, i32, i32) {
    %c0_i32 = arith.constant 0 : i32
    %c0_i32_0 = arith.constant 0 : i32
    %c0_i32_1 = arith.constant 0 : i32
    %c0_i32_2 = arith.constant 0 : i32
    return %c0_i32, %c0_i32_0, %c0_i32_1 : i32, i32, i32
  }
  func.func @transform_10(%arg0: i32) -> (i32, i32, i32) {
    %c0_i32 = arith.constant 0 : i32
    %c0_i32_0 = arith.constant 0 : i32
    %c0_i32_1 = arith.constant 0 : i32
    %c0_i32_2 = arith.constant 0 : i32
    return %c0_i32, %c0_i32_0, %c0_i32_1 : i32, i32, i32
  }
  func.func @transform_11(%arg0: i32) -> (i32, i32, i32) {
    %c0_i32 = arith.constant 0 : i32
    %c0_i32_0 = arith.constant 0 : i32
    %c0_i32_1 = arith.constant 0 : i32
    %c0_i32_2 = arith.constant 0 : i32
    return %c0_i32, %c0_i32_0, %c0_i32_1 : i32, i32, i32
  }
  func.func @transform_12(%arg0: i32) -> (i32, i32, i32) {
    %c0_i32 = arith.constant 0 : i32
    %c0_i32_0 = arith.constant 0 : i32
    %c0_i32_1 = arith.constant 0 : i32
    %c0_i32_2 = arith.constant 0 : i32
    return %c0_i32, %c0_i32_0, %c0_i32_1 : i32, i32, i32
  }
  func.func @transform_13(%arg0: i32) -> (i32, i32, i32) {
    %c0_i32 = arith.constant 0 : i32
    %c0_i32_0 = arith.constant 0 : i32
    %c0_i32_1 = arith.constant 0 : i32
    %c0_i32_2 = arith.constant 0 : i32
    return %c0_i32, %c0_i32_0, %c0_i32_1 : i32, i32, i32
  }
  func.func @transform_14(%arg0: i32) -> (i32, i32, i32) {
    %c0_i32 = arith.constant 0 : i32
    %c0_i32_0 = arith.constant 0 : i32
    %c0_i32_1 = arith.constant 0 : i32
    %c0_i32_2 = arith.constant 0 : i32
    return %c0_i32, %c0_i32_0, %c0_i32_1 : i32, i32, i32
  }
  func.func @transform_15(%arg0: i32) -> (i32, i32, i32) {
    %c0_i32 = arith.constant 0 : i32
    %c0_i32_0 = arith.constant 0 : i32
    %c0_i32_1 = arith.constant 0 : i32
    %c0_i32_2 = arith.constant 0 : i32
    return %c0_i32, %c0_i32_0, %c0_i32_1 : i32, i32, i32
  }
  func.func @transform_16(%arg0: i32) -> (i32, i32, i32) {
    %c0_i32 = arith.constant 0 : i32
    %c0_i32_0 = arith.constant 0 : i32
    %c0_i32_1 = arith.constant 0 : i32
    %c0_i32_2 = arith.constant 0 : i32
    return %c0_i32, %c0_i32_0, %c0_i32_1 : i32, i32, i32
  }
  func.func @transform_17(%arg0: i32) -> (i32, i32, i32) {
    %c0_i32 = arith.constant 0 : i32
    %c0_i32_0 = arith.constant 0 : i32
    %c0_i32_1 = arith.constant 0 : i32
    %c0_i32_2 = arith.constant 0 : i32
    return %c0_i32, %c0_i32_0, %c0_i32_1 : i32, i32, i32
  }
  func.func @transform_18(%arg0: i32) -> (i32, i32, i32) {
    %c0_i32 = arith.constant 0 : i32
    %c0_i32_0 = arith.constant 0 : i32
    %c0_i32_1 = arith.constant 0 : i32
    %c0_i32_2 = arith.constant 0 : i32
    return %c0_i32, %c0_i32_0, %c0_i32_1 : i32, i32, i32
  }
  func.func @transform_19(%arg0: i32) -> (i32, i32, i32) {
    %c0_i32 = arith.constant 0 : i32
    %c0_i32_0 = arith.constant 0 : i32
    %c0_i32_1 = arith.constant 0 : i32
    %c0_i32_2 = arith.constant 0 : i32
    return %c0_i32, %c0_i32_0, %c0_i32_1 : i32, i32, i32
  }
  func.func @transform_20(%arg0: i32) -> (i32, i32, i32) {
    %c0_i32 = arith.constant 0 : i32
    %c0_i32_0 = arith.constant 0 : i32
    %c0_i32_1 = arith.constant 0 : i32
    %c0_i32_2 = arith.constant 0 : i32
    return %c0_i32, %c0_i32_0, %c0_i32_1 : i32, i32, i32
  }
  func.func @transform_21(%arg0: i32) -> (i32, i32, i32) {
    %c0_i32 = arith.constant 0 : i32
    %c0_i32_0 = arith.constant 0 : i32
    %c0_i32_1 = arith.constant 0 : i32
    %c0_i32_2 = arith.constant 0 : i32
    return %c0_i32, %c0_i32_0, %c0_i32_1 : i32, i32, i32
  }
  func.func @transform_22(%arg0: i32) -> (i32, i32, i32) {
    %c0_i32 = arith.constant 0 : i32
    %c0_i32_0 = arith.constant 0 : i32
    %c0_i32_1 = arith.constant 0 : i32
    %c0_i32_2 = arith.constant 0 : i32
    return %c0_i32, %c0_i32_0, %c0_i32_1 : i32, i32, i32
  }
  func.func @transform_23(%arg0: i32) -> (i32, i32, i32) {
    %c0_i32 = arith.constant 0 : i32
    %c0_i32_0 = arith.constant 0 : i32
    %c0_i32_1 = arith.constant 0 : i32
    %c0_i32_2 = arith.constant 0 : i32
    return %c0_i32, %c0_i32_0, %c0_i32_1 : i32, i32, i32
  }
  func.func @transform_24(%arg0: i32) -> (i32, i32, i32) {
    %c0_i32 = arith.constant 0 : i32
    %c0_i32_0 = arith.constant 0 : i32
    %c0_i32_1 = arith.constant 0 : i32
    %c0_i32_2 = arith.constant 0 : i32
    return %c0_i32, %c0_i32_0, %c0_i32_1 : i32, i32, i32
  }
  func.func @transform_25(%arg0: i32) -> (i32, i32, i32) {
    %c0_i32 = arith.constant 0 : i32
    %c0_i32_0 = arith.constant 0 : i32
    %c0_i32_1 = arith.constant 0 : i32
    %c0_i32_2 = arith.constant 0 : i32
    return %c0_i32, %c0_i32_0, %c0_i32_1 : i32, i32, i32
  }
  func.func @transform_26(%arg0: i32) -> (i32, i32, i32) {
    %c0_i32 = arith.constant 0 : i32
    %c0_i32_0 = arith.constant 0 : i32
    %c0_i32_1 = arith.constant 0 : i32
    %c0_i32_2 = arith.constant 0 : i32
    return %c0_i32, %c0_i32_0, %c0_i32_1 : i32, i32, i32
  }
  func.func @transform_27(%arg0: i32) -> (i32, i32, i32) {
    %c0_i32 = arith.constant 0 : i32
    %c0_i32_0 = arith.constant 0 : i32
    %c0_i32_1 = arith.constant 0 : i32
    %c0_i32_2 = arith.constant 0 : i32
    return %c0_i32, %c0_i32_0, %c0_i32_1 : i32, i32, i32
  }
  func.func @transform_28(%arg0: i32) -> (i32, i32, i32) {
    %c0_i32 = arith.constant 0 : i32
    %c0_i32_0 = arith.constant 0 : i32
    %c0_i32_1 = arith.constant 0 : i32
    return %arg0, %c0_i32, %c0_i32_0 : i32, i32, i32
  }
  func.func @transform_29(%arg0: i32) -> (i32, i32, i32) {
    %c0_i32 = arith.constant 0 : i32
    %c0_i32_0 = arith.constant 0 : i32
    %c0_i32_1 = arith.constant 0 : i32
    return %arg0, %c0_i32, %c0_i32_0 : i32, i32, i32
  }
}

</mosaic_0001>

<bundles_post_ra>
// kernel: bert_decoder_forward.1
= control target key start
LH: loop header
LB: loop body
LE: loop exit
PB: predicated region body
PF: predicated region fallthrough
CT: control target
= control target key end

     0   :  { %s8523_s6 = smov 1   ;;  %s8524_s10 = smov 2   ;;  %s9495_s0 = inlined_call_operand.smem [shape: u32[30], index: -1, kind: input, shape index: {}] }
   0x1   :  { %s8590_s5 = sld [smem:[%s9495_s0]]   ;;  %s8525_s14 = smov 3  }
   0x2   :  { %s8595_s9 = sld [smem:[%s9495_s0 + %s8523_s6]]   ;;  %s8526_s18 = smov 4  }
   0x3   :  { %s8600_s13 = sld [smem:[%s9495_s0 + %s8524_s10]]   ;;  %s8527_s22 = smov 5  }
   0x4   :  { %s8605_s17 = sld [smem:[%s9495_s0 + %s8525_s14]]   ;;  %s8528_s26 = smov 6  }
   0x5   :  { %s8610_s21 = sld [smem:[%s9495_s0 + %s8526_s18]]   ;;  %s8529_s30 = smov 7  }
   0x6   :  { %s8615_s25 = sld [smem:[%s9495_s0 + %s8527_s22]]   ;;  %s8530_s4 = smov 8  }
   0x7   :  { %9525 = sst [smem:[#allocation35_spill]] %s8590_s5  ;;  %s8531_s10 = smov 9  }
   0x8   :  { %9526 = sst [smem:[#allocation36_spill]] %s8595_s9  ;;  %s8532_s15 = smov 10  }
   0x9   :  { %s8620_s29 = sld [smem:[%s9495_s0 + %s8528_s26]]   ;;  %s8533_s20 = smov 11  }
   0xa   :  { %9527 = sst [smem:[#allocation37_spill]] %s8605_s17  ;;  %s8534_s26 = smov 12  }
   0xb   :  { %9528 = sst [smem:[#allocation38_spill]] %s8610_s21  ;;  %s8535_s1 = smov 13  }
   0xc   :  { %9529 = sst [smem:[#allocation39_spill]] %s8615_s25  ;;  %s8536_s7 = smov 14  }
   0xd   :  { %s8625_s3 = sld [smem:[%s9495_s0 + %s8529_s30]]   ;;  %s8538_s22 = smov 16  }
   0xe   :  { %s8630_s8 = sld [smem:[%s9495_s0 + %s8530_s4]]   ;;  %s8539_s28 = smov 17  }
   0xf   :  { %9530 = sst [smem:[#allocation40_spill]] %s8620_s29 }
  0x10   :  { %s8635_s14 = sld [smem:[%s9495_s0 + %s8531_s10]]  }
  0x11   :  { %s8640_s19 = sld [smem:[%s9495_s0 + %s8532_s15]]   ;;  %s8537_s15 = smov 15  }
  0x12   :  { %s8645_s24 = sld [smem:[%s9495_s0 + %s8533_s20]]  }
  0x13   :  { %9531 = sst [smem:[#allocation41_spill]] %s8625_s3 }
  0x14   :  { %9532 = sst [smem:[#allocation42_spill]] %s8630_s8 }
  0x15   :  { %s8650_s30 = sld [smem:[%s9495_s0 + %s8534_s26]]  }
  0x16   :  { %9533 = sst [smem:[#allocation43_spill]] %s8635_s14 }
  0x17   :  { %9534 = sst [smem:[#allocation44_spill]] %s8640_s19 }
  0x18   :  { %9535 = sst [smem:[#allocation45_spill]] %s8645_s24 }
  0x19   :  { %s8655_s6 = sld [smem:[%s9495_s0 + %s8535_s1]]  }
  0x1a   :  { %s8660_s12 = sld [smem:[%s9495_s0 + %s8536_s7]]   ;;  %s8540_s7 = smov 18  }
  0x1b   :  { %9536 = sst [smem:[#allocation46_spill]] %s8650_s30 }
  0x1c   :  { %s8665_s20 = sld [smem:[%s9495_s0 + %s8537_s15]]   ;;  %s8541_s15 = smov 19  }
  0x1d   :  { %s8670_s27 = sld [smem:[%s9495_s0 + %s8538_s22]]   ;;  %s8542_s22 = smov 20  }
  0x1e   :  { %s8675_s4 = sld [smem:[%s9495_s0 + %s8539_s28]]   ;;  %s8543_s28 = smov 21  }
  0x1f   :  { %9537 = sst [smem:[#allocation47_spill]] %s8655_s6 }
  0x20   :  { %s8680_s6 = sld [smem:[%s9495_s0 + %s8540_s7]]   ;;  %s8544_s7 = smov 22  }
  0x21   :  { %s8685_s30 = sld [smem:[%s9495_s0 + %s8541_s15]]   ;;  %s8545_s15 = smov 23  }
  0x22   :  { %s8690_s21 = sld [smem:[%s9495_s0 + %s8542_s22]]   ;;  %s8546_s22 = smov 24  }
  0x23   :  { %s8700_s29 = sld [smem:[%s9495_s0 + %s8544_s7]]   ;;  %s8548_s7 = smov 26  }
  0x24   :  { %9538 = sst [smem:[#allocation48_spill]] %s8675_s4 }
  0x25   :  { %s8695_s4 = sld [smem:[%s9495_s0 + %s8543_s28]]   ;;  %s8547_s28 = smov 25  }
  0x26   :  { %9539 = sst [smem:[#allocation49_spill]] %s8680_s6 }
  0x27   :  { %s8705_s24 = sld [smem:[%s9495_s0 + %s8545_s15]]   ;;  %s8549_s15 = smov 27  }
  0x28   :  { %9540 = sst [smem:[#allocation50_spill]] %s8690_s21 }
  0x29   :  { %s8710_s21 = sld [smem:[%s9495_s0 + %s8546_s22]]   ;;  %s8550_s22 = smov 28  }
  0x2a   :  { %s8720_s25 = sld [smem:[%s9495_s0 + %s8548_s7]]  }
  0x2b   :  { %9541 = sst [smem:[#allocation51_spill]] %s8695_s4 }
  0x2c   :  { %s8715_s4 = sld [smem:[%s9495_s0 + %s8547_s28]]   ;;  %s8551_s28 = smov 29  }
  0x2d   :  { %s8725_s14 = sld [smem:[%s9495_s0 + %s8549_s15]]  }
  0x2e   :  { %s8730_s9 = sld [smem:[%s9495_s0 + %s8550_s22]]  }
  0x2f   :  { %s8735_s5 = sld [smem:[%s9495_s0 + %s8551_s28]]  }
  0x32   :  { %9542 = sst [smem:[#allocation52_spill]] %s8715_s4 }
  0x34   :  { %9543 = sst [smem:[#allocation53_spill]] %s8730_s9 }
  0x35   :  { %9544 = sst [smem:[#allocation54_spill]] %s8735_s5 }
  0x36   :  { %65 = vsyncpa [#allocation3], 0 }
  0x37   :  { %66 = vsyncpa [#allocation6], 0 }
  0x38   :  { %67 = vsyncpa [#allocation9], 0 }
  0x39   :  { %68 = vsyncpa [#allocation12], 0 }
  0x3a   :  { %69 = vsyncpa [#allocation15], 0 }
  0x3b   :  { %70 = vsyncpa [#allocation18], 0 }
  0x3c   :  { %71 = vsyncpa [#allocation21], 0 }
  0x3d   :  { %72 = vsyncpa [#allocation4], 0 }
  0x3e   :  { %74 = vsyncpa [#allocation4 + $0x1], 0 }
  0x3f   :  { %75 = vsyncpa [#allocation25], 0 }
  0x40   :  { %77 = vsyncpa [#allocation25 + $0x1], 0  ;;  %s8737_s7 = smov 0   ;;  %s8739_s10 = smov 0  }
  0x41   :  { %s8741_s11 = smov 0   ;;  %s8743_s15 = smov 0  }
  0x42 LB: > { %s9545_s5 = sld [smem:[#allocation54_spill]]  ;;  %s8758_s0 = sadd.s32 4294967295, %s8521_s15   ;;  %s8513_s10 = sphi %s8739_s10, %s9608_s10   ;;  %s8509_s7 = sphi %s8737_s7, %s9607_s7   ;;  %s8521_s15 = sphi %s8743_s15, %s9604_s15   ;;  %s8517_s11 = sphi %s8741_s11, %s9606_s11  }
  0x43   : > { %s9546_s3 = sld [smem:[#allocation41_spill]]  ;;  %s6467_s16 = sadd.s32 4294967294, %s8521_s15  }
  0x44   : > { %9547 = sst [smem:[#allocation55_spill]] %s8509_s7  ;;  %s8762_s18 = sadd.s32 1, %s8521_s15  }
  0x45   : > { %9548 = sst [smem:[#allocation56_spill]] %s8517_s11  ;;  %s698_s22 = sadd.s32 1, %s8517_s11 }
  0x46   : > { %9549 = sst [smem:[#allocation57_spill]] %s8521_s15  ;;  %s695_s23 = ssub.s32 %s8521_s15, %s8762_s18 }
  0x47   : > { %9550 = sst [smem:[#allocation58_spill]] %s8762_s18  ;;  %p708_p0 = scmp.ne.s32.totalorder %s8517_s11, %s8513_s10 }
  0x48   : > { %p696_p1 = scmp.eq.s32.totalorder %s695_s23, 0  ;;  %p709_p2 = scmp.eq.s32.totalorder %s8758_s0, 1 }
  0x49   : > { %p714_p3 = scmp.ne.s32.totalorder %s8513_s10, %s8509_s7  ;;  %p715_p4 = scmp.eq.s32.totalorder %s6467_s16, 1 }
  0x4a   : > { %s8773_s26 = scalar_select %p696_p1, %s8517_s11, %s698_s22  }
  0x4b   : > { %p8775_p5 = por %p709_p2, %p708_p0  ;;  %p8779_p6 = por %p715_p4, %p714_p3 }
  0x4c   : > { %9551 = sst [smem:[#allocation59_spill]] %s8773_s26  ;;  %p6468_p7 = scmp.ge.s32.totalorder %s8521_s15, 1 }
  0x4d   : > { %s9552_s28 = scalar_select %p8775_p5, 1, 0 }
  0x4e   : > { %s9553_s1 = scalar_select %p8779_p6, 1, 0 }
  0x4f   : > { %p748_p8 = scmp.lt.s32.totalorder %s8521_s15, 3  ;;  %p9508_p9 = scmp.eq.s32.totalorder %s8758_s0, 0 }
  0x50   : > { %9554 = sst [smem:[#allocation60_spill]] %s9553_s1  ;;  %s8552_s23 = smov [#allocation5]  }
  0x51   : > { %p8786_p10 = pnand %p6468_p7, %p748_p8  ;;  %s775_s16 = sshll.u32 %s8552_s23, 4  ;;  %s776_s16 = int_to_ptr.vmem [resolvable:$true] %s775_s16 }
  0x52   : > { %s8553_s22 = smov [#allocation8]   ;;  %s8554_s18 = smov [#allocation11]  }
  0x53   : > { %s9555_s2 = scalar_select %p8786_p10, 1, 0 }
  0x54   : > { %p7482_p11 = pneg %p8786_p10  ;;  %s804_s26 = sshll.u32 %s8553_s22, 4  ;;  %s8798_s26 = int_to_ptr.vmem [resolvable:$true] %s804_s26 }
  0x55   : > { %s839_s1 = sshll.u32 %s8554_s18, 4  ;;  %s8076_s23 = scalar_lea.vmem %s776_s16, 16  ;;  %s840_s1 = int_to_ptr.vmem [resolvable:$true] %s839_s1 }
  0x56   : > { %p8794_p12 = pnand %p9508_p9, %p7482_p11  ;;  %p8077_p0 = scmp.ne.s32.totalorder %s776_s16, %s8076_s23 }
  0x57   : > { %s8083_s22 = scalar_lea.vmem %s776_s16, 32  ;;  %p8084_p3 = scmp.lt.s32.totalorder %s776_s16, %s776_s16 }
  0x58   : > { %p8802_p13 = pneg %p8794_p12  ;;  %p8085_p4 = scmp.lt.s32.totalorder %s8083_s22, %s8076_s23 }
  0x5a   : > { %p8079_p1 = pnand %p8077_p0, %p8802_p13  ;;  %p8086_p7 = por %p8085_p4, %p8084_p3 }
  0x5c   : > { %p8080_p2 = pneg %p8079_p1 }
  0x5e   : > { %p8087_p8 = pnand %p8086_p7, %p8080_p2 }
  0x60   : > { %8090 = shalt.err (!%p8087_p8)
}
  0x61   : > { %s9558_s17 = sld [smem:[#allocation37_spill]]  ;;  %s8102_s18 = scalar_lea.vmem %s8798_s26, 2048 }
  0x62   : > { %p8103_p11 = scmp.ne.s32.totalorder %s8798_s26, %s8102_s18  ;;  %p8110_p1 = scmp.lt.s32.totalorder %s8798_s26, %s8798_s26 }
  0x63   : > { %p8111_p6 = scmp.lt.s32.totalorder %s8102_s18, %s8102_s18 }
  0x64   : > { %p8105_p9 = pnand %p8103_p11, %p8802_p13 }
  0x65   : > { %p8112_p5 = por %p8111_p6, %p8110_p1 }
  0x66   : > { %p8106_p0 = pneg %p8105_p9 }
  0x67   : > { %7488 = dma.hbm_to_vmem [thread:$0]  (!%p8794_p12), %s9558_s17, 16, %s776_s16, [#allocation6]  }
  0x68   : > { %p8113_p3 = pnand %p8112_p5, %p8106_p0 }
  0x6a   : > { %8116 = shalt.err (!%p8113_p3)
}
  0x6b   : > { %s9510_s23 = smov 64   ;;  %s9559_s19 = sld [smem:[#allocation44_spill]] }
  0x6c   : > { %s9512_s22 = smov 4   ;;  %s8128_s16 = scalar_lea.vmem %s840_s1, 32 }
  0x6d   : > { %p8129_p9 = scmp.ne.s32.totalorder %s840_s1, %s8128_s16  ;;  %p8136_p6 = scmp.lt.s32.totalorder %s840_s1, %s840_s1 }
  0x6e   : > { %p8137_p5 = scmp.lt.s32.totalorder %s8128_s16, %s8128_s16 }
  0x6f   : > { %p8131_p2 = pnand %p8129_p9, %p8802_p13 }
  0x70   : > { %p8138_p7 = por %p8137_p5, %p8136_p6 }
  0x71   : > { %7494 = dma.hbm_to_vmem [thread:$0]  (!%p8794_p12), %s9559_s19, 2048, %s8798_s26, [#allocation9], %s9510_s23, %s9510_s23, %s9512_s22  }
  0x72   : > { %p8132_p4 = pneg %p8131_p2 }
  0x74   : > { %p8139_p8 = pnand %p8138_p7, %p8132_p4 }
  0x76   : > { %8142 = shalt.err (!%p8139_p8)
}
  0x77   : > { %s9519_s18 = smov 16   ;;  %s9516_s17 = smov 1  }
  0x78   : > { %7500 = dma.hbm_to_vmem [thread:$0]  (!%p8794_p12), %s8665_s20, 32, %s840_s1, [#allocation12], %s9519_s18, %s9519_s18, %s9516_s17  }
  0x79   : > { %s8559_s26 = smov [#allocation14]   ;;  %s8560_s22 = smov [#allocation17]  }
  0x7a   : > { %s868_s23 = sshll.u32 %s8559_s26, 4  ;;  %s900_s19 = sshll.u32 %s8560_s22, 4  ;;  %s869_s23 = int_to_ptr.vmem [resolvable:$true] %s868_s23  ;;  %s901_s19 = int_to_ptr.vmem [resolvable:$true] %s900_s19 }
  0x7b   : > { %s8154_s15 = scalar_lea.vmem %s869_s23, 2048  ;;  %p8162_p3 = scmp.lt.s32.totalorder %s869_s23, %s869_s23 }
  0x7c   : > { %p8155_p11 = scmp.ne.s32.totalorder %s869_s23, %s8154_s15  ;;  %p8163_p9 = scmp.lt.s32.totalorder %s8154_s15, %s8154_s15 }
  0x7e   : > { %p8157_p0 = pnand %p8155_p11, %p8802_p13  ;;  %p8164_p2 = por %p8163_p9, %p8162_p3 }
  0x80   : > { %p8158_p1 = pneg %p8157_p0 }
  0x82   : > { %p8165_p4 = pnand %p8164_p2, %p8158_p1 }
  0x84   : > { %8168 = shalt.err (!%p8165_p4)
}
  0x85   : > { %s9560_s16 = smov 4   ;;  %s9561_s9 = smov 64  }
  0x86   : > { %s9562_s6 = sld [smem:[#allocation49_spill]]  ;;  %s8180_s1 = scalar_lea.vmem %s901_s19, 8192 }
  0x87   : > { %p8181_p6 = scmp.ne.s32.totalorder %s901_s19, %s8180_s1  ;;  %p8188_p8 = scmp.lt.s32.totalorder %s901_s19, %s901_s19 }
  0x88   : > { %p8189_p11 = scmp.lt.s32.totalorder %s8180_s1, %s8180_s1 }
  0x89   : > { %p8183_p5 = pnand %p8181_p6, %p8802_p13 }
  0x8a   : > { %p8190_p0 = por %p8189_p11, %p8188_p8 }
  0x8b   : > { %p8184_p7 = pneg %p8183_p5 }
  0x8c   : > { %7506 = dma.hbm_to_vmem [thread:$0]  (!%p8794_p12), %s9562_s6, 2048, %s869_s23, [#allocation15], %s9561_s9, %s9561_s9, %s9560_s16  }
  0x8d   : > { %p8191_p3 = pnand %p8190_p0, %p8184_p7 }
  0x8f   : > { %8194 = shalt.err (!%p8191_p3)
}
  0x90   : > { %s8561_s15 = smov 256   ;;  %s8562_s22 = smov [#allocation20]  }
  0x91   : > { %7512 = dma.hbm_to_vmem [thread:$0]  (!%p8794_p12), %s8700_s29, 8192, %s901_s19, [#allocation18], %s8561_s15, %s8561_s15, %s9519_s18  }
  0x92   : > { %s926_s23 = sshll.u32 %s8562_s22, 4  ;;  %s8563_s26 = smov [#allocation2]   ;;  %s927_s23 = int_to_ptr.vmem [resolvable:$true] %s926_s23 }
  0x93   : > { %s764_s17 = sshll.u32 %s8563_s26, 4  ;;  %s8206_s6 = scalar_lea.vmem %s927_s23, 8192  ;;  %s765_s17 = int_to_ptr.vmem [resolvable:$true] %s764_s17 }
  0x94   : > { %p8207_p1 = scmp.ne.s32.totalorder %s927_s23, %s8206_s6  ;;  %p8214_p4 = scmp.lt.s32.totalorder %s927_s23, %s927_s23 }
  0x95   : > { %p8215_p6 = scmp.lt.s32.totalorder %s8206_s6, %s8206_s6 }
  0x96   : > { %p8209_p9 = pnand %p8207_p1, %p8802_p13 }
  0x97   : > { %p8216_p5 = por %p8215_p6, %p8214_p4 }
  0x98   : > { %p8210_p2 = pneg %p8209_p9 }
  0x9a   : > { %p8217_p7 = pnand %p8216_p5, %p8210_p2 }
  0x9c   : > { %8220 = shalt.err (!%p8217_p7)
}
  0x9d   : > { %7518 = dma.hbm_to_vmem [thread:$0]  (!%p8794_p12), %s8710_s21, 8192, %s927_s23, [#allocation21], %s9561_s9, %s9561_s9, %s9560_s16  }
  0x9e   : > { %s8232_s19 = scalar_lea.vmem %s765_s17, 16  ;;  %s8239_s1 = scalar_lea.vmem %s765_s17, 32 }
  0x9f   : > { %p8233_p8 = scmp.ne.s32.totalorder %s765_s17, %s8232_s19  ;;  %p8240_p3 = scmp.lt.s32.totalorder %s765_s17, %s765_s17 }
  0xa0   : > { %p8241_p1 = scmp.lt.s32.totalorder %s8239_s1, %s8232_s19 }
  0xa1   : > { %p8235_p11 = pnand %p8233_p8, %p8802_p13 }
  0xa2   : > { %p8242_p9 = por %p8241_p1, %p8240_p3 }
  0xa3   : > { %p8236_p0 = pneg %p8235_p11 }
  0xa5   : > { %p8243_p4 = pnand %p8242_p9, %p8236_p0 }
  0xa7   : > { %8246 = shalt.err (!%p8243_p4)
}
  0xa8   : > { %7485 = dma.hbm_to_vmem [thread:$0]  (!%p8794_p12), %s8600_s13, 16, %s765_s17, [#allocation3]  }
  0xa9   : > { %s8564_s6 = smov [#allocation7]  }
  0xaa   : > { %s788_s15 = sshll.u32 %s8564_s6, 4  ;;  %s789_s15 = int_to_ptr.vmem [resolvable:$true] %s788_s15 }
  0xab   : > { %s8258_s22 = scalar_lea.vmem %s789_s15, 6144  ;;  %p8266_p7 = scmp.lt.s32.totalorder %s789_s15, %s789_s15 }
  0xac   : > { %p8259_p2 = scmp.ne.s32.totalorder %s789_s15, %s8258_s22  ;;  %p8267_p8 = scmp.lt.s32.totalorder %s8258_s22, %s8258_s22 }
  0xae   : > { %p8261_p6 = pnand %p8259_p2, %p8802_p13  ;;  %p8268_p11 = por %p8267_p8, %p8266_p7 }
  0xb0   : > { %p8262_p5 = pneg %p8261_p6 }
  0xb2   : > { %p8269_p10 = pnand %p8268_p11, %p8262_p5 }
  0xb4   : > { %8272 = shalt.err (!%p8269_p10)
}
  0xb5   : > { %s8565_s23 = smov 192   ;;  %s9563_s8 = sld [smem:[#allocation42_spill]] }
  0xb6   : > { %s8566_s26 = smov 12   ;;  %s8567_s17 = smov [#allocation10]  }
  0xb7   : > { %s826_s19 = sshll.u32 %s8567_s17, 4  ;;  %s8568_s1 = smov [#allocation13]   ;;  %s827_s19 = int_to_ptr.vmem [resolvable:$true] %s826_s19 }
  0xb8   : > { %s852_s6 = sshll.u32 %s8568_s1, 4  ;;  %s8284_s18 = scalar_lea.vmem %s827_s19, 2048  ;;  %s853_s6 = int_to_ptr.vmem [resolvable:$true] %s852_s6 }
  0xb9   : > { %p8285_p0 = scmp.ne.s32.totalorder %s827_s19, %s8284_s18  ;;  %p8292_p9 = scmp.lt.s32.totalorder %s827_s19, %s827_s19 }
  0xba   : > { %p8293_p4 = scmp.lt.s32.totalorder %s8284_s18, %s8284_s18 }
  0xbb   : > { %7491 = dma.hbm_to_vmem [thread:$0]  (!%p8794_p12), %s9563_s8, 6144, %s789_s15, [#allocation6], %s8565_s23, %s8565_s23, %s8566_s26  }
  0xbc   : > { %p8287_p3 = pnand %p8285_p0, %p8802_p13  ;;  %p8294_p10 = por %p8293_p4, %p8292_p9 }
  0xbe   : > { %p8288_p1 = pneg %p8287_p3 }
  0xc0   : > { %p8295_p2 = pnand %p8294_p10, %p8288_p1 }
  0xc2   : > { %8298 = shalt.err (!%p8295_p2)
}
  0xc3   : > { %7497 = dma.hbm_to_vmem [thread:$0]  (!%p8794_p12), %s8660_s12, 2048, %s827_s19, [#allocation9], %s9561_s9, %s9561_s9, %s9560_s16  }
  0xc4   : > { %s8310_s15 = scalar_lea.vmem %s853_s6, 4096  ;;  %p8318_p8 = scmp.lt.s32.totalorder %s853_s6, %s853_s6 }
  0xc5   : > { %p8311_p6 = scmp.ne.s32.totalorder %s853_s6, %s8310_s15  ;;  %p8319_p11 = scmp.lt.s32.totalorder %s8310_s15, %s8310_s15 }
  0xc7   : > { %p8313_p5 = pnand %p8311_p6, %p8802_p13  ;;  %p8320_p0 = por %p8319_p11, %p8318_p8 }
  0xc9   : > { %p8314_p7 = pneg %p8313_p5 }
  0xcb   : > { %p8321_p3 = pnand %p8320_p0, %p8314_p7 }
  0xcd   : > { %8324 = shalt.err (!%p8321_p3)
}
  0xce   : > { %s8569_s18 = smov 128   ;;  %s8570_s22 = smov 8  }
  0xcf   : > { %7503 = dma.hbm_to_vmem [thread:$0]  (!%p8794_p12), %s8670_s27, 4096, %s853_s6, [#allocation12], %s8569_s18, %s8569_s18, %s8570_s22  }
  0xd0   : > { %s8571_s23 = smov [#allocation16]   ;;  %s8572_s17 = smov [#allocation19]  }
  0xd1   : > { %s881_s26 = sshll.u32 %s8571_s23, 4  ;;  %s913_s19 = sshll.u32 %s8572_s17, 4  ;;  %s882_s26 = int_to_ptr.vmem [resolvable:$true] %s881_s26  ;;  %s914_s19 = int_to_ptr.vmem [resolvable:$true] %s913_s19 }
  0xd2   : > { %s8336_s1 = scalar_lea.vmem %s882_s26, 32  ;;  %p8344_p10 = scmp.lt.s32.totalorder %s882_s26, %s882_s26 }
  0xd3   : > { %p8337_p1 = scmp.ne.s32.totalorder %s882_s26, %s8336_s1  ;;  %p8345_p2 = scmp.lt.s32.totalorder %s8336_s1, %s8336_s1 }
  0xd5   : > { %p8339_p9 = pnand %p8337_p1, %p8802_p13  ;;  %p8346_p6 = por %p8345_p2, %p8344_p10 }
  0xd7   : > { %p8340_p4 = pneg %p8339_p9 }
  0xd9   : > { %p8347_p5 = pnand %p8346_p6, %p8340_p4 }
  0xdb   : > { %8350 = shalt.err (!%p8347_p5)
}
  0xdc   : > { %s9564_s15 = smov 1   ;;  %s9565_s8 = smov 16  }
  0xdd   : > { %7509 = dma.hbm_to_vmem [thread:$0]  (!%p8794_p12), %s8685_s30, 32, %s882_s26, [#allocation15], %s9565_s8, %s9565_s8, %s9564_s15  }
  0xde   : > { %s8362_s6 = scalar_lea.vmem %s914_s19, 128  ;;  %p8370_p0 = scmp.lt.s32.totalorder %s914_s19, %s914_s19 }
  0xdf   : > { %p8363_p7 = scmp.ne.s32.totalorder %s914_s19, %s8362_s6  ;;  %p8371_p3 = scmp.lt.s32.totalorder %s8362_s6, %s8362_s6 }
  0xe1   : > { %p8365_p8 = pnand %p8363_p7, %p8802_p13  ;;  %p8372_p1 = por %p8371_p3, %p8370_p0 }
  0xe3   : > { %p8366_p11 = pneg %p8365_p8 }
  0xe5   : > { %p8373_p9 = pnand %p8372_p1, %p8366_p11 }
  0xe7   : > { %8376 = shalt.err (!%p8373_p9)
}
  0xe8   : > { %7515 = dma.hbm_to_vmem [thread:$0]  (!%p8794_p12), %s8705_s24, 128, %s914_s19, [#allocation18], %s9561_s9, %s9561_s9, %s9560_s16  }
  0xe9   : > { %s8573_s18 = smov [#allocation22]  }
  0xea   : > { %s939_s22 = sshll.u32 %s8573_s18, 4  ;;  %s940_s22 = int_to_ptr.vmem [resolvable:$true] %s939_s22 }
  0xeb   : > { %s8388_s23 = scalar_lea.vmem %s940_s22, 32  ;;  %p8396_p6 = scmp.lt.s32.totalorder %s940_s22, %s940_s22 }
  0xec   : > { %p8389_p4 = scmp.ne.s32.totalorder %s940_s22, %s8388_s23  ;;  %p8397_p5 = scmp.lt.s32.totalorder %s8388_s23, %s8388_s23 }
  0xee   : > { %p8391_p10 = pnand %p8389_p4, %p8802_p13  ;;  %p8398_p7 = por %p8397_p5, %p8396_p6 }
  0xf0   : > { %p8392_p2 = pneg %p8391_p10 }
  0xf2   : > { %p8399_p8 = pnand %p8398_p7, %p8392_p2 }
  0xf4   : > { %8402 = shalt.err (!%p8399_p8)
}
  0xf5   : > { %s9566_s4 = sld [smem:[#allocation52_spill]]  ;;  %p9567_p11 = scmp.ne.s32.totalorder %s9555_s2, 0 }
  0xf6   : > { %p9568_p0 = scmp.eq.s32.totalorder (!%p9567_p11), %s8758_s0, 0 }
  0xf7   : > { %988 = sbr.rel (%p9567_p11) target bundleno = 10184 (0x27c8), region = 132 }
  0xfb   : > { %7521 = dma.hbm_to_vmem [thread:$0]  (!%p8794_p12), %s9566_s4, 32, %s940_s22, [#allocation21], %s9565_s8, %s9565_s8, %s9564_s15  }
  0xfc   : > { %8472 = dma.done.wait (%p9568_p0), [#allocation3], 16   ;;  %p9569_p13 = pmov %p9568_p0 }
  0xfd   : > { %p9570_p3 = pmov %p9568_p0 }
  0xfe   : > { %8474 = vsyncadd (%p9569_p13), [#allocation3], 4294967280 }
  0xff   : > { %8476 = dma.done.wait (%p9570_p3), [#allocation6], 6160   ;;  %p9571_p1 = pmov %p9568_p0 }
 0x100   : > { %p9572_p9 = pmov %p9568_p0 }
 0x101   : > { %8478 = vsyncadd (%p9571_p1), [#allocation6], 4294961136 }
 0x102   : > { %8480 = dma.done.wait (%p9572_p9), [#allocation9], 4096   ;;  %p9573_p12 = pmov %p9568_p0 }
 0x103   : > { %p9574_p4 = pmov %p9568_p0 }
 0x104   : > { %8482 = vsyncadd (%p9573_p12), [#allocation9], 4294963200 }
 0x105   : > { %8484 = dma.done.wait (%p9574_p4), [#allocation12], 4128   ;;  %p9575_p10 = pmov %p9568_p0 }
 0x106   : > { %p9576_p2 = pmov %p9568_p0 }
 0x107   : > { %8486 = vsyncadd (%p9575_p10), [#allocation12], 4294963168 }
 0x108   : > { %8488 = dma.done.wait (%p9576_p2), [#allocation15], 2080   ;;  %p9577_p6 = pmov %p9568_p0 }
 0x109   : > { %p9578_p5 = pmov %p9568_p0 }
 0x10a   : > { %8490 = vsyncadd (%p9577_p6), [#allocation15], 4294965216 }
 0x10b   : > { %8492 = dma.done.wait (%p9578_p5), [#allocation18], 8320   ;;  %p9579_p7 = pmov %p9568_p0 }
 0x10c   : > { %p9580_p8 = pmov %p9568_p0 }
 0x10d   : > { %8494 = vsyncadd (%p9579_p7), [#allocation18], 4294958976 }
 0x10e   : > { %8496 = dma.done.wait (%p9580_p8), [#allocation21], 8224   ;;  %p9581_p11 = pmov %p9568_p0 }
 0x10f   : > { %v8574_v0 = vmov 0.0   ;;  %s9582_s9 = sld [smem:[#allocation35_spill]]  ;;  %vm8575_vm0 = vmmov 0   ;;  %p1127_p0 = scmp.lt.s32.totalorder %s8758_s0, 1  ;;  %v7646_v1 = vld [vmem:[%s9546_s3 + $0x18] sm:$0xff]   ;;  %v7647_v2 = vld [vmem:[%s9546_s3 + $0x10] sm:$0xff]   ;;  %v1289_v51 = vlaneseq }
 0x110   : > { %8498 = vsyncadd (%p9581_p11), [#allocation21], 4294959072  ;;  %7062 = vmatprep.subr.bf16.mxu1 %v8574_v0  ;;  %7070 = vmatprep.mubr.msk.bf16.mxu1 %vm8575_vm0, %v8574_v0  ;;  %s9583_s8 = sld [smem:[#allocation36_spill]]  ;;  %v7648_v3 = vld [vmem:[%s9546_s3 + $0x8] sm:$0xff]   ;;  %v7649_v4 = vld [vmem:[%s9546_s3] sm:$0xff]   ;;  %vm1177_vm1 = vcmask 523264  }
 0x111   : > { %7074 = vmatprep.subr.bf16.mxu0 %v8574_v0  ;;  %7090 = vmatprep.mubr.msk.bf16.mxu0 %vm8575_vm0, %v8574_v0  ;;  %s8941_s7 = scalar_select %p1127_p0, %s8758_s0, 1  ;;  %v7650_v12 = vld [vmem:[#allocation7 + $0xa8] ss:$12 sps:$4 sm:$0xff]   ;;  %v7652_v13 = vld [vmem:[#allocation7 + $0xac] ss:$12 sps:$4 sm:$0xff]   ;;  %v8576_v40 = vmov 0  }
 0x112   : > { %7063 = vmatpush3.bf16.msra.mxu1 %v7646_v1  ;;  %v7653_v14 = vld [vmem:[#allocation7 + $0xb0] ss:$12 sps:$4 sm:$0xff]   ;;  %v7656_v15 = vld [vmem:[#allocation7 + $0x94] ss:$12 sps:$4 sm:$0xff]   ;;  %v7657_v16 = vld [vmem:[#allocation7 + $0x98] ss:$12 sps:$4 sm:$0xff]   ;;  %7645 = vset.pattern.permute.xlu0 %v8576_v40 }
 0x113   : > { %7064 = vmatprep.subr.bf16.mxu1 %v8574_v0  ;;  %s6499_s11 = sshll.u32 %s8941_s7, 2  ;;  %7075 = vmatpush3.bf16.msra.mxu0 %v7653_v14  ;;  %v7654_v17 = vld [vmem:[#allocation7 + $0x90] ss:$12 sps:$4 sm:$0xff]   ;;  %v7658_v23 = vld [vmem:[#allocation7 + $0x78] ss:$12 sps:$4 sm:$0xff]   ;;  %s8964_s16 = sand.u32 1, %s8513_s10  }
 0x114   : > { %7076 = vmatprep.subr.bf16.mxu0 %v8574_v0  ;;  %v7660_v22 = vld [vmem:[#allocation7 + $0x7c] ss:$12 sps:$4 sm:$0xff]   ;;  %v7661_v24 = vld [vmem:[#allocation7 + $0x80] ss:$12 sps:$4 sm:$0xff]   ;;  %v7664_v25 = vld [vmem:[#allocation7 + $0x64] ss:$12 sps:$4 sm:$0xff]  }
 0x115   : > { %s1130_s2 = scalar_lea.vmem %s9582_s9, %s6499_s11  ;;  %v7662_v26 = vld [vmem:[#allocation7 + $0x60] ss:$12 sps:$4 sm:$0xff]   ;;  %v7665_v27 = vld [vmem:[#allocation7 + $0x68] ss:$12 sps:$4 sm:$0xff]   ;;  %v7669_v30 = vld [vmem:[#allocation7 + $0x50] ss:$12 sps:$4 sm:$0xff]  }
 0x116   : > { %7065 = vmatpush3.bf16.msra.mxu1 %v7647_v2  ;;  %v1143_v5 = vld [vmem:[%s1130_s2] sm:$0xf]  ;;  %v7668_v28 = vld [vmem:[#allocation7 + $0x4c] ss:$12 sps:$4 sm:$0xff]   ;;  %v7666_v29 = vld [vmem:[#allocation7 + $0x48] ss:$12 sps:$4 sm:$0xff]  }
 0x117   : > { %7066 = vmatprep.subr.bf16.mxu1 %v8574_v0  ;;  %v1152_v6 = vld [vmem:[%s9583_s8] sm:$0xff]  ;;  %7077 = vmatpush3.bf16.msra.mxu0 %v7657_v16  ;;  %v7673_v33 = vld [vmem:[#allocation7 + $0x38] ss:$12 sps:$4 sm:$0xff]   ;;  %v7681_v39 = vld [vmem:[#allocation7 + $0x8] ss:$12 sps:$4 sm:$0xff]   ;;  %s9584_s26 = sld [smem:[#allocation43_spill]] }
 0x118   : > { %7078 = vmatprep.subr.bf16.mxu0 %v8574_v0  ;;  %v7672_v31 = vld [vmem:[#allocation7 + $0x34] ss:$12 sps:$4 sm:$0xff]   ;;  %v7670_v32 = vld [vmem:[#allocation7 + $0x30] ss:$12 sps:$4 sm:$0xff]   ;;  %v7674_v35 = vld [vmem:[#allocation7 + $0x18] ss:$12 sps:$4 sm:$0xff]  }
 0x119   : > { %v7676_v34 = vld [vmem:[#allocation7 + $0x1c] ss:$12 sps:$4 sm:$0xff]   ;;  %v7677_v36 = vld [vmem:[#allocation7 + $0x20] ss:$12 sps:$4 sm:$0xff]   ;;  %v7680_v37 = vld [vmem:[#allocation7 + $0x4] ss:$12 sps:$4 sm:$0xff]  }
 0x11a   : > { %7067 = vmatpush3.bf16.msra.mxu1 %v7648_v3  ;;  %v7678_v38 = vld [vmem:[#allocation7] ss:$12 sps:$4 sm:$0xff]   ;;  %v6507_v45 = vld [vmem:[#allocation2] ss:$0 sm:$0xff]  ;;  %s9521_s17 = sshll.u32 %s8964_s16, 3  ;;  %v8981_v52 = vshrl.u32 %v1289_v51, 7 }
 0x11b   : > { %7068 = vmatprep.subr.bf16.mxu1 %v8574_v0  ;;  %7079 = vmatpush3.bf16.msra.mxu0 %v7661_v24  ;;  %v6508_v47 = vld [vmem:[#allocation5] ss:$0 sm:$0xff]  ;;  %s8973_s19 = scalar_lea.vmem [#allocation24], %s9521_s17  ;;  %vm1516_vm2 = vcmask 261120   ;;  %s8577_s1 = smov 64   ;;  %vm1587_vm3 = vcmask 1043456  }
 0x11c   : > { %7080 = vmatprep.subr.bf16.mxu0 %v8574_v0  ;;  %v8984_v53 = vsub.s32 1, %v8981_v52  ;;  %v8987_v54 = vsub.s32 0, %v8981_v52  ;;  %v8991_v56 = vsub.s32 2, %v8981_v52  ;;  %s8578_s15 = smov 96   ;;  %s8579_s6 = smov 32   ;;  %vm1571_vm4 = vcmask 64512  }
 0x11d   : > { %v1287_v55 = vld [vmem:[%s9584_s26] sm:$0x7]  ;;  %s9585_s18 = sld [smem:[#allocation39_spill]]  ;;  %vm1984_vm5 = vcmask 785408   ;;  %s6500_s11 = sshll.u32 %s8941_s7, 3 }
 0x11e   : > { %7069 = vmatpush3.bf16.msra.mxu1 %v7649_v4  ;;  %v1296_v57 = vrot.slane %v1287_v55, %v8984_v53  ;;  %v1292_v60 = vrot.slane %v1287_v55, %v8987_v54  ;;  %v1300_v63 = vrot.slane %v1287_v55, %v8991_v56  ;;  %s9586_s23 = sld [smem:[#allocation45_spill]]  ;;  %p9597_p3 = scmp.ne.s32.totalorder %s9552_s28, 0 }
 0x11f   : > { %1432 = vmatprep.subr.bf16.mxu1 %v7652_v13  ;;  %7081 = vmatpush3.bf16.msra.mxu0 %v7665_v27  ;;  %s9587_s9 = sld [smem:[#allocation40_spill]] }
 0x120   : > { %7082 = vmatprep.subr.bf16.mxu0 %v8574_v0  ;;  %s9588_s8 = sld [smem:[#allocation38_spill]] }
 0x121   : > { %7071 = vmatmul.mubr.msk.bf16.vlgmr.msra.gmra.mxu1 %vm1177_vm1, %v1143_v5 }
 0x122   : > { %1433 = vmatpush1.bf16.msra.mxu1 %v7650_v12  ;;  %1464 = vmatprep.mubr.bf16.mxu1 %v8576_v40 }
 0x123   : > { %1434 = vmatprep.subr.bf16.mxu1 %v7656_v15  ;;  %7083 = vmatpush3.bf16.msra.mxu0 %v7669_v30  ;;  %s9029_s22 = scalar_lea.vmem %s9585_s18, %s8941_s7  ;;  %s9589_s7 = sld [smem:[#allocation46_spill]] }
 0x124   : > { %7084 = vmatprep.subr.bf16.mxu0 %v8574_v0 }
 0x125   : > { %s1141_s2 = scalar_lea.vmem %s9587_s9, %s6500_s11 }
 0x126   : > { %1435 = vmatpush1.bf16.msra.mxu1 %v7654_v17  ;;  %s1134_s18 = scalar_lea.vmem %s9588_s8, %s6500_s11  ;;  %s9591_s8 = sld [smem:[#allocation47_spill]] }
 0x127   : > { %1436 = vmatprep.subr.bf16.mxu1 %v7660_v22  ;;  %7085 = vmatpush3.bf16.msra.mxu0 %v7673_v33  ;;  %v6534_v22 = vld [vmem:[%s9029_s22] ss:$0 sm:$0xff]  ;;  %s9592_s11 = sld [smem:[#allocation48_spill]] }
 0x128   : > { %7086 = vmatprep.subr.bf16.mxu0 %v8574_v0 }
 0x129   : > { %s9590_s9 = smov %s9589_s7 }
 0x12a   : > { %1437 = vmatpush1.bf16.msra.mxu1 %v7658_v23 }
 0x12b   : > { %1438 = vmatprep.subr.bf16.mxu1 %v7664_v25  ;;  %7087 = vmatpush3.bf16.msra.mxu0 %v7677_v36 }
 0x12c   : > { %7088 = vmatprep.subr.bf16.mxu0 %v8574_v0 }
 0x12e   : > { %1439 = vmatpush1.bf16.msra.mxu1 %v7662_v26 }
 0x12f   : > { %1440 = vmatprep.subr.bf16.mxu1 %v7668_v28  ;;  %7089 = vmatpush3.bf16.msra.mxu0 %v7681_v39 }
 0x130   : > { %7106 = vmatprep.subr.bf16.mxu0 %v8574_v0 }
 0x132   : > { %1441 = vmatpush1.bf16.msra.mxu1 %v7666_v29 }
 0x133   : > { %1442 = vmatprep.subr.bf16.mxu1 %v7672_v31 }
 0x136   : > { %1443 = vmatpush1.bf16.msra.mxu1 %v7670_v32 }
 0x137   : > { %1444 = vmatprep.subr.bf16.mxu1 %v7676_v34 }
 0x13a   : > { %1445 = vmatpush1.bf16.msra.mxu1 %v7674_v35 }
 0x13b   : > { %1446 = vmatprep.subr.bf16.mxu1 %v7680_v37 }
 0x13e   : > { %1447 = vmatpush1.bf16.msra.mxu1 %v7678_v38 }
 0x13f   : > { %7094 = vmatprep.subr.bf16.mxu1 %v8574_v0 }
 0x1e1   : > { %v1215_v7 = vpop.f32.mrf.mxu1 }
 0x1e2   : > { %v1216_v8 = vadd.f32 %v1215_v7, %v1152_v6 }
 0x1e3   : > { %v7072_v9 = vpop.f32.mrf.mxu1 }
 0x1e4   : > { %1223 = vadd.xlane.f32.xlu0 %v1216_v8 }
 0x1e5   : > { %v1218_v10 = vpop.f32.mrf.mxu1 }
 0x1e7   : > { %v7073_v11 = vpop.f32.mrf.mxu1 }
 0x26d   : > { %v1224_v18 = vpop.xlane.xlu0 %1223 }
 0x26e   : > { %v1226_v19 = vmul.f32 0.0078125, %v1224_v18 }
 0x270   : > { %v1227_v20 = vsub.f32 %v1216_v8, %v1226_v19 }
 0x272   : > { %v1228_v21 = vmul.f32 %v1227_v20, %v1227_v20 }
 0x274   : > { %1229 = vadd.xlane.f32.xlu0 %v1228_v21 }
 0x2fd   : > { %v1230_v41 = vpop.xlane.xlu0 %1229 }
 0x2fe   : > { %v1231_v42 = vmul.f32 0.0078125, %v1230_v41 }
 0x300   : > { %v1232_v43 = vadd.f32 1e-12, %v1231_v42 }
 0x302   : > { %7970 = vrsqrt.f32 %v1232_v43 }
 0x30f   : > { %v7971_v44 = vpop.eup %7970 }
 0x310   : > { %v1234_v46 = vmul.f32 %v7971_v44, %v1227_v20 }
 0x312   : > { %v1241_v48 = vmul.f32 %v6507_v45, %v1234_v46 }
 0x314   : > { %v8967_v49 = vadd.f32 %v6508_v47, %v1241_v48 }
 0x316   : > { %v1254_v50 = vpack.c.bf16 %v8967_v49, %v8967_v49  ;;  %1249 = vst [vmem:[%s8973_s19] sm:$0xff] %v8967_v49 }
 0x318   : > { %1465 = vmatmul.mubr.bf16.vlgmr.msra.gmra.mxu1 %v1254_v50  ;;  %7091 = vmatmul.mubr.bf16.vlgmr.msra.gmra.mxu0 %v1254_v50 }
 0x319   : > { %7096 = vmatprep.mubr.msk.bf16.mxu1 %vm8575_vm0, %v8574_v0  ;;  %7108 = vmatprep.mubr.msk.bf16.mxu0 %vm8575_vm0, %v8574_v0 }
 0x3d8   : > { %v1466_v58 = vpop.f32.mrf.mxu1  ;;  %v1507_v59 = vpop.f32.mrf.mxu0 }
 0x3d9   : > { %v1467_v4 = vadd.f32 %v1466_v58, %v1292_v60  ;;  %v1508_v8 = vadd.f32 %v1507_v59, %v1300_v63 }
 0x3da   : > { %v1468_v61 = vpop.f32.mrf.mxu1  ;;  %v7092_v62 = vpop.f32.mrf.mxu0 }
 0x3db   : > { %v1469_v1 = vadd.f32 %v1468_v61, %v1296_v57  ;;  %v1513_v10 = vpack.c.bf16 %v1467_v4, %v1467_v4  ;;  %v9000_v11 = vpack.c.bf16 %v1508_v8, %v1508_v8 }
 0x3dc   : > { %v1470_v2 = vpop.f32.mrf.mxu1  ;;  %v1510_v3 = vpop.f32.mrf.mxu0 }
 0x3dd   : > { %v1514_v5 = vpack.c.bf16 %v1469_v1, %v1469_v1  ;;  %v1589_v12 = vsel %vm1587_vm3, %v9000_v11, 0 }
 0x3de   : > { %v1471_v6 = vpop.f32.mrf.mxu1  ;;  %v7093_v7 = vpop.f32.mrf.mxu0 }
 0x3df   : > { %1748 = vrot.lane.b32.xlu0 %v1514_v5, %s8577_s1  ;;  %1635 = vrot.lane.b32.xlu1 %v1514_v5, %s8578_s15  ;;  %v1521_v9 = vsel %vm1516_vm2, %v1514_v5, 0 }
 0x3e0   : > { %7095 = vmatpush3.bf16.xpose.msra.mxu1 %v1521_v9 }
 0x3e1   : > { %7100 = vmatprep.subr.bf16.mxu1 %v8574_v0 }
 0x3e3   : > { %1632 = vrot.lane.b32.xlu1 %v1513_v10, %s8578_s15 }
 0x3e7   : > { %1746 = vrot.lane.b32.xlu1 %v1513_v10, %s8577_s1  ;;  %7097 = vmatmul.mubr.msk.bf16.vlgmr.msra.gmra.mxu1 %vm1516_vm2, %v1513_v10 }
 0x3e8   : > { %7101 = vmatpush3.bf16.msra.mxu1 %v1589_v12  ;;  %7102 = vmatprep.mubr.msk.bf16.mxu1 %vm8575_vm0, %v8574_v0 }
 0x3e9   : > { %7112 = vmatprep.subr.bf16.mxu1 %v8574_v0 }
 0x3eb   : > { %1860 = vrot.lane.b32.xlu1 %v1514_v5, %s8579_s6 }
 0x3ef   : > { %1858 = vrot.lane.b32.xlu1 %v1513_v10, %s8579_s6 }
 0x451   : > { %v1636_v13 = vpop.permute.xlu1 %1635  ;;  %v1749_v16 = vpop.permute.xlu0 %1748 }
 0x452   : > { %v1641_v14 = vsel %vm1516_vm2, %v1636_v13, 0  ;;  %v1754_v18 = vsel %vm1516_vm2, %v1749_v16, 0 }
 0x453   : > { %7107 = vmatpush3.bf16.xpose.msra.mxu0 %v1641_v14 }
 0x454   : > { %7118 = vmatprep.subr.bf16.mxu0 %v8574_v0 }
 0x455   : > { %v1633_v15 = vpop.permute.xlu1 %1632 }
 0x459   : > { %v1747_v17 = vpop.permute.xlu1 %1746 }
 0x45a   : > { %7109 = vmatmul.mubr.msk.bf16.vlgmr.msra.gmra.mxu0 %vm1516_vm2, %v1633_v15 }
 0x45b   : > { %7119 = vmatpush3.bf16.xpose.msra.mxu0 %v1754_v18  ;;  %7120 = vmatprep.mubr.msk.bf16.mxu0 %vm8575_vm0, %v8574_v0 }
 0x45c   : > { %7130 = vmatprep.subr.bf16.mxu0 %v8574_v0 }
 0x45d   : > { %v1861_v19 = vpop.permute.xlu1 %1860 }
 0x45e   : > { %v1866_v20 = vsel %vm1516_vm2, %v1861_v19, 0 }
 0x461   : > { %v1859_v21 = vpop.permute.xlu1 %1858 }
 0x462   : > { %7121 = vmatmul.mubr.msk.bf16.vlgmr.msra.gmra.mxu0 %vm1516_vm2, %v1747_v17 }
 0x463   : > { %7131 = vmatpush3.bf16.xpose.msra.mxu0 %v1866_v20  ;;  %7132 = vmatprep.mubr.msk.bf16.mxu0 %vm8575_vm0, %v8574_v0 }
 0x464   : > { %7142 = vmatprep.subr.bf16.mxu0 %v8574_v0 }
 0x46a   : > { %7133 = vmatmul.mubr.msk.bf16.vlgmr.msra.gmra.mxu0 %vm1516_vm2, %v1859_v21 }
 0x46b   : > { %7158 = vmatprep.mubr.msk.bf16.mxu0 %vm8575_vm0, %v8574_v0 }
 0x4a7   : > { %v1557_v23 = vpop.f32.mrf.mxu1 }
 0x4a8   : > { %v1563_v24 = vmul.f32 0.17677669, %v1557_v23 }
 0x4a9   : > { %v7098_v25 = vpop.f32.mrf.mxu1 }
 0x4aa   : > { %v1570_v26 = vadd.f32 %v6534_v22, %v1563_v24 }
 0x4ab   : > { %v1560_v27 = vpop.f32.mrf.mxu1 }
 0x4ac   : > { %v1572_v28 = vsel %vm1571_vm4, %v1570_v26, -inf }
 0x4ad   : > { %1573 = vmax.xlane.f32.xlu1 %v1572_v28  ;;  %v7099_v29 = vpop.f32.mrf.mxu1 }
 0x51a   : > { %v1677_v30 = vpop.f32.mrf.mxu0 }
 0x51b   : > { %v1683_v31 = vmul.f32 0.17677669, %v1677_v30 }
 0x51c   : > { %v7110_v32 = vpop.f32.mrf.mxu0 }
 0x51d   : > { %v1684_v33 = vadd.f32 %v6534_v22, %v1683_v31 }
 0x51e   : > { %v1680_v34 = vpop.f32.mrf.mxu0 }
 0x51f   : > { %v1685_v35 = vsel %vm1571_vm4, %v1684_v33, -inf }
 0x520   : > { %1686 = vmax.xlane.f32.xlu0 %v1685_v35  ;;  %v7111_v36 = vpop.f32.mrf.mxu0 }
 0x522   : > { %v1790_v37 = vpop.f32.mrf.mxu0 }
 0x523   : > { %v1796_v38 = vmul.f32 0.17677669, %v1790_v37 }
 0x524   : > { %v7122_v39 = vpop.f32.mrf.mxu0 }
 0x525   : > { %v1797_v41 = vadd.f32 %v6534_v22, %v1796_v38 }
 0x526   : > { %v1793_v42 = vpop.f32.mrf.mxu0 }
 0x527   : > { %v1798_v43 = vsel %vm1571_vm4, %v1797_v41, -inf  ;;  %v7683_v42 = vld [vmem:[#allocation8 + $0x30] sm:$0xff]  }
 0x528   : > { %v7123_v44 = vpop.f32.mrf.mxu0  ;;  %1799 = vmax.xlane.f32.xlu1 %v1798_v43 }
 0x52a   : > { %v1902_v45 = vpop.f32.mrf.mxu0 }
 0x52b   : > { %v1908_v46 = vmul.f32 0.17677669, %v1902_v45  ;;  %v7684_v45 = vld [vmem:[#allocation8 + $0x28] sm:$0xff]  }
 0x52c   : > { %v7134_v47 = vpop.f32.mrf.mxu0 }
 0x52d   : > { %v1909_v48 = vadd.f32 %v6534_v22, %v1908_v46 }
 0x52e   : > { %v1905_v50 = vpop.f32.mrf.mxu0 }
 0x52f   : > { %v1910_v51 = vsel %vm1571_vm4, %v1909_v48, -inf }
 0x530   : > { %v7135_v55 = vpop.f32.mrf.mxu0  ;;  %1911 = vmax.xlane.f32.xlu1 %v1910_v51 }
 0x531   : > { %v7686_v55 = vld [vmem:[#allocation8 + $0x18] sm:$0xff]  }
 0x536   : > { %v1574_v57 = vpop.xlane.xlu1 %1573 }
 0x537   : > { %v1575_v58 = vsub.f32 %v1570_v26, %v1574_v57 }
 0x539   : > { %v1576_v59 = vmul.f32 1.442695, %v1575_v58 }
 0x53b   : > { %7972 = vpow2.f32 %v1576_v59  ;;  %v7687_v59 = vld [vmem:[#allocation8 + $0x10] sm:$0xff]  }
 0x548   : > { %v7973_v60 = vpop.eup %7972 }
 0x549   : > { %v1578_v61 = vsel %vm1571_vm4, %v7973_v60, 0.0 }
 0x54a   : > { %1579 = vadd.xlane.f32.xlu0 %v1578_v61  ;;  %v7689_v61 = vld [vmem:[#allocation8] sm:$0xff]  }
 0x5a9   : > { %v1687_v62 = vpop.xlane.xlu0 %1686 }
 0x5aa   : > { %v1688_v63 = vsub.f32 %v1684_v33, %v1687_v62 }
 0x5ac   : > { %v1689_v1 = vmul.f32 1.442695, %v1688_v63 }
 0x5ae   : > { %7974 = vpow2.f32 %v1689_v1 }
 0x5b1   : > { %v1800_v2 = vpop.xlane.xlu1 %1799 }
 0x5b2   : > { %v1801_v3 = vsub.f32 %v1797_v41, %v1800_v2  ;;  %v7682_v41 = vld [vmem:[#allocation8 + $0x38] sm:$0xff]  }
 0x5b3   : > { %7143 = vmatpush3.bf16.msra.mxu0 %v7682_v41  ;;  %v7715_v41 = vld [vmem:[#allocation13] ss:$8 sps:$4 sm:$0xff]  }
 0x5b4   : > { %v1802_v4 = vmul.f32 1.442695, %v1801_v3  ;;  %7144 = vmatprep.subr.bf16.mxu0 %v8574_v0 }
 0x5b6   : > { %7976 = vpow2.f32 %v1802_v4 }
 0x5b7   : > { %7145 = vmatpush3.bf16.msra.mxu0 %v7683_v42  ;;  %v1250_v42 = vld [vmem:[%s1134_s18] sm:$0xff]  ;;  %s9594_s18 = sld [smem:[#allocation50_spill]] }
 0x5b8   : > { %7146 = vmatprep.subr.bf16.mxu0 %v8574_v0 }
 0x5b9   : > { %v1912_v10 = vpop.xlane.xlu1 %1911 }
 0x5ba   : > { %v1913_v12 = vsub.f32 %v1909_v48, %v1912_v10  ;;  %v7685_v48 = vld [vmem:[#allocation8 + $0x20] sm:$0xff]   ;;  %v6542_v10 = vld [vmem:[%s9586_s23] ss:$0 sm:$0xff] }
 0x5bb   : > { %v7975_v5 = vpop.eup %7974  ;;  %7147 = vmatpush3.bf16.msra.mxu0 %v7684_v45  ;;  %v7719_v45 = vld [vmem:[#allocation10 + $0x10] sm:$0xff]  }
 0x5bc   : > { %v1691_v6 = vsel %vm1571_vm4, %v7975_v5, 0.0  ;;  %v1914_v13 = vmul.f32 1.442695, %v1913_v12  ;;  %7148 = vmatprep.subr.bf16.mxu0 %v8574_v0 }
 0x5bd   : > { %1692 = vadd.xlane.f32.xlu1 %v1691_v6 }
 0x5bf   : > { %7149 = vmatpush3.bf16.msra.mxu0 %v7685_v48 }
 0x5c0   : > { %7150 = vmatprep.subr.bf16.mxu0 %v8574_v0 }
 0x5c3   : > { %v7977_v7 = vpop.eup %7976  ;;  %7151 = vmatpush3.bf16.msra.mxu0 %v7686_v55 }
 0x5c4   : > { %v1804_v8 = vsel %vm1571_vm4, %v7977_v7, 0.0  ;;  %7152 = vmatprep.subr.bf16.mxu0 %v8574_v0 }
 0x5c5   : > { %1805 = vadd.xlane.f32.xlu0 %v1804_v8 }
 0x5c7   : > { %7153 = vmatpush3.bf16.msra.mxu0 %v7687_v59  ;;  %v6552_v59 = vld [vmem:[%s9591_s8] ss:$0 sm:$0xff] }
 0x5c8   : > { %7154 = vmatprep.subr.bf16.mxu0 %v8574_v0 }
 0x5ce   : > { %1810 = vrot.lane.b32.xlu1 %v9000_v11, %s8577_s1 }
 0x5d3   : > { %v1580_v9 = vpop.xlane.xlu0 %1579 }
 0x5d4   : > { %7978 = vrcp.f32 %v1580_v9 }
 0x5d5   : > { %7980 = vpow2.f32 %v1914_v13 }
 0x5db   : > { %1698 = vrot.lane.b32.xlu0 %v9000_v11, %s8578_s15 }
 0x5e1   : > { %v7979_v14 = vpop.eup %7978 }
 0x5e2   : > { %v1582_v15 = vmul.f32 %v7979_v14, %v7973_v60  ;;  %v7981_v17 = vpop.eup %7980  ;;  %v7688_v60 = vld [vmem:[#allocation8 + $0x8] sm:$0xff]  }
 0x5e3   : > { %v1916_v18 = vsel %vm1571_vm4, %v7981_v17, 0.0  ;;  %7155 = vmatpush3.bf16.msra.mxu0 %v7688_v60 }
 0x5e4   : > { %v1583_v16 = vpack.c.bf16 %v1582_v15, %v1582_v15  ;;  %7156 = vmatprep.subr.bf16.mxu0 %v8574_v0 }
 0x5e6   : > { %7103 = vmatmul.mubr.msk.bf16.vlgmr.msra.gmra.mxu1 %vm1571_vm4, %v1583_v16 }
 0x5e7   : > { %7114 = vmatprep.mubr.msk.bf16.mxu1 %vm8575_vm0, %v8574_v0  ;;  %7157 = vmatpush3.bf16.msra.mxu0 %v7689_v61 }
 0x5f2   : > { %1917 = vadd.xlane.f32.xlu1 %v1916_v18  ;;  %v7690_v18 = vld [vmem:[#allocation13 + $0x70] ss:$8 sps:$4 sm:$0xff]  }
 0x603   : > { %1922 = vrot.lane.b32.xlu1 %v9000_v11, %s8579_s6 }
 0x646   : > { %v1693_v19 = vpop.xlane.xlu1 %1692 }
 0x647   : > { %7982 = vrcp.f32 %v1693_v19  ;;  %v7692_v19 = vld [vmem:[#allocation13 + $0x74] ss:$8 sps:$4 sm:$0xff]  }
 0x648   : > { %2352 = vmatprep.subr.bf16.mxu0 %v7692_v19 }
 0x64a   : > { %v1811_v25 = vpop.permute.xlu1 %1810 }
 0x64b   : > { %v1816_v27 = vsel %vm1587_vm3, %v1811_v25, 0  ;;  %v7701_v25 = vld [vmem:[#allocation13 + $0x44] ss:$8 sps:$4 sm:$0xff]  }
 0x64e   : > { %v1806_v20 = vpop.xlane.xlu0 %1805 }
 0x64f   : > { %7984 = vrcp.f32 %v1806_v20  ;;  %v7695_v20 = vld [vmem:[#allocation13 + $0x64] ss:$8 sps:$4 sm:$0xff]  }
 0x652   : > { %v1699_v21 = vpop.permute.xlu0 %1698 }
 0x653   : > { %v1704_v22 = vsel %vm1587_vm3, %v1699_v21, 0  ;;  %v7702_v21 = vld [vmem:[#allocation10 + $0x38] sm:$0xff]  }
 0x654   : > { %v7983_v23 = vpop.eup %7982  ;;  %7113 = vmatpush3.bf16.msra.mxu1 %v1704_v22  ;;  %v7693_v22 = vld [vmem:[#allocation13 + $0x60] ss:$8 sps:$4 sm:$0xff]  }
 0x655   : > { %7124 = vmatprep.subr.bf16.mxu1 %v8574_v0  ;;  %v1695_v24 = vmul.f32 %v7983_v23, %v7975_v5  ;;  %v7698_v23 = vld [vmem:[#allocation13 + $0x54] ss:$8 sps:$4 sm:$0xff]  }
 0x657   : > { %v1696_v26 = vpack.c.bf16 %v1695_v24, %v1695_v24  ;;  %v7696_v24 = vld [vmem:[#allocation13 + $0x50] ss:$8 sps:$4 sm:$0xff]  }
 0x659   : > { %7115 = vmatmul.mubr.msk.bf16.vlgmr.msra.gmra.mxu1 %vm1571_vm4, %v1696_v26  ;;  %v7705_v26 = vld [vmem:[#allocation13 + $0x34] ss:$8 sps:$4 sm:$0xff]  }
 0x65a   : > { %7125 = vmatpush3.bf16.msra.mxu1 %v1816_v27  ;;  %7126 = vmatprep.mubr.msk.bf16.mxu1 %vm8575_vm0, %v8574_v0  ;;  %v7703_v27 = vld [vmem:[#allocation13 + $0x30] ss:$8 sps:$4 sm:$0xff]  }
 0x65b   : > { %7136 = vmatprep.subr.bf16.mxu1 %v8574_v0 }
 0x65c   : > { %v7985_v11 = vpop.eup %7984 }
 0x65d   : > { %v1808_v28 = vmul.f32 %v7985_v11, %v7977_v7 }
 0x65f   : > { %v1809_v29 = vpack.c.bf16 %v1808_v28, %v1808_v28 }
 0x661   : > { %7127 = vmatmul.mubr.msk.bf16.vlgmr.msra.gmra.mxu1 %vm1571_vm4, %v1809_v29 }
 0x662   : > { %7138 = vmatprep.mubr.msk.bf16.mxu1 %vm8575_vm0, %v8574_v0 }
 0x67b   : > { %v1918_v30 = vpop.xlane.xlu1 %1917 }
 0x67c   : > { %7986 = vrcp.f32 %v1918_v30 }
 0x67f   : > { %v1923_v31 = vpop.permute.xlu1 %1922 }
 0x680   : > { %v1928_v32 = vsel %vm1587_vm3, %v1923_v31, 0  ;;  %v7706_v31 = vld [vmem:[#allocation10 + $0x30] sm:$0xff]  }
 0x681   : > { %7137 = vmatpush3.bf16.msra.mxu1 %v1928_v32  ;;  %v7709_v32 = vld [vmem:[#allocation13 + $0x24] ss:$8 sps:$4 sm:$0xff]  }
 0x682   : > { %7162 = vmatprep.subr.bf16.mxu1 %v8574_v0 }
 0x689   : > { %v7987_v33 = vpop.eup %7986 }
 0x68a   : > { %v1920_v34 = vmul.f32 %v7987_v33, %v7981_v17  ;;  %v7707_v33 = vld [vmem:[#allocation13 + $0x20] ss:$8 sps:$4 sm:$0xff]  }
 0x68c   : > { %v1921_v35 = vpack.c.bf16 %v1920_v34, %v1920_v34  ;;  %v7710_v34 = vld [vmem:[#allocation10 + $0x28] sm:$0xff]  }
 0x68e   : > { %7139 = vmatmul.mubr.msk.bf16.vlgmr.msra.gmra.mxu1 %vm1571_vm4, %v1921_v35  ;;  %v7711_v35 = vld [vmem:[#allocation13 + $0x10] ss:$8 sps:$4 sm:$0xff]  }
 0x68f   : > { %7178 = vmatprep.mubr.msk.bf16.mxu1 %vm8575_vm0, %v8574_v0  ;;  %7163 = vmatpush3.bf16.msra.mxu1 %v7702_v21 }
 0x690   : > { %7164 = vmatprep.subr.bf16.mxu1 %v8574_v0 }
 0x693   : > { %7165 = vmatpush3.bf16.msra.mxu1 %v7706_v31 }
 0x694   : > { %7166 = vmatprep.subr.bf16.mxu1 %v8574_v0 }
 0x697   : > { %7167 = vmatpush3.bf16.msra.mxu1 %v7710_v34 }
 0x698   : > { %7168 = vmatprep.subr.bf16.mxu1 %v8574_v0 }
 0x6a6   : > { %v1625_v36 = vpop.f32.mrf.mxu1 }
 0x6a8   : > { %v7104_v37 = vpop.f32.mrf.mxu1 }
 0x6a9   : > { %v7717_v37 = vld [vmem:[#allocation13 + $0x4] ss:$8 sps:$4 sm:$0xff]  }
 0x6aa   : > { %v1628_v38 = vpop.f32.mrf.mxu1 }
 0x6ab   : > { %v7714_v38 = vld [vmem:[#allocation10 + $0x20] sm:$0xff]  }
 0x6ac   : > { %v7105_v39 = vpop.f32.mrf.mxu1  ;;  %7169 = vmatpush3.bf16.msra.mxu1 %v7714_v38 }
 0x6ad   : > { %v1252_v39 = vld [vmem:[%s1141_s2] sm:$0xff]  ;;  %7170 = vmatprep.subr.bf16.mxu1 %v8574_v0  ;;  %s9593_s2 = smov %s9592_s11 }
 0x719   : > { %v1740_v43 = vpop.f32.mrf.mxu1 }
 0x71a   : > { %1971 = vrot.lane.b32.xlu0 %v1740_v43, %s8579_s6  ;;  %v7718_v43 = vld [vmem:[#allocation10 + $0x18] sm:$0xff]  }
 0x71b   : > { %v7116_v44 = vpop.f32.mrf.mxu1  ;;  %7171 = vmatpush3.bf16.msra.mxu1 %v7718_v43 }
 0x71c   : > { %v9086_v44 = vpack.c.bf16 %v1252_v39, %v1252_v39  ;;  %7172 = vmatprep.subr.bf16.mxu1 %v8574_v0 }
 0x71d   : > { %v1743_v46 = vpop.f32.mrf.mxu1 }
 0x71e   : > { %v7720_v46 = vld [vmem:[#allocation10 + $0x8] sm:$0xff]  }
 0x71f   : > { %v7117_v47 = vpop.f32.mrf.mxu1  ;;  %7173 = vmatpush3.bf16.msra.mxu1 %v7719_v45 }
 0x720   : > { %7174 = vmatprep.subr.bf16.mxu1 %v8574_v0  ;;  %v7721_v47 = vld [vmem:[#allocation10] sm:$0xff]  }
 0x721   : > { %v1852_v50 = vpop.f32.mrf.mxu1 }
 0x722   : > { %1975 = vrot.lane.b32.xlu1 %v1852_v50, %s8577_s1 }
 0x723   : > { %v7128_v51 = vpop.f32.mrf.mxu1  ;;  %7175 = vmatpush3.bf16.msra.mxu1 %v7720_v46 }
 0x724   : > { %7176 = vmatprep.subr.bf16.mxu1 %v8574_v0 }
 0x725   : > { %v1855_v57 = vpop.f32.mrf.mxu1 }
 0x726   : > { %v6551_v57 = vld [vmem:[%s9589_s7] ss:$0 sm:$0xff]  ;;  %s9595_s7 = sld [smem:[#allocation51_spill]] }
 0x727   : > { %v7129_v58 = vpop.f32.mrf.mxu1  ;;  %7177 = vmatpush3.bf16.msra.mxu1 %v7721_v47 }
 0x728   : > { %7182 = vmatprep.subr.bf16.mxu1 %v8574_v0 }
 0x72c   : > { %s9596_s17 = smov %s9595_s7 }
 0x74e   : > { %v1964_v62 = vpop.f32.mrf.mxu1 }
 0x74f   : > { %1979 = vrot.lane.b32.xlu0 %v1964_v62, %s8578_s15 }
 0x750   : > { %v7140_v63 = vpop.f32.mrf.mxu1 }
 0x752   : > { %v1967_v1 = vpop.f32.mrf.mxu1 }
 0x754   : > { %v7141_v2 = vpop.f32.mrf.mxu1 }
 0x755   : > { %v2260_v2 = vld [vmem:[%s9592_s11] sm:$0x3] }
 0x78c   : > { %v1972_v3 = vpop.permute.xlu0 %1971 }
 0x78d   : > { %v1982_v5 = vsel %vm1516_vm2, %v1625_v36, %v1972_v3  ;;  %v7713_v36 = vld [vmem:[#allocation13 + $0x14] ss:$8 sps:$4 sm:$0xff]   ;;  %v2265_v3 = vrot.slane %v2260_v2, %v8987_v54 }
 0x794   : > { %v1976_v4 = vpop.permute.xlu1 %1975 }
 0x795   : > { %v1983_v6 = vsel %vm1177_vm1, %v1982_v5, %v1976_v4  ;;  %v2269_v4 = vrot.slane %v2260_v2, %v8984_v53 }
 0x7c1   : > { %v1980_v7 = vpop.permute.xlu0 %1979 }
 0x7c2   : > { %v1985_v8 = vsel %vm1984_vm5, %v1983_v6, %v1980_v7 }
 0x7c3   : > { %v1986_v9 = vpack.c.bf16 %v1985_v8, %v1985_v8 }
 0x7c5   : > { %7159 = vmatmul.mubr.bf16.vlgmr.msra.gmra.mxu0 %v1986_v9 }
 0x7c6   : > { %2384 = vmatprep.mubr.bf16.mxu0 %v8576_v40  ;;  %2353 = vmatpush1.bf16.msra.mxu0 %v7690_v18 }
 0x7c7   : > { %2354 = vmatprep.subr.bf16.mxu0 %v7695_v20 }
 0x7ca   : > { %2355 = vmatpush1.bf16.msra.mxu0 %v7693_v22 }
 0x7cb   : > { %2356 = vmatprep.subr.bf16.mxu0 %v7698_v23 }
 0x7ce   : > { %2357 = vmatpush1.bf16.msra.mxu0 %v7696_v24 }
 0x7cf   : > { %2358 = vmatprep.subr.bf16.mxu0 %v7701_v25 }
 0x885   : > { %v2092_v12 = vpop.f32.mrf.mxu0 }
 0x886   : > { %v2093_v13 = vadd.f32 %v6542_v10, %v2092_v12 }
 0x887   : > { %v7160_v14 = vpop.f32.mrf.mxu0 }
 0x888   : > { %v2098_v15 = vadd.f32 %v2093_v13, %v8967_v49  ;;  %v7699_v49 = vld [vmem:[#allocation13 + $0x40] ss:$8 sps:$4 sm:$0xff]   ;;  %v6553_v14 = vld [vmem:[#allocation11] ss:$0 sm:$0xff] }
 0x889   : > { %v2095_v16 = vpop.f32.mrf.mxu0  ;;  %2359 = vmatpush1.bf16.msra.mxu0 %v7699_v49 }
 0x88a   : > { %2101 = vadd.xlane.f32.xlu1 %v2098_v15  ;;  %2360 = vmatprep.subr.bf16.mxu0 %v7705_v26 }
 0x88b   : > { %v7161_v17 = vpop.f32.mrf.mxu0 }
 0x88d   : > { %2361 = vmatpush1.bf16.msra.mxu0 %v7703_v27 }
 0x88e   : > { %2362 = vmatprep.subr.bf16.mxu0 %v7709_v32 }
 0x891   : > { %2363 = vmatpush1.bf16.msra.mxu0 %v7707_v33 }
 0x892   : > { %2364 = vmatprep.subr.bf16.mxu0 %v7713_v36 }
 0x895   : > { %2365 = vmatpush1.bf16.msra.mxu0 %v7711_v35 }
 0x896   : > { %2366 = vmatprep.subr.bf16.mxu0 %v7717_v37 }
 0x899   : > { %2367 = vmatpush1.bf16.msra.mxu0 %v7715_v41 }
 0x89a   : > { %7206 = vmatprep.subr.bf16.mxu0 %v8574_v0 }
 0x89c   : > { %2385 = vmatmul.mubr.bf16.vlgmr.msra.gmra.mxu0 %v9086_v44 }
 0x89d   : > { %7208 = vmatprep.mubr.msk.bf16.mxu0 %vm8575_vm0, %v8574_v0 }
 0x913   : > { %v2102_v11 = vpop.xlane.xlu1 %2101 }
 0x914   : > { %v2103_v28 = vmul.f32 0.0078125, %v2102_v11 }
 0x916   : > { %v2104_v29 = vsub.f32 %v2098_v15, %v2103_v28 }
 0x918   : > { %v2105_v30 = vmul.f32 %v2104_v29, %v2104_v29 }
 0x91a   : > { %2106 = vadd.xlane.f32.xlu0 %v2105_v30 }
 0x930   : > { %2128 = vperm.xlu0 %7645, %v1250_v42  }
 0x95c   : > { %v2386_v5 = vpop.f32.mrf.mxu0 }
 0x95d   : > { %v2387_v6 = vadd.f32 %v2386_v5, %v2265_v3 }
 0x95e   : > { %v2388_v7 = vpop.f32.mrf.mxu0 }
 0x95f   : > { %v2394_v8 = vpack.c.bf16 %v2387_v6, %v2387_v6  ;;  %v2389_v9 = vadd.f32 %v2388_v7, %v2269_v4 }
 0x960   : > { %v2390_v10 = vpop.f32.mrf.mxu0 }
 0x961   : > { %v2400_v12 = vsel %vm1516_vm2, %v2394_v8, 0  ;;  %v9113_v16 = vpack.c.bf16 %v2389_v9, %v2389_v9 }
 0x962   : > { %v2391_v13 = vpop.f32.mrf.mxu0 }
 0x963   : > { %v2459_v21 = vsel %vm1587_vm3, %v9113_v16, 0 }
 0x9a3   : > { %v2107_v48 = vpop.xlane.xlu0 %2106 }
 0x9a4   : > { %v2108_v50 = vmul.f32 0.0078125, %v2107_v48 }
 0x9a6   : > { %v2109_v51 = vadd.f32 1e-12, %v2108_v50 }
 0x9a8   : > { %7988 = vrsqrt.f32 %v2109_v51 }
 0x9ab   : > { %v9099_v61 = vpop.permute.xlu0 %2128 }
 0x9b5   : > { %v7989_v55 = vpop.eup %7988 }
 0x9b6   : > { %v2111_v58 = vmul.f32 %v7989_v55, %v2104_v29 }
 0x9b8   : > { %v2118_v60 = vmul.f32 %v6551_v57, %v2111_v58 }
 0x9ba   : > { %v2125_v62 = vadd.f32 %v6552_v59, %v2118_v60 }
 0x9bc   : > { %v9102_v63 = vmul.f32 %v9099_v61, %v2125_v62 }
 0x9be   : > { %v2132_v1 = vpack.c.bf16 %v9102_v63, %v9102_v63 }
 0x9c0   : > { %7179 = vmatmul.mubr.bf16.vlgmr.msra.gmra.mxu1 %v2132_v1 }
 0x9c1   : > { %7184 = vmatprep.mubr.msk.bf16.mxu1 %vm8575_vm0, %v8574_v0  ;;  %7183 = vmatpush3.bf16.xpose.msra.mxu1 %v2400_v12 }
 0x9c2   : > { %7188 = vmatprep.subr.bf16.mxu1 %v8574_v0 }
 0xa80   : > { %v2238_v15 = vpop.f32.mrf.mxu1 }
 0xa81   : > { %v2239_v17 = vadd.f32 %v6553_v14, %v2238_v15 }
 0xa82   : > { %v7180_v18 = vpop.f32.mrf.mxu1 }
 0xa83   : > { %v2393_v19 = vpack.c.bf16 %v2239_v17, %v2239_v17 }
 0xa84   : > { %v2241_v20 = vpop.f32.mrf.mxu1 }
 0xa85   : > { %2726 = vrot.lane.b32.xlu0 %v2393_v19, %s8579_s6  ;;  %7185 = vmatmul.mubr.msk.bf16.vlgmr.msra.gmra.mxu1 %vm1516_vm2, %v2393_v19 }
 0xa86   : > { %7189 = vmatpush3.bf16.msra.mxu1 %v2459_v21  ;;  %v7181_v22 = vpop.f32.mrf.mxu1  ;;  %7190 = vmatprep.mubr.msk.bf16.mxu1 %vm8575_vm0, %v8574_v0 }
 0xa87   : > { %7194 = vmatprep.subr.bf16.mxu1 %v8574_v0 }
 0xaf7   : > { %v2727_v46 = vpop.permute.xlu0 %2726 }
 0xb45   : > { %v2436_v23 = vpop.f32.mrf.mxu1 }
 0xb46   : > { %v2442_v24 = vmul.f32 0.17677669, %v2436_v23 }
 0xb47   : > { %v7186_v25 = vpop.f32.mrf.mxu1 }
 0xb48   : > { %v2443_v49 = vsel %vm1571_vm4, %v2442_v24, -inf }
 0xb49   : > { %2444 = vmax.xlane.f32.xlu1 %v2443_v49  ;;  %v2439_v26 = vpop.f32.mrf.mxu1 }
 0xb4b   : > { %v7187_v27 = vpop.f32.mrf.mxu1 }
 0xb5a   : > { %2505 = vrot.lane.b32.xlu1 %v2394_v8, %s8578_s15 }
 0xbd2   : > { %v2445_v11 = vpop.xlane.xlu1 %2444 }
 0xbd3   : > { %v2446_v28 = vsub.f32 %v2442_v24, %v2445_v11 }
 0xbd5   : > { %v2447_v29 = vmul.f32 1.442695, %v2446_v28 }
 0xbd6   : > { %v2506_v32 = vpop.permute.xlu1 %2505 }
 0xbd7   : > { %7990 = vpow2.f32 %v2447_v29  ;;  %v2511_v45 = vsel %vm1516_vm2, %v2506_v32, 0 }
 0xbe4   : > { %v7991_v30 = vpop.eup %7990 }
 0xbe5   : > { %v2449_v31 = vsel %vm1571_vm4, %v7991_v30, 0.0 }
 0xbe6   : > { %2450 = vadd.xlane.f32.xlu1 %v2449_v31 }
 0xbf7   : > { %2502 = vrot.lane.b32.xlu1 %v2393_v19, %s8578_s15 }
 0xbfb   : > { %2617 = vrot.lane.b32.xlu1 %v2394_v8, %s8577_s1 }
 0xbff   : > { %2615 = vrot.lane.b32.xlu1 %v2393_v19, %s8577_s1 }
 0xc03   : > { %2728 = vrot.lane.b32.xlu1 %v2394_v8, %s8579_s6 }
 0xc6f   : > { %v2451_v33 = vpop.xlane.xlu1 %2450 }
 0xc70   : > { %7992 = vrcp.f32 %v2451_v33 }
 0xc73   : > { %v2503_v34 = vpop.permute.xlu1 %2502 }
 0xc77   : > { %v2618_v35 = vpop.permute.xlu1 %2617 }
 0xc78   : > { %v2623_v36 = vsel %vm1516_vm2, %v2618_v35, 0 }
 0xc79   : > { %7207 = vmatpush3.bf16.xpose.msra.mxu0 %v2623_v36 }
 0xc7a   : > { %7218 = vmatprep.subr.bf16.mxu0 %v8574_v0 }
 0xc7b   : > { %v2616_v37 = vpop.permute.xlu1 %2615 }
 0xc7d   : > { %v7993_v38 = vpop.eup %7992 }
 0xc7e   : > { %v2453_v39 = vmul.f32 %v7993_v38, %v7991_v30 }
 0xc7f   : > { %v2729_v41 = vpop.permute.xlu1 %2728 }
 0xc80   : > { %v2734_v42 = vsel %vm1516_vm2, %v2729_v41, 0  ;;  %7209 = vmatmul.mubr.msk.bf16.vlgmr.msra.gmra.mxu0 %vm1516_vm2, %v2616_v37  ;;  %v2454_v43 = vpack.c.bf16 %v2453_v39, %v2453_v39 }
 0xc81   : > { %7219 = vmatpush3.bf16.xpose.msra.mxu0 %v2734_v42  ;;  %7220 = vmatprep.mubr.msk.bf16.mxu0 %vm8575_vm0, %v8574_v0 }
 0xc82   : > { %7191 = vmatmul.mubr.msk.bf16.vlgmr.msra.gmra.mxu1 %vm1571_vm4, %v2454_v43  ;;  %7230 = vmatprep.subr.bf16.mxu0 %v8574_v0 }
 0xc83   : > { %7195 = vmatpush3.bf16.xpose.msra.mxu1 %v2511_v45  ;;  %7196 = vmatprep.mubr.msk.bf16.mxu1 %vm8575_vm0, %v8574_v0 }
 0xc84   : > { %7200 = vmatprep.subr.bf16.mxu1 %v8574_v0 }
 0xc88   : > { %7221 = vmatmul.mubr.msk.bf16.vlgmr.msra.gmra.mxu0 %vm1516_vm2, %v2727_v46 }
 0xc89   : > { %7246 = vmatprep.mubr.msk.bf16.mxu0 %vm8575_vm0, %v8574_v0 }
 0xc8a   : > { %7197 = vmatmul.mubr.msk.bf16.vlgmr.msra.gmra.mxu1 %vm1516_vm2, %v2503_v34 }
 0xc8b   : > { %7202 = vmatprep.mubr.msk.bf16.mxu1 %vm8575_vm0, %v8574_v0 }
 0xd40   : > { %v2659_v47 = vpop.f32.mrf.mxu0 }
 0xd41   : > { %v2665_v48 = vmul.f32 0.17677669, %v2659_v47  ;;  %v7722_v47 = vld [vmem:[#allocation14 + $0x38] sm:$0xff]  }
 0xd42   : > { %v9147_v50 = vpop.f32.mrf.mxu1  ;;  %v7210_v51 = vpop.f32.mrf.mxu0  ;;  %7231 = vmatpush3.bf16.msra.mxu0 %v7722_v47  ;;  %v7754_v47 = vld [vmem:[#allocation17 + $0x60] ss:$16 sps:$4 sm:$0xff]  }
 0xd43   : > { %v2666_v55 = vsel %vm1571_vm4, %v2665_v48, -inf  ;;  %7232 = vmatprep.subr.bf16.mxu0 %v8574_v0  ;;  %v7724_v51 = vld [vmem:[#allocation14 + $0x28] sm:$0xff]  }
 0xd44   : > { %2667 = vmax.xlane.f32.xlu0 %v2666_v55  ;;  %v7192_v57 = vpop.f32.mrf.mxu1  ;;  %v2662_v58 = vpop.f32.mrf.mxu0  ;;  %v7725_v55 = vld [vmem:[#allocation14 + $0x20] sm:$0xff]  }
 0xd45   : > { %v7726_v57 = vld [vmem:[#allocation14 + $0x18] sm:$0xff]   ;;  %v7727_v58 = vld [vmem:[#allocation14 + $0x10] sm:$0xff]  }
 0xd46   : > { %v2498_v59 = vpop.f32.mrf.mxu1  ;;  %v7211_v60 = vpop.f32.mrf.mxu0 }
 0xd47   : > { %v7728_v59 = vld [vmem:[#allocation14 + $0x8] sm:$0xff]  }
 0xd48   : > { %v7193_v62 = vpop.f32.mrf.mxu1  ;;  %v2770_v1 = vpop.f32.mrf.mxu0 }
 0xd49   : > { %v2776_v2 = vmul.f32 0.17677669, %v2770_v1  ;;  %v7729_v1 = vld [vmem:[#allocation14] sm:$0xff]  }
 0xd4a   : > { %v2547_v3 = vpop.f32.mrf.mxu1  ;;  %v7222_v4 = vpop.f32.mrf.mxu0 }
 0xd4b   : > { %v2553_v5 = vmul.f32 0.17677669, %v2547_v3  ;;  %v2777_v6 = vsel %vm1571_vm4, %v2776_v2, -inf }
 0xd4c   : > { %2778 = vmax.xlane.f32.xlu0 %v2777_v6  ;;  %v7198_v7 = vpop.f32.mrf.mxu1  ;;  %v2773_v8 = vpop.f32.mrf.mxu0 }
 0xd4d   : > { %v2554_v9 = vsel %vm1571_vm4, %v2553_v5, -inf }
 0xd4e   : > { %v7223_v10 = vpop.f32.mrf.mxu0  ;;  %2555 = vmax.xlane.f32.xlu1 %v2554_v9  ;;  %v2550_v12 = vpop.f32.mrf.mxu1 }
 0xd50   : > { %v7199_v13 = vpop.f32.mrf.mxu1 }
 0xdcd   : > { %v2668_v14 = vpop.xlane.xlu0 %2667 }
 0xdce   : > { %v2669_v15 = vsub.f32 %v2665_v48, %v2668_v14  ;;  %v7723_v48 = vld [vmem:[#allocation14 + $0x30] sm:$0xff]  }
 0xdcf   : > { %7233 = vmatpush3.bf16.msra.mxu0 %v7723_v48  ;;  %v7757_v48 = vld [vmem:[#allocation17 + $0x68] ss:$16 sps:$4 sm:$0xff]  }
 0xdd0   : > { %v2670_v17 = vmul.f32 1.442695, %v2669_v15  ;;  %7234 = vmatprep.subr.bf16.mxu0 %v8574_v0 }
 0xdd2   : > { %7994 = vpow2.f32 %v2670_v17 }
 0xdd3   : > { %7235 = vmatpush3.bf16.msra.mxu0 %v7724_v51  ;;  %v7762_v51 = vld [vmem:[#allocation17 + $0x44] ss:$16 sps:$4 sm:$0xff]  }
 0xdd4   : > { %7236 = vmatprep.subr.bf16.mxu0 %v8574_v0 }
 0xdd5   : > { %v2779_v18 = vpop.xlane.xlu0 %2778 }
 0xdd6   : > { %v2780_v19 = vsub.f32 %v2776_v2, %v2779_v18 }
 0xdd7   : > { %v2556_v20 = vpop.xlane.xlu1 %2555  ;;  %7237 = vmatpush3.bf16.msra.mxu0 %v7725_v55  ;;  %v7765_v55 = vld [vmem:[#allocation17 + $0x4c] ss:$16 sps:$4 sm:$0xff]  }
 0xdd8   : > { %v2781_v21 = vmul.f32 1.442695, %v2780_v19  ;;  %v2557_v22 = vsub.f32 %v2553_v5, %v2556_v20  ;;  %7238 = vmatprep.subr.bf16.mxu0 %v8574_v0 }
 0xdda   : > { %7996 = vpow2.f32 %v2781_v21  ;;  %v2558_v23 = vmul.f32 1.442695, %v2557_v22  ;;  %v6586_v21 = vld [vmem:[#allocation16] ss:$0 sm:$0xff] }
 0xddb   : > { %7239 = vmatpush3.bf16.msra.mxu0 %v7726_v57  ;;  %v7760_v57 = vld [vmem:[#allocation17 + $0x40] ss:$16 sps:$4 sm:$0xff]  }
 0xddc   : > { %7998 = vpow2.f32 %v2558_v23  ;;  %7240 = vmatprep.subr.bf16.mxu0 %v8574_v0 }
 0xddf   : > { %v7995_v24 = vpop.eup %7994  ;;  %7241 = vmatpush3.bf16.msra.mxu0 %v7727_v58  ;;  %v7763_v58 = vld [vmem:[#allocation17 + $0x48] ss:$16 sps:$4 sm:$0xff]  }
 0xde0   : > { %v2672_v25 = vsel %vm1571_vm4, %v7995_v24, 0.0  ;;  %7242 = vmatprep.subr.bf16.mxu0 %v8574_v0 }
 0xde1   : > { %2673 = vadd.xlane.f32.xlu0 %v2672_v25 }
 0xde3   : > { %7243 = vmatpush3.bf16.msra.mxu0 %v7728_v59  ;;  %v7768_v59 = vld [vmem:[#allocation17 + $0x24] ss:$16 sps:$4 sm:$0xff]  }
 0xde4   : > { %7244 = vmatprep.subr.bf16.mxu0 %v8574_v0 }
 0xde7   : > { %v7997_v49 = vpop.eup %7996  ;;  %7245 = vmatpush3.bf16.msra.mxu0 %v7729_v1  ;;  %v7769_v1 = vld [vmem:[#allocation17 + $0x28] ss:$16 sps:$4 sm:$0xff]  }
 0xde8   : > { %v2783_v26 = vsel %vm1571_vm4, %v7997_v49, 0.0 }
 0xde9   : > { %v7999_v27 = vpop.eup %7998  ;;  %2784 = vadd.xlane.f32.xlu1 %v2783_v26 }
 0xdea   : > { %v2560_v11 = vsel %vm1571_vm4, %v7999_v27, 0.0 }
 0xded   : > { %2561 = vadd.xlane.f32.xlu1 %v2560_v11  ;;  %v7733_v11 = vld [vmem:[#allocation17 + $0xe8] ss:$16 sps:$4 sm:$0xff]  }
 0xdf7   : > { %2567 = vrot.lane.b32.xlu0 %v9113_v16, %s8578_s15 }
 0xdfe   : > { %2678 = vrot.lane.b32.xlu1 %v9113_v16, %s8577_s1 }
 0xe02   : > { %2789 = vrot.lane.b32.xlu1 %v9113_v16, %s8579_s6 }
 0xe6a   : > { %v2674_v28 = vpop.xlane.xlu0 %2673 }
 0xe6e   : > { %v2568_v29 = vpop.permute.xlu0 %2567 }
 0xe6f   : > { %v2573_v30 = vsel %vm1587_vm3, %v2568_v29, 0 }
 0xe70   : > { %7201 = vmatpush3.bf16.msra.mxu1 %v2573_v30 }
 0xe71   : > { %7212 = vmatprep.subr.bf16.mxu1 %v8574_v0 }
 0xe72   : > { %v2785_v31 = vpop.xlane.xlu1 %2784 }
 0xe76   : > { %v2562_v32 = vpop.xlane.xlu1 %2561 }
 0xe77   : > { %8000 = vrcp.f32 %v2562_v32 }
 0xe78   : > { %8002 = vrcp.f32 %v2674_v28  ;;  %v7735_v28 = vld [vmem:[#allocation17 + $0xec] ss:$16 sps:$4 sm:$0xff]  }
 0xe79   : > { %8004 = vrcp.f32 %v2785_v31  ;;  %3249 = vmatprep.subr.bf16.mxu0 %v7735_v28  ;;  %v7790_v28 = vld [vmem:[#allocation20 + $0x60] sm:$0xff]  }
 0xe7a   : > { %v2679_v35 = vpop.permute.xlu1 %2678 }
 0xe7b   : > { %v2684_v38 = vsel %vm1587_vm3, %v2679_v35, 0  ;;  %v7739_v35 = vld [vmem:[#allocation17 + $0xc8] ss:$16 sps:$4 sm:$0xff]  }
 0xe7e   : > { %v2790_v39 = vpop.permute.xlu1 %2789 }
 0xe7f   : > { %v2795_v43 = vsel %vm1587_vm3, %v2790_v39, 0  ;;  %v7750_v39 = vld [vmem:[#allocation17 + $0x84] ss:$16 sps:$4 sm:$0xff]  }
 0xe84   : > { %v8001_v33 = vpop.eup %8000 }
 0xe85   : > { %v2564_v34 = vmul.f32 %v8001_v33, %v7999_v27  ;;  %v8003_v37 = vpop.eup %8002  ;;  %v7730_v27 = vld [vmem:[#allocation17 + $0xe0] ss:$16 sps:$4 sm:$0xff]   ;;  %v7741_v33 = vld [vmem:[#allocation17 + $0xcc] ss:$16 sps:$4 sm:$0xff]  }
 0xe86   : > { %v2676_v16 = vmul.f32 %v8003_v37, %v7995_v24  ;;  %v8005_v42 = vpop.eup %8004  ;;  %v7747_v37 = vld [vmem:[#allocation17 + $0xac] ss:$16 sps:$4 sm:$0xff]  }
 0xe87   : > { %v2565_v36 = vpack.c.bf16 %v2564_v34, %v2564_v34  ;;  %v2787_v45 = vmul.f32 %v8005_v42, %v7997_v49  ;;  %v7736_v34 = vld [vmem:[#allocation17 + $0xc0] ss:$16 sps:$4 sm:$0xff]  }
 0xe88   : > { %v2677_v41 = vpack.c.bf16 %v2676_v16, %v2676_v16  ;;  %v7745_v16 = vld [vmem:[#allocation17 + $0xa8] ss:$16 sps:$4 sm:$0xff]   ;;  %v7748_v42 = vld [vmem:[#allocation17 + $0x80] ss:$16 sps:$4 sm:$0xff]  }
 0xe89   : > { %7203 = vmatmul.mubr.msk.bf16.vlgmr.msra.gmra.mxu1 %vm1571_vm4, %v2565_v36  ;;  %v2788_v46 = vpack.c.bf16 %v2787_v45, %v2787_v45  ;;  %v7744_v36 = vld [vmem:[#allocation17 + $0xa4] ss:$16 sps:$4 sm:$0xff]  }
 0xe8a   : > { %7213 = vmatpush3.bf16.msra.mxu1 %v2684_v38  ;;  %7214 = vmatprep.mubr.msk.bf16.mxu1 %vm8575_vm0, %v8574_v0  ;;  %v7742_v38 = vld [vmem:[#allocation17 + $0xa0] ss:$16 sps:$4 sm:$0xff]   ;;  %v7756_v45 = vld [vmem:[#allocation17 + $0x64] ss:$16 sps:$4 sm:$0xff]  }
 0xe8b   : > { %7224 = vmatprep.subr.bf16.mxu1 %v8574_v0 }
 0xe91   : > { %7215 = vmatmul.mubr.msk.bf16.vlgmr.msra.gmra.mxu1 %vm1571_vm4, %v2677_v41  ;;  %v7753_v41 = vld [vmem:[#allocation17 + $0x8c] ss:$16 sps:$4 sm:$0xff]  }
 0xe92   : > { %7225 = vmatpush3.bf16.msra.mxu1 %v2795_v43  ;;  %7226 = vmatprep.mubr.msk.bf16.mxu1 %vm8575_vm0, %v8574_v0  ;;  %v7751_v43 = vld [vmem:[#allocation17 + $0x88] ss:$16 sps:$4 sm:$0xff]  }
 0xe99   : > { %7227 = vmatmul.mubr.msk.bf16.vlgmr.msra.gmra.mxu1 %vm1571_vm4, %v2788_v46  ;;  %v7759_v46 = vld [vmem:[#allocation17 + $0x6c] ss:$16 sps:$4 sm:$0xff]  }
 0xe9a   : > { %3240 = vmatprep.mubr.bf16.mxu1 %v8576_v40 }
 0xf49   : > { %v2609_v60 = vpop.f32.mrf.mxu1 }
 0xf4a   : > { %2838 = vrot.lane.b32.xlu0 %v2609_v60, %s8579_s6  ;;  %v7771_v60 = vld [vmem:[#allocation17 + $0x2c] ss:$16 sps:$4 sm:$0xff]  }
 0xf4b   : > { %v7204_v62 = vpop.f32.mrf.mxu1 }
 0xf4c   : > { %v7766_v62 = vld [vmem:[#allocation17 + $0x20] ss:$16 sps:$4 sm:$0xff]  }
 0xf4d   : > { %v2612_v2 = vpop.f32.mrf.mxu1 }
 0xf4e   : > { %v7774_v2 = vld [vmem:[#allocation17 + $0x4] ss:$16 sps:$4 sm:$0xff]  }
 0xf4f   : > { %v7205_v3 = vpop.f32.mrf.mxu1 }
 0xf50   : > { %v7777_v3 = vld [vmem:[#allocation17 + $0xc] ss:$16 sps:$4 sm:$0xff]  }
 0xf51   : > { %v2720_v4 = vpop.f32.mrf.mxu1 }
 0xf52   : > { %2842 = vrot.lane.b32.xlu1 %v2720_v4, %s8577_s1  ;;  %v7772_v4 = vld [vmem:[#allocation17] ss:$16 sps:$4 sm:$0xff]  }
 0xf53   : > { %v7216_v5 = vpop.f32.mrf.mxu1 }
 0xf54   : > { %v7775_v5 = vld [vmem:[#allocation17 + $0x8] ss:$16 sps:$4 sm:$0xff]  }
 0xf55   : > { %v2723_v6 = vpop.f32.mrf.mxu1 }
 0xf57   : > { %v7217_v7 = vpop.f32.mrf.mxu1 }
 0xf59   : > { %v2831_v8 = vpop.f32.mrf.mxu1 }
 0xf5a   : > { %2846 = vrot.lane.b32.xlu0 %v2831_v8, %s8578_s15 }
 0xf5b   : > { %v7228_v9 = vpop.f32.mrf.mxu1 }
 0xf5d   : > { %v2834_v10 = vpop.f32.mrf.mxu1 }
 0xf5e   : > { %v6595_v10 = vld [vmem:[%s9594_s18] ss:$0 sm:$0xff] }
 0xf5f   : > { %v7229_v12 = vpop.f32.mrf.mxu1 }
 0xfbc   : > { %v2839_v13 = vpop.permute.xlu0 %2838 }
 0xfbd   : > { %v2849_v15 = vsel %vm1516_vm2, %v9147_v50, %v2839_v13  ;;  %v7732_v50 = vld [vmem:[#allocation17 + $0xe4] ss:$16 sps:$4 sm:$0xff]   ;;  %v6596_v13 = vld [vmem:[%s9595_s7] ss:$0 sm:$0xff]  ;;  %s8580_s7 = smov [#allocation24]  }
 0xfbe   : > { %3208 = vmatprep.subr.bf16.mxu1 %v7732_v50  ;;  %v7788_v50 = vld [vmem:[#allocation20 + $0x28] sm:$0xff]  }
 0xfbf   : > { %3209 = vmatpush1.bf16.msra.mxu1 %v7730_v27  ;;  %v7787_v27 = vld [vmem:[#allocation20 + $0xe8] sm:$0xff]  }
 0xfc4   : > { %v2843_v14 = vpop.permute.xlu1 %2842 }
 0xfc5   : > { %v2850_v17 = vsel %vm1177_vm1, %v2849_v15, %v2843_v14 }
 0xfcc   : > { %v2847_v18 = vpop.permute.xlu0 %2846 }
 0xfcd   : > { %v2851_v19 = vsel %vm1984_vm5, %v2850_v17, %v2847_v18 }
 0xfce   : > { %v2852_v20 = vpack.c.bf16 %v2851_v19, %v2851_v19  ;;  %v7778_v19 = vld [vmem:[#allocation20 + $0x78] sm:$0xff]  }
 0xfd0   : > { %7247 = vmatmul.mubr.bf16.vlgmr.msra.gmra.mxu0 %v2852_v20  ;;  %v7779_v20 = vld [vmem:[#allocation20 + $0xf8] sm:$0xff]  }
 0xfd1   : > { %3281 = vmatprep.mubr.bf16.mxu0 %v8576_v40  ;;  %3250 = vmatpush1.bf16.msra.mxu0 %v7733_v11  ;;  %v7789_v11 = vld [vmem:[#allocation20 + $0xa8] sm:$0xff]  }
 0xfd2   : > { %3251 = vmatprep.subr.bf16.mxu0 %v7741_v33  ;;  %v7796_v33 = vld [vmem:[#allocation20 + $0x18] sm:$0xff]  }
 0xfd5   : > { %3252 = vmatpush1.bf16.msra.mxu0 %v7739_v35  ;;  %v7798_v35 = vld [vmem:[#allocation20 + $0x50] sm:$0xff]  }
 0xfd6   : > { %3253 = vmatprep.subr.bf16.mxu0 %v7747_v37  ;;  %v7800_v37 = vld [vmem:[#allocation20 + $0x10] sm:$0xff]  }
 0xfd9   : > { %3254 = vmatpush1.bf16.msra.mxu0 %v7745_v16  ;;  %v7802_v16 = vld [vmem:[#allocation20 + $0x48] sm:$0xff]  }
 0xfda   : > { %3255 = vmatprep.subr.bf16.mxu0 %v7753_v41  ;;  %v7804_v41 = vld [vmem:[#allocation20 + $0x8] sm:$0xff]  }
 0xfdd   : > { %3256 = vmatpush1.bf16.msra.mxu0 %v7751_v43  ;;  %v7806_v43 = vld [vmem:[#allocation20 + $0x40] sm:$0xff]  }
 0xfde   : > { %3257 = vmatprep.subr.bf16.mxu0 %v7759_v46  ;;  %v7808_v46 = vld [vmem:[#allocation20] sm:$0xff]  }
 0xfe1   : > { %3258 = vmatpush1.bf16.msra.mxu0 %v7757_v48  ;;  %v3026_v48 = vld [vmem:[#allocation19] sm:$0xf] }
 0xfe2   : > { %3259 = vmatprep.subr.bf16.mxu0 %v7765_v55  ;;  %v3031_v55 = vrot.slane %v3026_v48, %v8987_v54 }
 0xfe5   : > { %3260 = vmatpush1.bf16.msra.mxu0 %v7763_v58  ;;  %v3035_v58 = vrot.slane %v3026_v48, %v8984_v53 }
 0xfe6   : > { %3261 = vmatprep.subr.bf16.mxu0 %v7771_v60 }
 0xfe9   : > { %3262 = vmatpush1.bf16.msra.mxu0 %v7769_v1 }
 0xfea   : > { %3263 = vmatprep.subr.bf16.mxu0 %v7777_v3 }
 0xfed   : > { %3264 = vmatpush1.bf16.msra.mxu0 %v7775_v5 }
 0xfee   : > { %6928 = vmatprep.subr.bf16.mxu0 %v7779_v20 }
0x1090   : > { %v2958_v22 = vpop.f32.mrf.mxu0 }
0x1091   : > { %v2959_v23 = vadd.f32 %v6586_v21, %v2958_v22  ;;  %v7780_v21 = vld [vmem:[#allocation20 + $0x38] sm:$0xff]  }
0x1092   : > { %v7248_v24 = vpop.f32.mrf.mxu0  ;;  %v7781_v22 = vld [vmem:[#allocation20 + $0xb8] sm:$0xff]  }
0x1093   : > { %v2964_v25 = vadd.f32 %v2959_v23, %v9102_v63  ;;  %v7738_v63 = vld [vmem:[#allocation17 + $0xc4] ss:$16 sps:$4 sm:$0xff]   ;;  %v7782_v23 = vld [vmem:[#allocation20 + $0x70] sm:$0xff]  }
0x1094   : > { %v2961_v49 = vpop.f32.mrf.mxu0  ;;  %3210 = vmatprep.subr.bf16.mxu1 %v7738_v63  ;;  %v7783_v24 = vld [vmem:[#allocation20 + $0xf0] sm:$0xff]   ;;  %v7795_v63 = vld [vmem:[#allocation20 + $0xd8] sm:$0xff]  }
0x1095   : > { %2967 = vadd.xlane.f32.xlu1 %v2964_v25  ;;  %3211 = vmatpush1.bf16.msra.mxu1 %v7736_v34  ;;  %v7785_v49 = vld [vmem:[#allocation20 + $0xb0] sm:$0xff]   ;;  %v7797_v34 = vld [vmem:[#allocation20 + $0x98] sm:$0xff]  }
0x1096   : > { %v7249_v26 = vpop.f32.mrf.mxu0  ;;  %3212 = vmatprep.subr.bf16.mxu1 %v7744_v36  ;;  %v7799_v36 = vld [vmem:[#allocation20 + $0xd0] sm:$0xff]  }
0x1097   : > { %v7786_v26 = vld [vmem:[#allocation20 + $0x68] sm:$0xff]  }
0x1099   : > { %3213 = vmatpush1.bf16.msra.mxu1 %v7742_v38  ;;  %v7801_v38 = vld [vmem:[#allocation20 + $0x90] sm:$0xff]  }
0x109a   : > { %3214 = vmatprep.subr.bf16.mxu1 %v7750_v39  ;;  %v7803_v39 = vld [vmem:[#allocation20 + $0xc8] sm:$0xff]  }
0x109d   : > { %3215 = vmatpush1.bf16.msra.mxu1 %v7748_v42  ;;  %v7805_v42 = vld [vmem:[#allocation20 + $0x88] sm:$0xff]  }
0x109e   : > { %3216 = vmatprep.subr.bf16.mxu1 %v7756_v45  ;;  %v7807_v45 = vld [vmem:[#allocation20 + $0xc0] sm:$0xff]  }
0x10a1   : > { %3217 = vmatpush1.bf16.msra.mxu1 %v7754_v47  ;;  %v7809_v47 = vld [vmem:[#allocation20 + $0x80] sm:$0xff]  }
0x10a2   : > { %3218 = vmatprep.subr.bf16.mxu1 %v7762_v51  ;;  %v3042_v51 = vsub.s32 3, %v8981_v52 }
0x10a5   : > { %3219 = vmatpush1.bf16.msra.mxu1 %v7760_v57  ;;  %v3039_v57 = vrot.slane %v3026_v48, %v8991_v56 }
0x10a6   : > { %3220 = vmatprep.subr.bf16.mxu1 %v7768_v59  ;;  %v3043_v59 = vrot.slane %v3026_v48, %v3042_v51 }
0x10a9   : > { %3221 = vmatpush1.bf16.msra.mxu1 %v7766_v62 }
0x10aa   : > { %3222 = vmatprep.subr.bf16.mxu1 %v7774_v2 }
0x10ad   : > { %3223 = vmatpush1.bf16.msra.mxu1 %v7772_v4 }
0x10ae   : > { %6906 = vmatprep.subr.bf16.mxu1 %v7778_v19 }
0x111e   : > { %v2968_v29 = vpop.xlane.xlu1 %2967 }
0x111f   : > { %v2969_v30 = vmul.f32 0.0078125, %v2968_v29  ;;  %v7791_v29 = vld [vmem:[#allocation20 + $0xe0] sm:$0xff]  }
0x1121   : > { %v9190_v31 = vsub.f32 %v2964_v25, %v2969_v30  ;;  %v7784_v25 = vld [vmem:[#allocation20 + $0x30] sm:$0xff]   ;;  %v7792_v30 = vld [vmem:[#allocation20 + $0x20] sm:$0xff]  }
0x1123   : > { %v2971_v32 = vmul.f32 %v9190_v31, %v9190_v31 }
0x1125   : > { %2972 = vadd.xlane.f32.xlu0 %v2971_v32  ;;  %v7794_v32 = vld [vmem:[#allocation20 + $0x58] sm:$0xff]  }
0x11ae   : > { %v2973_v6 = vpop.xlane.xlu0 %2972 }
0x11af   : > { %v2974_v7 = vmul.f32 0.0078125, %v2973_v6 }
0x11b1   : > { %v2975_v8 = vadd.f32 1e-12, %v2974_v7 }
0x11b3   : > { %8006 = vrsqrt.f32 %v2975_v8 }
0x11c0   : > { %v8007_v9 = vpop.eup %8006 }
0x11c1   : > { %v2977_v12 = vmul.f32 %v8007_v9, %v9190_v31  ;;  %v7793_v31 = vld [vmem:[#allocation20 + $0xa0] sm:$0xff]  }
0x11c3   : > { %v2984_v14 = vmul.f32 %v6595_v10, %v2977_v12 }
0x11c5   : > { %v2991_v15 = vadd.f32 %v6596_v13, %v2984_v14 }
0x11c7   : > { %v9198_v17 = vmul.f32 %v2991_v15, %v9099_v61 }
0x11c9   : > { %v2993_v18 = vpack.c.bf16 %v9198_v17, %v9198_v17 }
0x11cb   : > { %3241 = vmatmul.mubr.bf16.vlgmr.msra.gmra.mxu1 %v2993_v18  ;;  %3282 = vmatmul.mubr.bf16.vlgmr.msra.gmra.mxu0 %v2993_v18 }
0x11cc   : > { %6907 = vmatpush3.bf16.msra.mxu1 %v7780_v21  ;;  %6929 = vmatpush3.bf16.msra.mxu0 %v7781_v22 }
0x11cd   : > { %6908 = vmatprep.subr.bf16.mxu1 %v7782_v23  ;;  %6930 = vmatprep.subr.bf16.mxu0 %v7783_v24 }
0x11d0   : > { %6909 = vmatpush3.bf16.msra.mxu1 %v7784_v25  ;;  %6931 = vmatpush3.bf16.msra.mxu0 %v7785_v49 }
0x11d1   : > { %6910 = vmatprep.subr.bf16.mxu1 %v7786_v26  ;;  %6932 = vmatprep.subr.bf16.mxu0 %v7787_v27 }
0x11d4   : > { %6911 = vmatpush3.bf16.msra.mxu1 %v7788_v50  ;;  %6933 = vmatpush3.bf16.msra.mxu0 %v7789_v11 }
0x11d5   : > { %6912 = vmatprep.subr.bf16.mxu1 %v7790_v28  ;;  %6934 = vmatprep.subr.bf16.mxu0 %v7791_v29 }
0x11d8   : > { %6913 = vmatpush3.bf16.msra.mxu1 %v7792_v30  ;;  %6935 = vmatpush3.bf16.msra.mxu0 %v7793_v31 }
0x11d9   : > { %6914 = vmatprep.subr.bf16.mxu1 %v7794_v32  ;;  %6936 = vmatprep.subr.bf16.mxu0 %v7795_v63 }
0x11dc   : > { %6915 = vmatpush3.bf16.msra.mxu1 %v7796_v33  ;;  %6937 = vmatpush3.bf16.msra.mxu0 %v7797_v34 }
0x11dd   : > { %6916 = vmatprep.subr.bf16.mxu1 %v7798_v35  ;;  %6938 = vmatprep.subr.bf16.mxu0 %v7799_v36 }
0x11e0   : > { %6917 = vmatpush3.bf16.msra.mxu1 %v7800_v37  ;;  %6939 = vmatpush3.bf16.msra.mxu0 %v7801_v38 }
0x11e1   : > { %6918 = vmatprep.subr.bf16.mxu1 %v7802_v16  ;;  %6940 = vmatprep.subr.bf16.mxu0 %v7803_v39 }
0x11e4   : > { %6919 = vmatpush3.bf16.msra.mxu1 %v7804_v41  ;;  %6941 = vmatpush3.bf16.msra.mxu0 %v7805_v42 }
0x11e5   : > { %6920 = vmatprep.subr.bf16.mxu1 %v7806_v43  ;;  %6942 = vmatprep.subr.bf16.mxu0 %v7807_v45 }
0x11e8   : > { %6921 = vmatpush3.bf16.msra.mxu1 %v7808_v46  ;;  %6943 = vmatpush3.bf16.msra.mxu0 %v7809_v47 }
0x11e9   : > { %7250 = vmatprep.subr.bf16.mxu0 %v8574_v0 }
0x128b   : > { %v3242_v60 = vpop.f32.mrf.mxu1  ;;  %v3283_v62 = vpop.f32.mrf.mxu0 }
0x128c   : > { %v3243_v1 = vadd.f32 %v3242_v60, %v3031_v55  ;;  %v3284_v2 = vadd.f32 %v3283_v62, %v3039_v57  ;;  %v6629_v60 = vld [vmem:[#allocation22] ss:$0 sm:$0xff] }
0x128d   : > { %v3244_v3 = vpop.f32.mrf.mxu1  ;;  %v3285_v4 = vpop.f32.mrf.mxu0 }
0x128e   : > { %v3290_v5 = vmul.f32 %v3243_v1, %v3243_v1  ;;  %v3292_v6 = vmul.f32 %v3284_v2, %v3284_v2  ;;  %v3245_v7 = vadd.f32 %v3244_v3, %v3035_v58  ;;  %v3286_v8 = vadd.f32 %v3285_v4, %v3043_v59 }
0x128f   : > { %v3246_v9 = vpop.f32.mrf.mxu1  ;;  %v3287_v10 = vpop.f32.mrf.mxu0 }
0x1290   : > { %v3294_v12 = vmul.f32 %v3290_v5, %v3243_v1  ;;  %v3296_v13 = vmul.f32 %v3292_v6, %v3284_v2  ;;  %v3291_v14 = vmul.f32 %v3245_v7, %v3245_v7  ;;  %v3293_v15 = vmul.f32 %v3286_v8, %v3286_v8 }
0x1291   : > { %v3247_v18 = vpop.f32.mrf.mxu1  ;;  %v3288_v19 = vpop.f32.mrf.mxu0 }
0x1292   : > { %v3298_v20 = vmul.f32 0.044715, %v3294_v12  ;;  %v3300_v21 = vmul.f32 0.044715, %v3296_v13  ;;  %v3295_v22 = vmul.f32 %v3291_v14, %v3245_v7  ;;  %v3297_v23 = vmul.f32 %v3293_v15, %v3286_v8  ;;  %v7810_v12 = vld [vmem:[#allocation7 + $0x168] ss:$12 sps:$4 sm:$0xff]  }
0x1293   : > { %v7812_v13 = vld [vmem:[#allocation7 + $0x16c] ss:$12 sps:$4 sm:$0xff]   ;;  %v7813_v14 = vld [vmem:[#allocation7 + $0x170] ss:$12 sps:$4 sm:$0xff]  }
0x1294   : > { %v3302_v24 = vadd.f32 %v3298_v20, %v3243_v1  ;;  %v3304_v25 = vadd.f32 %v3300_v21, %v3284_v2  ;;  %v3299_v49 = vmul.f32 0.044715, %v3295_v22  ;;  %v3301_v26 = vmul.f32 0.044715, %v3297_v23  ;;  %3882 = vmatprep.subr.bf16.mxu1 %v7812_v13  ;;  %v7816_v21 = vld [vmem:[#allocation7 + $0x154] ss:$12 sps:$4 sm:$0xff]  }
0x1295   : > { %v7814_v22 = vld [vmem:[#allocation7 + $0x150] ss:$12 sps:$4 sm:$0xff]   ;;  %v7817_v23 = vld [vmem:[#allocation7 + $0x158] ss:$12 sps:$4 sm:$0xff]  }
0x1296   : > { %v3306_v27 = vmul.f32 0.7978846, %v3302_v24  ;;  %v3308_v50 = vmul.f32 0.7978846, %v3304_v25  ;;  %v3303_v11 = vadd.f32 %v3299_v49, %v3245_v7  ;;  %v3305_v28 = vadd.f32 %v3301_v26, %v3286_v8  ;;  %v7818_v24 = vld [vmem:[#allocation7 + $0x138] ss:$12 sps:$4 sm:$0xff]  }
0x1297   : > { %v7821_v25 = vld [vmem:[#allocation7 + $0x140] ss:$12 sps:$4 sm:$0xff]   ;;  %v7824_v49 = vld [vmem:[#allocation7 + $0x124] ss:$12 sps:$4 sm:$0xff]  }
0x1298   : > { %8008 = vtanh.f32 %v3306_v27  ;;  %v3307_v29 = vmul.f32 0.7978846, %v3303_v11  ;;  %v3309_v30 = vmul.f32 0.7978846, %v3305_v28  ;;  %v7822_v26 = vld [vmem:[#allocation7 + $0x120] ss:$12 sps:$4 sm:$0xff]  }
0x1299   : > { %8010 = vtanh.f32 %v3308_v50  ;;  %v7825_v27 = vld [vmem:[#allocation7 + $0x128] ss:$12 sps:$4 sm:$0xff]   ;;  %v7828_v50 = vld [vmem:[#allocation7 + $0x10c] ss:$12 sps:$4 sm:$0xff]   ;;  %v7829_v28 = vld [vmem:[#allocation7 + $0x110] ss:$12 sps:$4 sm:$0xff]  }
0x129a   : > { %8012 = vtanh.f32 %v3307_v29  ;;  %v7826_v11 = vld [vmem:[#allocation7 + $0x108] ss:$12 sps:$4 sm:$0xff]  }
0x129b   : > { %8014 = vtanh.f32 %v3309_v30  ;;  %v7832_v29 = vld [vmem:[#allocation7 + $0xf4] ss:$12 sps:$4 sm:$0xff]   ;;  %v7830_v30 = vld [vmem:[#allocation7 + $0xf0] ss:$12 sps:$4 sm:$0xff]  }
0x12a5   : > { %v8009_v31 = vpop.eup %8008 }
0x12a6   : > { %v8011_v32 = vpop.eup %8010  ;;  %v3314_v63 = vadd.f32 1.0, %v8009_v31  ;;  %v7833_v31 = vld [vmem:[#allocation7 + $0xf8] ss:$12 sps:$4 sm:$0xff]  }
0x12a7   : > { %v8013_v33 = vpop.eup %8012  ;;  %v3316_v34 = vadd.f32 1.0, %v8011_v32  ;;  %v7836_v32 = vld [vmem:[#allocation7 + $0xdc] ss:$12 sps:$4 sm:$0xff]  }
0x12a8   : > { %v8015_v35 = vpop.eup %8014  ;;  %v3315_v36 = vadd.f32 1.0, %v8013_v33  ;;  %v3318_v37 = vmul.f32 0.5, %v3314_v63  ;;  %v7834_v63 = vld [vmem:[#allocation7 + $0xd8] ss:$12 sps:$4 sm:$0xff]   ;;  %v7837_v33 = vld [vmem:[#allocation7 + $0xe0] ss:$12 sps:$4 sm:$0xff]  }
0x12a9   : > { %v3317_v38 = vadd.f32 1.0, %v8015_v35  ;;  %v3320_v16 = vmul.f32 0.5, %v3316_v34  ;;  %v7840_v34 = vld [vmem:[#allocation7 + $0xc4] ss:$12 sps:$4 sm:$0xff]   ;;  %v7838_v35 = vld [vmem:[#allocation7 + $0xc0] ss:$12 sps:$4 sm:$0xff]  }
0x12aa   : > { %v3319_v39 = vmul.f32 0.5, %v3315_v36  ;;  %v3322_v42 = vmul.f32 %v3318_v37, %v3243_v1  ;;  %v7841_v36 = vld [vmem:[#allocation7 + $0xc8] ss:$12 sps:$4 sm:$0xff]  }
0x12ab   : > { %v3321_v41 = vmul.f32 0.5, %v3317_v38  ;;  %v3324_v45 = vmul.f32 %v3320_v16, %v3284_v2 }
0x12ac   : > { %v3323_v43 = vmul.f32 %v3319_v39, %v3245_v7  ;;  %v3326_v55 = vpack.c.bf16 %v3322_v42, %v3322_v42 }
0x12ad   : > { %v3325_v46 = vmul.f32 %v3321_v41, %v3286_v8  ;;  %v3328_v57 = vpack.c.bf16 %v3324_v45, %v3324_v45  ;;  %v6662_v41 = vld [vmem:[%s8720_s25] ss:$0 sm:$0xff] }
0x12ae   : > { %v3327_v47 = vpack.c.bf16 %v3323_v43, %v3323_v43  ;;  %v6663_v43 = vld [vmem:[%s8725_s14] ss:$0 sm:$0xff] }
0x12af   : > { %v3329_v48 = vpack.c.bf16 %v3325_v46, %v3325_v46 }
0x12b0   : > { %3625 = vmatprep.mubr.bf16.mxu1 %v3327_v47 }
0x12b1   : > { %3665 = vmatprep.mubr.bf16.mxu0 %v3329_v48  ;;  %3626 = vmatmul.mubr.bf16.vlgmr.msra.gmra.mxu1 %v3326_v55  ;;  %v6664_v55 = vld [vmem:[%s9584_s26 + $0x3] sm:$0x7] }
0x12b2   : > { %3666 = vmatmul.mubr.bf16.vlgmr.msra.gmra.mxu0 %v3328_v57  ;;  %3914 = vmatprep.mubr.bf16.mxu1 %v8576_v40  ;;  %v3746_v57 = vrot.slane %v6664_v55, %v8984_v53 }
0x12b3   : > { %7266 = vmatprep.mubr.msk.bf16.mxu0 %vm8575_vm0, %v8574_v0  ;;  %7251 = vmatpush3.bf16.msra.mxu0 %v7813_v14 }
0x12b4   : > { %3883 = vmatpush1.bf16.msra.mxu1 %v7810_v12  ;;  %7252 = vmatprep.subr.bf16.mxu0 %v8574_v0 }
0x12b5   : > { %3884 = vmatprep.subr.bf16.mxu1 %v7816_v21  ;;  %v9248_v21 = vld [vmem:[%s9029_s22] ss:$0 sm:$0xff]  ;;  %s6162_s22 = scalar_lea.sflag [#allocation25], %s8964_s16 }
0x12b7   : > { %7253 = vmatpush3.bf16.msra.mxu0 %v7817_v23 }
0x12b8   : > { %3885 = vmatpush1.bf16.msra.mxu1 %v7814_v22  ;;  %7254 = vmatprep.subr.bf16.mxu0 %v8574_v0 }
0x12bb   : > { %7255 = vmatpush3.bf16.msra.mxu0 %v7821_v25 }
0x12bc   : > { %7256 = vmatprep.subr.bf16.mxu0 %v8574_v0 }
0x12bf   : > { %7257 = vmatpush3.bf16.msra.mxu0 %v7825_v27 }
0x12c0   : > { %7258 = vmatprep.subr.bf16.mxu0 %v8574_v0 }
0x12c3   : > { %7259 = vmatpush3.bf16.msra.mxu0 %v7829_v28 }
0x12c4   : > { %7260 = vmatprep.subr.bf16.mxu0 %v8574_v0 }
0x12c7   : > { %7261 = vmatpush3.bf16.msra.mxu0 %v7833_v31 }
0x12c8   : > { %7262 = vmatprep.subr.bf16.mxu0 %v8574_v0 }
0x12cb   : > { %7263 = vmatpush3.bf16.msra.mxu0 %v7837_v33 }
0x12cc   : > { %7264 = vmatprep.subr.bf16.mxu0 %v8574_v0 }
0x12cf   : > { %7265 = vmatpush3.bf16.msra.mxu0 %v7841_v36 }
0x12d0   : > { %7294 = vmatprep.subr.bf16.mxu0 %v8574_v0 }
0x1371   : > { %v6922_v58 = vpop.f32.mrf.mxu1 }
0x1372   : > { %v6944_v59 = vpop.f32.mrf.mxu0 }
0x1373   : > { %v6923_v62 = vpop.f32.mrf.mxu1 }
0x1374   : > { %v6924_v1 = vadd.f32 %v6923_v62, %v6922_v58  ;;  %v6945_v2 = vpop.f32.mrf.mxu0 }
0x1375   : > { %v6925_v3 = vpop.f32.mrf.mxu1  ;;  %v6946_v5 = vadd.f32 %v6945_v2, %v6944_v59 }
0x1376   : > { %v3628_v4 = vadd.f32 %v6924_v1, %v6629_v60  ;;  %v6947_v6 = vpop.f32.mrf.mxu0  ;;  %v3750_v1 = vrot.slane %v6664_v55, %v8991_v56 }
0x1377   : > { %v6926_v7 = vpop.f32.mrf.mxu1 }
0x1378   : > { %v3668_v8 = vadd.f32 %v6946_v5, %v3628_v4  ;;  %v6948_v9 = vpop.f32.mrf.mxu0  ;;  %v3742_v5 = vrot.slane %v6664_v55, %v8987_v54 }
0x137a   : > { %v3673_v10 = vadd.f32 %v3668_v8, %v9198_v17  ;;  %v7820_v17 = vld [vmem:[#allocation7 + $0x13c] ss:$12 sps:$4 sm:$0xff]  }
0x137b   : > { %3886 = vmatprep.subr.bf16.mxu1 %v7820_v17 }
0x137c   : > { %3676 = vadd.xlane.f32.xlu0 %v3673_v10  ;;  %3887 = vmatpush1.bf16.msra.mxu1 %v7818_v24 }
0x137d   : > { %3888 = vmatprep.subr.bf16.mxu1 %v7824_v49 }
0x1380   : > { %3889 = vmatpush1.bf16.msra.mxu1 %v7822_v26 }
0x1381   : > { %3890 = vmatprep.subr.bf16.mxu1 %v7828_v50 }
0x1384   : > { %3891 = vmatpush1.bf16.msra.mxu1 %v7826_v11 }
0x1385   : > { %3892 = vmatprep.subr.bf16.mxu1 %v7832_v29 }
0x1388   : > { %3893 = vmatpush1.bf16.msra.mxu1 %v7830_v30 }
0x1389   : > { %3894 = vmatprep.subr.bf16.mxu1 %v7836_v32 }
0x138c   : > { %3895 = vmatpush1.bf16.msra.mxu1 %v7834_v63 }
0x138d   : > { %3896 = vmatprep.subr.bf16.mxu1 %v7840_v34 }
0x1390   : > { %3897 = vmatpush1.bf16.msra.mxu1 %v7838_v35 }
0x1391   : > { %7270 = vmatprep.subr.bf16.mxu1 %v8574_v0 }
0x1405   : > { %v3677_v15 = vpop.xlane.xlu0 %3676 }
0x1406   : > { %v3678_v18 = vmul.f32 0.0078125, %v3677_v15 }
0x1408   : > { %v3679_v19 = vsub.f32 %v3673_v10, %v3678_v18 }
0x140a   : > { %v3680_v20 = vmul.f32 %v3679_v19, %v3679_v19 }
0x140c   : > { %3681 = vadd.xlane.f32.xlu1 %v3680_v20 }
0x1495   : > { %v3682_v37 = vpop.xlane.xlu1 %3681 }
0x1496   : > { %v3683_v38 = vmul.f32 0.0078125, %v3682_v37 }
0x1498   : > { %v3684_v16 = vadd.f32 1e-12, %v3683_v38 }
0x149a   : > { %8016 = vrsqrt.f32 %v3684_v16 }
0x14a7   : > { %v8017_v39 = vpop.eup %8016 }
0x14a8   : > { %v3686_v42 = vmul.f32 %v8017_v39, %v3679_v19 }
0x14aa   : > { %v3693_v45 = vmul.f32 %v6662_v41, %v3686_v42 }
0x14ac   : > { %v3700_v46 = vadd.f32 %v6663_v43, %v3693_v45 }
0x14ae   : > { %v9225_v47 = vmul.f32 %v3700_v46, %v9099_v61 }
0x14b0   : > { %v3702_v48 = vpack.c.bf16 %v9225_v47, %v9225_v47 }
0x14b2   : > { %3915 = vmatmul.mubr.bf16.vlgmr.msra.gmra.mxu1 %v3702_v48  ;;  %7267 = vmatmul.mubr.bf16.vlgmr.msra.gmra.mxu0 %v3702_v48 }
0x14b3   : > { %7272 = vmatprep.mubr.msk.bf16.mxu1 %vm8575_vm0, %v8574_v0  ;;  %7296 = vmatprep.mubr.msk.bf16.mxu0 %vm8575_vm0, %v8574_v0 }
0x1572   : > { %v3916_v58 = vpop.f32.mrf.mxu1  ;;  %v3957_v59 = vpop.f32.mrf.mxu0 }
0x1573   : > { %v3958_v9 = vadd.f32 %v3957_v59, %v3750_v1  ;;  %v3917_v12 = vadd.f32 %v3916_v58, %v3742_v5 }
0x1574   : > { %v3918_v60 = vpop.f32.mrf.mxu1  ;;  %v7268_v62 = vpop.f32.mrf.mxu0 }
0x1575   : > { %v3919_v2 = vadd.f32 %v3918_v60, %v3746_v57  ;;  %v9239_v13 = vpack.c.bf16 %v3958_v9, %v3958_v9  ;;  %v3963_v14 = vpack.c.bf16 %v3917_v12, %v3917_v12 }
0x1576   : > { %v3920_v3 = vpop.f32.mrf.mxu1  ;;  %v3960_v4 = vpop.f32.mrf.mxu0 }
0x1577   : > { %v3964_v6 = vpack.c.bf16 %v3919_v2, %v3919_v2  ;;  %v4030_v15 = vsel %vm1587_vm3, %v9239_v13, 0 }
0x1578   : > { %v3921_v7 = vpop.f32.mrf.mxu1  ;;  %v7269_v8 = vpop.f32.mrf.mxu0 }
0x1579   : > { %v3970_v10 = vsel %vm1516_vm2, %v3964_v6, 0 }
0x157a   : > { %7271 = vmatpush3.bf16.xpose.msra.mxu1 %v3970_v10 }
0x157b   : > { %7276 = vmatprep.subr.bf16.mxu1 %v8574_v0 }
0x1581   : > { %7273 = vmatmul.mubr.msk.bf16.vlgmr.msra.gmra.mxu1 %vm1516_vm2, %v3963_v14 }
0x1582   : > { %7277 = vmatpush3.bf16.msra.mxu1 %v4030_v15  ;;  %7278 = vmatprep.mubr.msk.bf16.mxu1 %vm8575_vm0, %v8574_v0 }
0x1583   : > { %7282 = vmatprep.subr.bf16.mxu1 %v8574_v0 }
0x1641   : > { %v4006_v18 = vpop.f32.mrf.mxu1 }
0x1642   : > { %v4012_v19 = vmul.f32 0.17677669, %v4006_v18 }
0x1643   : > { %v7274_v20 = vpop.f32.mrf.mxu1 }
0x1644   : > { %v4013_v22 = vadd.f32 %v9248_v21, %v4012_v19 }
0x1645   : > { %v4009_v23 = vpop.f32.mrf.mxu1 }
0x1646   : > { %v4014_v17 = vsel %vm1571_vm4, %v4013_v22, -inf }
0x1647   : > { %4015 = vmax.xlane.f32.xlu0 %v4014_v17  ;;  %v7275_v24 = vpop.f32.mrf.mxu1 }
0x165d   : > { %4076 = vrot.lane.b32.xlu0 %v3964_v6, %s8578_s15 }
0x1661   : > { %4187 = vrot.lane.b32.xlu0 %v3963_v14, %s8577_s1 }
0x1665   : > { %4299 = vrot.lane.b32.xlu0 %v3963_v14, %s8579_s6 }
0x16d0   : > { %v4016_v25 = vpop.xlane.xlu0 %4015 }
0x16d1   : > { %v4017_v49 = vsub.f32 %v4013_v22, %v4016_v25 }
0x16d3   : > { %v4018_v26 = vmul.f32 1.442695, %v4017_v49 }
0x16d4   : > { %v4077_v31 = vpop.permute.xlu0 %4076 }
0x16d5   : > { %8018 = vpow2.f32 %v4018_v26  ;;  %v4082_v37 = vsel %vm1516_vm2, %v4077_v31, 0 }
0x16d8   : > { %v4188_v34 = vpop.permute.xlu0 %4187 }
0x16dc   : > { %v4300_v38 = vpop.permute.xlu0 %4299 }
0x16e2   : > { %v8019_v27 = vpop.eup %8018 }
0x16e3   : > { %v4020_v50 = vsel %vm1571_vm4, %v8019_v27, 0.0 }
0x16e4   : > { %4021 = vadd.xlane.f32.xlu1 %v4020_v50 }
0x16f5   : > { %4073 = vrot.lane.b32.xlu1 %v3963_v14, %s8578_s15 }
0x16f9   : > { %4189 = vrot.lane.b32.xlu1 %v3964_v6, %s8577_s1 }
0x16fd   : > { %4301 = vrot.lane.b32.xlu1 %v3964_v6, %s8579_s6 }
0x176d   : > { %v4022_v11 = vpop.xlane.xlu1 %4021 }
0x176e   : > { %8020 = vrcp.f32 %v4022_v11 }
0x1771   : > { %v4074_v28 = vpop.permute.xlu1 %4073 }
0x1775   : > { %v4190_v29 = vpop.permute.xlu1 %4189 }
0x1776   : > { %v4195_v30 = vsel %vm1516_vm2, %v4190_v29, 0 }
0x1777   : > { %7295 = vmatpush3.bf16.xpose.msra.mxu0 %v4195_v30 }
0x1778   : > { %7306 = vmatprep.subr.bf16.mxu0 %v8574_v0 }
0x1779   : > { %v4302_v63 = vpop.permute.xlu1 %4301 }
0x177a   : > { %v4307_v35 = vsel %vm1516_vm2, %v4302_v63, 0 }
0x177b   : > { %v8021_v32 = vpop.eup %8020 }
0x177c   : > { %v4024_v33 = vmul.f32 %v8021_v32, %v8019_v27 }
0x177e   : > { %7297 = vmatmul.mubr.msk.bf16.vlgmr.msra.gmra.mxu0 %vm1516_vm2, %v4188_v34  ;;  %v4025_v36 = vpack.c.bf16 %v4024_v33, %v4024_v33 }
0x177f   : > { %7307 = vmatpush3.bf16.xpose.msra.mxu0 %v4307_v35  ;;  %7308 = vmatprep.mubr.msk.bf16.mxu0 %vm8575_vm0, %v8574_v0 }
0x1780   : > { %7279 = vmatmul.mubr.msk.bf16.vlgmr.msra.gmra.mxu1 %vm1571_vm4, %v4025_v36  ;;  %7318 = vmatprep.subr.bf16.mxu0 %v8574_v0 }
0x1781   : > { %7283 = vmatpush3.bf16.xpose.msra.mxu1 %v4082_v37  ;;  %7284 = vmatprep.mubr.msk.bf16.mxu1 %vm8575_vm0, %v8574_v0 }
0x1782   : > { %7288 = vmatprep.subr.bf16.mxu1 %v8574_v0 }
0x1786   : > { %7309 = vmatmul.mubr.msk.bf16.vlgmr.msra.gmra.mxu0 %vm1516_vm2, %v4300_v38 }
0x1787   : > { %7334 = vmatprep.mubr.msk.bf16.mxu0 %vm8575_vm0, %v8574_v0 }
0x1788   : > { %7285 = vmatmul.mubr.msk.bf16.vlgmr.msra.gmra.mxu1 %vm1516_vm2, %v4074_v28 }
0x1789   : > { %7290 = vmatprep.mubr.msk.bf16.mxu1 %vm8575_vm0, %v8574_v0 }
0x183e   : > { %v4231_v16 = vpop.f32.mrf.mxu0 }
0x183f   : > { %v4237_v39 = vmul.f32 0.17677669, %v4231_v16 }
0x1840   : > { %v9277_v41 = vpop.f32.mrf.mxu1  ;;  %v7298_v42 = vpop.f32.mrf.mxu0 }
0x1841   : > { %v4238_v43 = vadd.f32 %v9248_v21, %v4237_v39 }
0x1842   : > { %v7280_v45 = vpop.f32.mrf.mxu1  ;;  %v4234_v46 = vpop.f32.mrf.mxu0 }
0x1843   : > { %v4239_v48 = vsel %vm1571_vm4, %v4238_v43, -inf  ;;  %v7842_v45 = vld [vmem:[#allocation8 + $0x78] sm:$0xff]   ;;  %v7843_v46 = vld [vmem:[#allocation8 + $0x70] sm:$0xff]  }
0x1844   : > { %4240 = vmax.xlane.f32.xlu0 %v4239_v48  ;;  %v4069_v55 = vpop.f32.mrf.mxu1  ;;  %v7299_v57 = vpop.f32.mrf.mxu0  ;;  %7319 = vmatpush3.bf16.msra.mxu0 %v7842_v45  ;;  %v7844_v48 = vld [vmem:[#allocation8 + $0x68] sm:$0xff]  }
0x1845   : > { %7320 = vmatprep.subr.bf16.mxu0 %v8574_v0  ;;  %v7845_v55 = vld [vmem:[#allocation8 + $0x60] sm:$0xff]   ;;  %v7846_v57 = vld [vmem:[#allocation8 + $0x58] sm:$0xff]  }
0x1846   : > { %v7281_v58 = vpop.f32.mrf.mxu1  ;;  %v4343_v59 = vpop.f32.mrf.mxu0  ;;  %v7877_v45 = vld [vmem:[#allocation13 + $0x84] ss:$8 sps:$4 sm:$0xff]  }
0x1847   : > { %v4349_v60 = vmul.f32 0.17677669, %v4343_v59  ;;  %v7847_v58 = vld [vmem:[#allocation8 + $0x50] sm:$0xff]   ;;  %v7848_v59 = vld [vmem:[#allocation8 + $0x48] sm:$0xff]  }
0x1848   : > { %v4118_v62 = vpop.f32.mrf.mxu1  ;;  %v7310_v1 = vpop.f32.mrf.mxu0  ;;  %7321 = vmatpush3.bf16.msra.mxu0 %v7843_v46  ;;  %v7874_v46 = vld [vmem:[#allocation10 + $0x60] sm:$0xff]  }
0x1849   : > { %v4124_v2 = vmul.f32 0.17677669, %v4118_v62  ;;  %v4350_v3 = vadd.f32 %v9248_v21, %v4349_v60  ;;  %7322 = vmatprep.subr.bf16.mxu0 %v8574_v0  ;;  %v7849_v1 = vld [vmem:[#allocation8 + $0x40] sm:$0xff]  }
0x184a   : > { %v7286_v4 = vpop.f32.mrf.mxu1  ;;  %v4346_v5 = vpop.f32.mrf.mxu0 }
0x184b   : > { %v4351_v6 = vsel %vm1571_vm4, %v4350_v3, -inf  ;;  %v4125_v7 = vadd.f32 %v9248_v21, %v4124_v2 }
0x184c   : > { %4352 = vmax.xlane.f32.xlu0 %v4351_v6  ;;  %v4121_v8 = vpop.f32.mrf.mxu1  ;;  %v7311_v9 = vpop.f32.mrf.mxu0  ;;  %7323 = vmatpush3.bf16.msra.mxu0 %v7844_v48  ;;  %v7875_v48 = vld [vmem:[#allocation13 + $0x80] ss:$8 sps:$4 sm:$0xff]  }
0x184d   : > { %v4126_v10 = vsel %vm1571_vm4, %v4125_v7, -inf  ;;  %7324 = vmatprep.subr.bf16.mxu0 %v8574_v0 }
0x184e   : > { %4127 = vmax.xlane.f32.xlu1 %v4126_v10  ;;  %v7287_v12 = vpop.f32.mrf.mxu1 }
0x1850   : > { %7325 = vmatpush3.bf16.msra.mxu0 %v7845_v55  ;;  %v7878_v55 = vld [vmem:[#allocation10 + $0x58] sm:$0xff]  }
0x1851   : > { %7326 = vmatprep.subr.bf16.mxu0 %v8574_v0 }
0x1854   : > { %7327 = vmatpush3.bf16.msra.mxu0 %v7846_v57  ;;  %v7879_v57 = vld [vmem:[#allocation10 + $0x50] sm:$0xff]  }
0x1855   : > { %7328 = vmatprep.subr.bf16.mxu0 %v8574_v0 }
0x1858   : > { %7329 = vmatpush3.bf16.msra.mxu0 %v7847_v58  ;;  %v7880_v58 = vld [vmem:[#allocation10 + $0x48] sm:$0xff]  }
0x1859   : > { %7330 = vmatprep.subr.bf16.mxu0 %v8574_v0 }
0x185c   : > { %7331 = vmatpush3.bf16.msra.mxu0 %v7848_v59  ;;  %v7881_v59 = vld [vmem:[#allocation10 + $0x40] sm:$0xff]  }
0x185d   : > { %7332 = vmatprep.subr.bf16.mxu0 %v8574_v0 }
0x1860   : > { %7333 = vmatpush3.bf16.msra.mxu0 %v7849_v1 }
0x18cd   : > { %v4241_v14 = vpop.xlane.xlu0 %4240 }
0x18ce   : > { %v4242_v15 = vsub.f32 %v4238_v43, %v4241_v14 }
0x18d0   : > { %v4243_v18 = vmul.f32 1.442695, %v4242_v15 }
0x18d2   : > { %8022 = vpow2.f32 %v4243_v18 }
0x18d5   : > { %v4353_v19 = vpop.xlane.xlu0 %4352 }
0x18d6   : > { %v4354_v20 = vsub.f32 %v4350_v3, %v4353_v19 }
0x18d7   : > { %v4128_v22 = vpop.xlane.xlu1 %4127 }
0x18d8   : > { %v4355_v23 = vmul.f32 1.442695, %v4354_v20  ;;  %v4129_v17 = vsub.f32 %v4125_v7, %v4128_v22 }
0x18da   : > { %8024 = vpow2.f32 %v4355_v23  ;;  %v4130_v24 = vmul.f32 1.442695, %v4129_v17  ;;  %v6698_v17 = vld [vmem:[%s9586_s23 + $0x1] ss:$0 sm:$0xff] }
0x18dc   : > { %8026 = vpow2.f32 %v4130_v24 }
0x18df   : > { %v8023_v21 = vpop.eup %8022 }
0x18e0   : > { %v4245_v25 = vsel %vm1571_vm4, %v8023_v21, 0.0 }
0x18e1   : > { %4246 = vadd.xlane.f32.xlu0 %v4245_v25 }
0x18e7   : > { %v8025_v49 = vpop.eup %8024 }
0x18e8   : > { %v4357_v26 = vsel %vm1571_vm4, %v8025_v49, 0.0 }
0x18e9   : > { %v8027_v27 = vpop.eup %8026  ;;  %4358 = vadd.xlane.f32.xlu1 %v4357_v26 }
0x18ea   : > { %v4132_v50 = vsel %vm1571_vm4, %v8027_v27, 0.0 }
0x18ed   : > { %4133 = vadd.xlane.f32.xlu1 %v4132_v50  ;;  %v7850_v50 = vld [vmem:[#allocation13 + $0xf0] ss:$8 sps:$4 sm:$0xff]  }
0x18f7   : > { %4139 = vrot.lane.b32.xlu0 %v9239_v13, %s8578_s15 }
0x18fe   : > { %4251 = vrot.lane.b32.xlu1 %v9239_v13, %s8577_s1 }
0x1902   : > { %4363 = vrot.lane.b32.xlu1 %v9239_v13, %s8579_s6 }
0x196a   : > { %v4247_v11 = vpop.xlane.xlu0 %4246 }
0x196e   : > { %v4140_v28 = vpop.permute.xlu0 %4139 }
0x196f   : > { %v4145_v29 = vsel %vm1587_vm3, %v4140_v28, 0  ;;  %v7862_v28 = vld [vmem:[#allocation10 + $0x78] sm:$0xff]  }
0x1970   : > { %7289 = vmatpush3.bf16.msra.mxu1 %v4145_v29  ;;  %v7853_v29 = vld [vmem:[#allocation13 + $0xe0] ss:$8 sps:$4 sm:$0xff]  }
0x1971   : > { %7300 = vmatprep.subr.bf16.mxu1 %v8574_v0 }
0x1972   : > { %v4359_v30 = vpop.xlane.xlu1 %4358 }
0x1976   : > { %v4134_v31 = vpop.xlane.xlu1 %4133 }
0x1977   : > { %8028 = vrcp.f32 %v4134_v31  ;;  %v7856_v31 = vld [vmem:[#allocation13 + $0xd0] ss:$8 sps:$4 sm:$0xff]  }
0x1978   : > { %8030 = vrcp.f32 %v4247_v11  ;;  %v7855_v11 = vld [vmem:[#allocation13 + $0xe4] ss:$8 sps:$4 sm:$0xff]  }
0x1979   : > { %8032 = vrcp.f32 %v4359_v30  ;;  %v7858_v30 = vld [vmem:[#allocation13 + $0xd4] ss:$8 sps:$4 sm:$0xff]  }
0x197a   : > { %v4252_v33 = vpop.permute.xlu1 %4251 }
0x197b   : > { %v4257_v36 = vsel %vm1587_vm3, %v4252_v33, 0  ;;  %v7863_v33 = vld [vmem:[#allocation13 + $0xb0] ss:$8 sps:$4 sm:$0xff]  }
0x197e   : > { %v4364_v37 = vpop.permute.xlu1 %4363 }
0x197f   : > { %v4369_v39 = vsel %vm1587_vm3, %v4364_v37, 0  ;;  %v7866_v37 = vld [vmem:[#allocation10 + $0x70] sm:$0xff]  }
0x1984   : > { %v8029_v32 = vpop.eup %8028 }
0x1985   : > { %v4136_v63 = vmul.f32 %v8029_v32, %v8027_v27  ;;  %v8031_v35 = vpop.eup %8030  ;;  %v7861_v32 = vld [vmem:[#allocation13 + $0xc4] ss:$8 sps:$4 sm:$0xff]  }
0x1986   : > { %v4249_v13 = vmul.f32 %v8031_v35, %v8023_v21  ;;  %v8033_v16 = vpop.eup %8032 }
0x1987   : > { %v4137_v34 = vpack.c.bf16 %v4136_v63, %v4136_v63  ;;  %v4361_v42 = vmul.f32 %v8033_v16, %v8025_v49  ;;  %v7865_v63 = vld [vmem:[#allocation13 + $0xb4] ss:$8 sps:$4 sm:$0xff]   ;;  %v7867_v16 = vld [vmem:[#allocation13 + $0xa0] ss:$8 sps:$4 sm:$0xff]  }
0x1988   : > { %v4250_v38 = vpack.c.bf16 %v4249_v13, %v4249_v13 }
0x1989   : > { %7291 = vmatmul.mubr.msk.bf16.vlgmr.msra.gmra.mxu1 %vm1571_vm4, %v4137_v34  ;;  %v4362_v43 = vpack.c.bf16 %v4361_v42, %v4361_v42  ;;  %v7871_v42 = vld [vmem:[#allocation13 + $0x90] ss:$8 sps:$4 sm:$0xff]  }
0x198a   : > { %7301 = vmatpush3.bf16.msra.mxu1 %v4257_v36  ;;  %7302 = vmatprep.mubr.msk.bf16.mxu1 %vm8575_vm0, %v8574_v0 }
0x198b   : > { %7312 = vmatprep.subr.bf16.mxu1 %v8574_v0 }
0x1991   : > { %7303 = vmatmul.mubr.msk.bf16.vlgmr.msra.gmra.mxu1 %vm1571_vm4, %v4250_v38  ;;  %v7869_v38 = vld [vmem:[#allocation13 + $0xa4] ss:$8 sps:$4 sm:$0xff]  }
0x1992   : > { %7313 = vmatpush3.bf16.msra.mxu1 %v4369_v39  ;;  %7314 = vmatprep.mubr.msk.bf16.mxu1 %vm8575_vm0, %v8574_v0  ;;  %v7870_v39 = vld [vmem:[#allocation10 + $0x68] sm:$0xff]  }
0x1993   : > { %7338 = vmatprep.subr.bf16.mxu1 %v8574_v0 }
0x1999   : > { %7315 = vmatmul.mubr.msk.bf16.vlgmr.msra.gmra.mxu1 %vm1571_vm4, %v4362_v43  ;;  %v7873_v43 = vld [vmem:[#allocation13 + $0x94] ss:$8 sps:$4 sm:$0xff]  }
0x199a   : > { %7354 = vmatprep.mubr.msk.bf16.mxu1 %vm8575_vm0, %v8574_v0  ;;  %7339 = vmatpush3.bf16.msra.mxu1 %v7862_v28 }
0x199b   : > { %7340 = vmatprep.subr.bf16.mxu1 %v8574_v0 }
0x199e   : > { %7341 = vmatpush3.bf16.msra.mxu1 %v7866_v37 }
0x199f   : > { %7342 = vmatprep.subr.bf16.mxu1 %v8574_v0 }
0x19a2   : > { %7343 = vmatpush3.bf16.msra.mxu1 %v7870_v39 }
0x19a3   : > { %7344 = vmatprep.subr.bf16.mxu1 %v8574_v0 }
0x19a6   : > { %7345 = vmatpush3.bf16.msra.mxu1 %v7874_v46 }
0x19a7   : > { %7346 = vmatprep.subr.bf16.mxu1 %v8574_v0 }
0x19aa   : > { %7347 = vmatpush3.bf16.msra.mxu1 %v7878_v55 }
0x19ab   : > { %7348 = vmatprep.subr.bf16.mxu1 %v8574_v0 }
0x19ae   : > { %7349 = vmatpush3.bf16.msra.mxu1 %v7879_v57 }
0x19af   : > { %7350 = vmatprep.subr.bf16.mxu1 %v8574_v0 }
0x19b2   : > { %7351 = vmatpush3.bf16.msra.mxu1 %v7880_v58 }
0x19b3   : > { %7352 = vmatprep.subr.bf16.mxu1 %v8574_v0 }
0x19b6   : > { %7353 = vmatpush3.bf16.msra.mxu1 %v7881_v59 }
0x19b7   : > { %7358 = vmatprep.subr.bf16.mxu1 %v8574_v0 }
0x1a49   : > { %v4181_v60 = vpop.f32.mrf.mxu1 }
0x1a4a   : > { %4412 = vrot.lane.b32.xlu0 %v4181_v60, %s8579_s6 }
0x1a4b   : > { %v7292_v62 = vpop.f32.mrf.mxu1 }
0x1a4d   : > { %v4184_v2 = vpop.f32.mrf.mxu1 }
0x1a4e   : > { %v6709_v2 = vld [vmem:[%s9590_s9 + $0x1] ss:$0 sm:$0xff] }
0x1a4f   : > { %v7293_v3 = vpop.f32.mrf.mxu1 }
0x1a51   : > { %v4293_v4 = vpop.f32.mrf.mxu1 }
0x1a52   : > { %4416 = vrot.lane.b32.xlu1 %v4293_v4, %s8577_s1  ;;  %v6710_v4 = vld [vmem:[%s9591_s8 + $0x1] ss:$0 sm:$0xff] }
0x1a53   : > { %v7304_v5 = vpop.f32.mrf.mxu1 }
0x1a55   : > { %v4296_v6 = vpop.f32.mrf.mxu1 }
0x1a57   : > { %v7305_v7 = vpop.f32.mrf.mxu1 }
0x1a59   : > { %v4405_v8 = vpop.f32.mrf.mxu1 }
0x1a5a   : > { %4420 = vrot.lane.b32.xlu0 %v4405_v8, %s8578_s15 }
0x1a5b   : > { %v7316_v9 = vpop.f32.mrf.mxu1 }
0x1a5c   : > { %v6720_v9 = vld [vmem:[%s9593_s2 + $0x2] sm:$0x3]  ;;  %s8407_s2 = sshll.u32 %s8580_s7, 4  ;;  %s8408_s2 = int_to_ptr.vmem [resolvable:$false] %s8407_s2 }
0x1a5d   : > { %v4408_v10 = vpop.f32.mrf.mxu1  ;;  %s8409_s3 = scalar_lea.vmem %s8408_s2, 256 }
0x1a5e   : > { %v4708_v10 = vrot.slane %v6720_v9, %v8987_v54 }
0x1a5f   : > { %v7317_v12 = vpop.f32.mrf.mxu1 }
0x1a60   : > { %v4712_v12 = vrot.slane %v6720_v9, %v8984_v53 }
0x1abc   : > { %v4413_v14 = vpop.permute.xlu0 %4412 }
0x1abd   : > { %v4423_v18 = vsel %vm1516_vm2, %v9277_v41, %v4413_v14  ;;  %v7852_v41 = vld [vmem:[#allocation13 + $0xf4] ss:$8 sps:$4 sm:$0xff]  }
0x1abe   : > { %4795 = vmatprep.subr.bf16.mxu0 %v7852_v41 }
0x1ac4   : > { %v4417_v15 = vpop.permute.xlu1 %4416 }
0x1ac5   : > { %v4424_v19 = vsel %vm1177_vm1, %v4423_v18, %v4417_v15 }
0x1acc   : > { %v4421_v20 = vpop.permute.xlu0 %4420 }
0x1acd   : > { %v4425_v22 = vsel %vm1984_vm5, %v4424_v19, %v4421_v20 }
0x1ace   : > { %v4426_v23 = vpack.c.bf16 %v4425_v22, %v4425_v22 }
0x1ad0   : > { %7335 = vmatmul.mubr.bf16.vlgmr.msra.gmra.mxu0 %v4426_v23 }
0x1ad1   : > { %4827 = vmatprep.mubr.bf16.mxu0 %v8576_v40  ;;  %4796 = vmatpush1.bf16.msra.mxu0 %v7850_v50 }
0x1ad2   : > { %4797 = vmatprep.subr.bf16.mxu0 %v7855_v11 }
0x1ad5   : > { %4798 = vmatpush1.bf16.msra.mxu0 %v7853_v29 }
0x1ad6   : > { %4799 = vmatprep.subr.bf16.mxu0 %v7858_v30 }
0x1ad9   : > { %4800 = vmatpush1.bf16.msra.mxu0 %v7856_v31 }
0x1ada   : > { %4801 = vmatprep.subr.bf16.mxu0 %v7861_v32 }
0x1b90   : > { %v4534_v24 = vpop.f32.mrf.mxu0 }
0x1b91   : > { %v4535_v21 = vadd.f32 %v6698_v17, %v4534_v24  ;;  %v6711_v24 = vld [vmem:[#allocation11 + $0x1] ss:$0 sm:$0xff] }
0x1b92   : > { %v7336_v25 = vpop.f32.mrf.mxu0 }
0x1b93   : > { %v4540_v49 = vadd.f32 %v4535_v21, %v9225_v47  ;;  %v7859_v47 = vld [vmem:[#allocation13 + $0xc0] ss:$8 sps:$4 sm:$0xff]  }
0x1b94   : > { %v4537_v26 = vpop.f32.mrf.mxu0  ;;  %4802 = vmatpush1.bf16.msra.mxu0 %v7859_v47 }
0x1b95   : > { %4545 = vadd.xlane.f32.xlu1 %v4540_v49  ;;  %4803 = vmatprep.subr.bf16.mxu0 %v7865_v63 }
0x1b96   : > { %v7337_v27 = vpop.f32.mrf.mxu0 }
0x1b98   : > { %4804 = vmatpush1.bf16.msra.mxu0 %v7863_v33 }
0x1b99   : > { %4805 = vmatprep.subr.bf16.mxu0 %v7869_v38 }
0x1b9c   : > { %4806 = vmatpush1.bf16.msra.mxu0 %v7867_v16 }
0x1b9d   : > { %4807 = vmatprep.subr.bf16.mxu0 %v7873_v43 }
0x1ba0   : > { %4808 = vmatpush1.bf16.msra.mxu0 %v7871_v42 }
0x1ba1   : > { %4809 = vmatprep.subr.bf16.mxu0 %v7877_v45 }
0x1ba4   : > { %4810 = vmatpush1.bf16.msra.mxu0 %v7875_v48 }
0x1ba5   : > { %7382 = vmatprep.subr.bf16.mxu0 %v8574_v0 }
0x1ba7   : > { %4828 = vmatmul.mubr.bf16.vlgmr.msra.gmra.mxu0 %v9086_v44 }
0x1ba8   : > { %7384 = vmatprep.mubr.msk.bf16.mxu0 %vm8575_vm0, %v8574_v0 }
0x1c1e   : > { %v4546_v34 = vpop.xlane.xlu1 %4545 }
0x1c1f   : > { %v4547_v35 = vmul.f32 0.0078125, %v4546_v34 }
0x1c21   : > { %v4548_v36 = vsub.f32 %v4540_v49, %v4547_v35 }
0x1c23   : > { %v4549_v13 = vmul.f32 %v4548_v36, %v4548_v36 }
0x1c25   : > { %4550 = vadd.xlane.f32.xlu0 %v4549_v13 }
0x1c67   : > { %v4829_v14 = vpop.f32.mrf.mxu0 }
0x1c68   : > { %v4830_v15 = vadd.f32 %v4829_v14, %v4708_v10 }
0x1c69   : > { %v4831_v18 = vpop.f32.mrf.mxu0 }
0x1c6a   : > { %v4837_v19 = vpack.c.bf16 %v4830_v15, %v4830_v15  ;;  %v4832_v20 = vadd.f32 %v4831_v18, %v4712_v12 }
0x1c6b   : > { %v4833_v22 = vpop.f32.mrf.mxu0 }
0x1c6c   : > { %v4843_v23 = vsel %vm1516_vm2, %v4837_v19, 0  ;;  %v9352_v25 = vpack.c.bf16 %v4832_v20, %v4832_v20 }
0x1c6d   : > { %v4834_v17 = vpop.f32.mrf.mxu0 }
0x1c6e   : > { %v4902_v41 = vsel %vm1587_vm3, %v9352_v25, 0 }
0x1cae   : > { %v4551_v44 = vpop.xlane.xlu0 %4550 }
0x1caf   : > { %v4552_v60 = vmul.f32 0.0078125, %v4551_v44 }
0x1cb1   : > { %v4553_v62 = vadd.f32 1e-12, %v4552_v60 }
0x1cb3   : > { %8034 = vrsqrt.f32 %v4553_v62 }
0x1cc0   : > { %v8035_v1 = vpop.eup %8034 }
0x1cc1   : > { %v4555_v3 = vmul.f32 %v8035_v1, %v4548_v36 }
0x1cc3   : > { %v4562_v5 = vmul.f32 %v6709_v2, %v4555_v3 }
0x1cc5   : > { %v4569_v6 = vadd.f32 %v6710_v4, %v4562_v5 }
0x1cc7   : > { %v9341_v7 = vmul.f32 %v4569_v6, %v9099_v61 }
0x1cc9   : > { %v4571_v8 = vpack.c.bf16 %v9341_v7, %v9341_v7 }
0x1ccb   : > { %7355 = vmatmul.mubr.bf16.vlgmr.msra.gmra.mxu1 %v4571_v8 }
0x1ccc   : > { %7360 = vmatprep.mubr.msk.bf16.mxu1 %vm8575_vm0, %v8574_v0  ;;  %7359 = vmatpush3.bf16.xpose.msra.mxu1 %v4843_v23 }
0x1ccd   : > { %7364 = vmatprep.subr.bf16.mxu1 %v8574_v0 }
0x1d8b   : > { %v4679_v21 = vpop.f32.mrf.mxu1 }
0x1d8c   : > { %v4680_v49 = vadd.f32 %v6711_v24, %v4679_v21 }
0x1d8d   : > { %v7356_v26 = vpop.f32.mrf.mxu1 }
0x1d8e   : > { %v4836_v27 = vpack.c.bf16 %v4680_v49, %v4680_v49 }
0x1d8f   : > { %v4682_v50 = vpop.f32.mrf.mxu1 }
0x1d90   : > { %7361 = vmatmul.mubr.msk.bf16.vlgmr.msra.gmra.mxu1 %vm1516_vm2, %v4836_v27 }
0x1d91   : > { %7365 = vmatpush3.bf16.msra.mxu1 %v4902_v41  ;;  %v7357_v11 = vpop.f32.mrf.mxu1  ;;  %7366 = vmatprep.mubr.msk.bf16.mxu1 %vm8575_vm0, %v8574_v0 }
0x1d92   : > { %7370 = vmatprep.subr.bf16.mxu1 %v8574_v0 }
0x1e50   : > { %v4879_v28 = vpop.f32.mrf.mxu1 }
0x1e51   : > { %v4885_v29 = vmul.f32 0.17677669, %v4879_v28 }
0x1e52   : > { %v7362_v30 = vpop.f32.mrf.mxu1 }
0x1e53   : > { %v4886_v31 = vsel %vm1571_vm4, %v4885_v29, -inf }
0x1e54   : > { %4887 = vmax.xlane.f32.xlu0 %v4886_v31  ;;  %v4882_v32 = vpop.f32.mrf.mxu1 }
0x1e56   : > { %v7363_v47 = vpop.f32.mrf.mxu1 }
0x1e6a   : > { %4948 = vrot.lane.b32.xlu0 %v4837_v19, %s8578_s15 }
0x1e6e   : > { %5058 = vrot.lane.b32.xlu0 %v4836_v27, %s8577_s1 }
0x1e72   : > { %5169 = vrot.lane.b32.xlu0 %v4836_v27, %s8579_s6 }
0x1edd   : > { %v4888_v63 = vpop.xlane.xlu0 %4887 }
0x1ede   : > { %v4889_v33 = vsub.f32 %v4885_v29, %v4888_v63 }
0x1ee0   : > { %v4890_v34 = vmul.f32 1.442695, %v4889_v33 }
0x1ee1   : > { %v4949_v39 = vpop.permute.xlu0 %4948 }
0x1ee2   : > { %8036 = vpow2.f32 %v4890_v34  ;;  %v4954_v57 = vsel %vm1516_vm2, %v4949_v39, 0 }
0x1ee5   : > { %v5059_v46 = vpop.permute.xlu0 %5058 }
0x1ee9   : > { %v5170_v58 = vpop.permute.xlu0 %5169 }
0x1eef   : > { %v8037_v35 = vpop.eup %8036 }
0x1ef0   : > { %v4892_v36 = vsel %vm1571_vm4, %v8037_v35, 0.0 }
0x1ef1   : > { %4893 = vadd.xlane.f32.xlu1 %v4892_v36 }
0x1f02   : > { %4945 = vrot.lane.b32.xlu1 %v4836_v27, %s8578_s15 }
0x1f06   : > { %5060 = vrot.lane.b32.xlu1 %v4837_v19, %s8577_s1 }
0x1f0a   : > { %5171 = vrot.lane.b32.xlu1 %v4837_v19, %s8579_s6 }
0x1f7a   : > { %v4894_v13 = vpop.xlane.xlu1 %4893 }
0x1f7b   : > { %8038 = vrcp.f32 %v4894_v13 }
0x1f7e   : > { %v4946_v37 = vpop.permute.xlu1 %4945 }
0x1f82   : > { %v5061_v38 = vpop.permute.xlu1 %5060 }
0x1f83   : > { %v5066_v16 = vsel %vm1516_vm2, %v5061_v38, 0 }
0x1f84   : > { %7383 = vmatpush3.bf16.xpose.msra.mxu0 %v5066_v16 }
0x1f85   : > { %7394 = vmatprep.subr.bf16.mxu0 %v8574_v0 }
0x1f86   : > { %v5172_v43 = vpop.permute.xlu1 %5171 }
0x1f87   : > { %v5177_v48 = vsel %vm1516_vm2, %v5172_v43, 0 }
0x1f88   : > { %v8039_v42 = vpop.eup %8038 }
0x1f89   : > { %v4896_v45 = vmul.f32 %v8039_v42, %v8037_v35 }
0x1f8b   : > { %7385 = vmatmul.mubr.msk.bf16.vlgmr.msra.gmra.mxu0 %vm1516_vm2, %v5059_v46  ;;  %v4897_v55 = vpack.c.bf16 %v4896_v45, %v4896_v45 }
0x1f8c   : > { %7395 = vmatpush3.bf16.xpose.msra.mxu0 %v5177_v48  ;;  %7396 = vmatprep.mubr.msk.bf16.mxu0 %vm8575_vm0, %v8574_v0 }
0x1f8d   : > { %7367 = vmatmul.mubr.msk.bf16.vlgmr.msra.gmra.mxu1 %vm1571_vm4, %v4897_v55  ;;  %7406 = vmatprep.subr.bf16.mxu0 %v8574_v0 }
0x1f8e   : > { %7371 = vmatpush3.bf16.xpose.msra.mxu1 %v4954_v57  ;;  %7372 = vmatprep.mubr.msk.bf16.mxu1 %vm8575_vm0, %v8574_v0 }
0x1f8f   : > { %7376 = vmatprep.subr.bf16.mxu1 %v8574_v0 }
0x1f93   : > { %7397 = vmatmul.mubr.msk.bf16.vlgmr.msra.gmra.mxu0 %vm1516_vm2, %v5170_v58 }
0x1f94   : > { %7422 = vmatprep.mubr.msk.bf16.mxu0 %vm8575_vm0, %v8574_v0 }
0x1f95   : > { %7373 = vmatmul.mubr.msk.bf16.vlgmr.msra.gmra.mxu1 %vm1516_vm2, %v4946_v37 }
0x1f96   : > { %7378 = vmatprep.mubr.msk.bf16.mxu1 %vm8575_vm0, %v8574_v0 }
0x204b   : > { %v5102_v59 = vpop.f32.mrf.mxu0 }
0x204c   : > { %v5108_v44 = vmul.f32 0.17677669, %v5102_v59  ;;  %v7882_v59 = vld [vmem:[#allocation14 + $0x78] sm:$0xff]  }
0x204d   : > { %v9386_v60 = vpop.f32.mrf.mxu1  ;;  %v7386_v62 = vpop.f32.mrf.mxu0  ;;  %7407 = vmatpush3.bf16.msra.mxu0 %v7882_v59  ;;  %v7922_v59 = vld [vmem:[#allocation17 + $0x144] ss:$16 sps:$4 sm:$0xff]  }
0x204e   : > { %v5109_v1 = vsel %vm1571_vm4, %v5108_v44, -inf  ;;  %7408 = vmatprep.subr.bf16.mxu0 %v8574_v0  ;;  %v7884_v62 = vld [vmem:[#allocation14 + $0x68] sm:$0xff]  }
0x204f   : > { %5110 = vmax.xlane.f32.xlu0 %v5109_v1  ;;  %v7368_v2 = vpop.f32.mrf.mxu1  ;;  %v5105_v3 = vpop.f32.mrf.mxu0  ;;  %v7885_v1 = vld [vmem:[#allocation14 + $0x60] sm:$0xff]  }
0x2050   : > { %v7886_v2 = vld [vmem:[#allocation14 + $0x58] sm:$0xff]   ;;  %v7887_v3 = vld [vmem:[#allocation14 + $0x50] sm:$0xff]  }
0x2051   : > { %v4941_v4 = vpop.f32.mrf.mxu1  ;;  %v7387_v5 = vpop.f32.mrf.mxu0 }
0x2052   : > { %v7888_v4 = vld [vmem:[#allocation14 + $0x48] sm:$0xff]  }
0x2053   : > { %v7369_v6 = vpop.f32.mrf.mxu1  ;;  %v5213_v8 = vpop.f32.mrf.mxu0 }
0x2054   : > { %v5219_v9 = vmul.f32 0.17677669, %v5213_v8  ;;  %v7889_v8 = vld [vmem:[#allocation14 + $0x40] sm:$0xff]  }
0x2055   : > { %v4990_v10 = vpop.f32.mrf.mxu1  ;;  %v7398_v12 = vpop.f32.mrf.mxu0 }
0x2056   : > { %v4996_v14 = vmul.f32 0.17677669, %v4990_v10  ;;  %v5220_v15 = vsel %vm1571_vm4, %v5219_v9, -inf }
0x2057   : > { %5221 = vmax.xlane.f32.xlu0 %v5220_v15  ;;  %v7374_v18 = vpop.f32.mrf.mxu1  ;;  %v5216_v19 = vpop.f32.mrf.mxu0 }
0x2058   : > { %v4997_v20 = vsel %vm1571_vm4, %v4996_v14, -inf }
0x2059   : > { %v7399_v22 = vpop.f32.mrf.mxu0  ;;  %4998 = vmax.xlane.f32.xlu1 %v4997_v20  ;;  %v4993_v23 = vpop.f32.mrf.mxu1 }
0x205b   : > { %v7375_v17 = vpop.f32.mrf.mxu1 }
0x20d8   : > { %v5111_v24 = vpop.xlane.xlu0 %5110 }
0x20d9   : > { %v5112_v21 = vsub.f32 %v5108_v44, %v5111_v24  ;;  %v7883_v44 = vld [vmem:[#allocation14 + $0x70] sm:$0xff]  }
0x20da   : > { %7409 = vmatpush3.bf16.msra.mxu0 %v7883_v44  ;;  %v7925_v44 = vld [vmem:[#allocation17 + $0x14c] ss:$16 sps:$4 sm:$0xff]  }
0x20db   : > { %v5113_v49 = vmul.f32 1.442695, %v5112_v21  ;;  %7410 = vmatprep.subr.bf16.mxu0 %v8574_v0 }
0x20dd   : > { %8040 = vpow2.f32 %v5113_v49 }
0x20de   : > { %7411 = vmatpush3.bf16.msra.mxu0 %v7884_v62  ;;  %v7920_v62 = vld [vmem:[#allocation17 + $0x140] ss:$16 sps:$4 sm:$0xff]  }
0x20df   : > { %7412 = vmatprep.subr.bf16.mxu0 %v8574_v0 }
0x20e0   : > { %v5222_v26 = vpop.xlane.xlu0 %5221 }
0x20e1   : > { %v5223_v27 = vsub.f32 %v5219_v9, %v5222_v26 }
0x20e2   : > { %v4999_v50 = vpop.xlane.xlu1 %4998  ;;  %7413 = vmatpush3.bf16.msra.mxu0 %v7885_v1  ;;  %v7923_v1 = vld [vmem:[#allocation17 + $0x148] ss:$16 sps:$4 sm:$0xff]  }
0x20e3   : > { %v5224_v41 = vmul.f32 1.442695, %v5223_v27  ;;  %v5000_v11 = vsub.f32 %v4996_v14, %v4999_v50  ;;  %7414 = vmatprep.subr.bf16.mxu0 %v8574_v0  ;;  %v6745_v50 = vld [vmem:[#allocation16 + $0x1] ss:$0 sm:$0xff] }
0x20e5   : > { %8042 = vpow2.f32 %v5224_v41  ;;  %v5001_v28 = vmul.f32 1.442695, %v5000_v11 }
0x20e6   : > { %7415 = vmatpush3.bf16.msra.mxu0 %v7886_v2  ;;  %v7928_v2 = vld [vmem:[#allocation17 + $0x124] ss:$16 sps:$4 sm:$0xff]  }
0x20e7   : > { %8044 = vpow2.f32 %v5001_v28  ;;  %7416 = vmatprep.subr.bf16.mxu0 %v8574_v0 }
0x20ea   : > { %v8041_v29 = vpop.eup %8040  ;;  %7417 = vmatpush3.bf16.msra.mxu0 %v7887_v3  ;;  %v7931_v3 = vld [vmem:[#allocation17 + $0x12c] ss:$16 sps:$4 sm:$0xff]  }
0x20eb   : > { %v5115_v30 = vsel %vm1571_vm4, %v8041_v29, 0.0  ;;  %7418 = vmatprep.subr.bf16.mxu0 %v8574_v0 }
0x20ec   : > { %5116 = vadd.xlane.f32.xlu0 %v5115_v30 }
0x20ee   : > { %7419 = vmatpush3.bf16.msra.mxu0 %v7888_v4  ;;  %v7926_v4 = vld [vmem:[#allocation17 + $0x120] ss:$16 sps:$4 sm:$0xff]  }
0x20ef   : > { %7420 = vmatprep.subr.bf16.mxu0 %v8574_v0 }
0x20f2   : > { %v8043_v31 = vpop.eup %8042  ;;  %7421 = vmatpush3.bf16.msra.mxu0 %v7889_v8  ;;  %v7937_v8 = vld [vmem:[#allocation17 + $0x10c] ss:$16 sps:$4 sm:$0xff]  }
0x20f3   : > { %v5226_v32 = vsel %vm1571_vm4, %v8043_v31, 0.0 }
0x20f4   : > { %v8045_v47 = vpop.eup %8044  ;;  %5227 = vadd.xlane.f32.xlu1 %v5226_v32  ;;  %v7890_v32 = vld [vmem:[#allocation17 + $0x1e0] ss:$16 sps:$4 sm:$0xff]  }
0x20f5   : > { %v5003_v63 = vsel %vm1571_vm4, %v8045_v47, 0.0 }
0x20f8   : > { %5004 = vadd.xlane.f32.xlu1 %v5003_v63  ;;  %v7895_v63 = vld [vmem:[#allocation17 + $0x1ec] ss:$16 sps:$4 sm:$0xff]  }
0x20f9   : > { %5698 = vmatprep.subr.bf16.mxu0 %v7895_v63  ;;  %v7952_v63 = vld [vmem:[#allocation20 + $0x120] sm:$0xff]  }
0x2102   : > { %5010 = vrot.lane.b32.xlu0 %v9352_v25, %s8578_s15 }
0x2109   : > { %5121 = vrot.lane.b32.xlu1 %v9352_v25, %s8577_s1 }
0x210d   : > { %5232 = vrot.lane.b32.xlu1 %v9352_v25, %s8579_s6 }
0x2175   : > { %v5117_v33 = vpop.xlane.xlu0 %5116 }
0x2179   : > { %v5011_v34 = vpop.permute.xlu0 %5010 }
0x217a   : > { %v5016_v35 = vsel %vm1587_vm3, %v5011_v34, 0 }
0x217b   : > { %7377 = vmatpush3.bf16.msra.mxu1 %v5016_v35 }
0x217c   : > { %7388 = vmatprep.subr.bf16.mxu1 %v8574_v0 }
0x217d   : > { %v5228_v36 = vpop.xlane.xlu1 %5227 }
0x2181   : > { %v5005_v13 = vpop.xlane.xlu1 %5004 }
0x2182   : > { %8046 = vrcp.f32 %v5005_v13  ;;  %v7896_v13 = vld [vmem:[#allocation17 + $0x1c0] ss:$16 sps:$4 sm:$0xff]  }
0x2183   : > { %8048 = vrcp.f32 %v5117_v33 }
0x2184   : > { %8050 = vrcp.f32 %v5228_v36  ;;  %v7901_v36 = vld [vmem:[#allocation17 + $0x1cc] ss:$16 sps:$4 sm:$0xff]  }
0x2185   : > { %v5122_v16 = vpop.permute.xlu1 %5121 }
0x2186   : > { %v5127_v43 = vsel %vm1587_vm3, %v5122_v16, 0  ;;  %v7907_v16 = vld [vmem:[#allocation17 + $0x1ac] ss:$16 sps:$4 sm:$0xff]  }
0x2189   : > { %v5233_v45 = vpop.permute.xlu1 %5232 }
0x218a   : > { %v5238_v55 = vsel %vm1587_vm3, %v5233_v45, 0  ;;  %v7908_v45 = vld [vmem:[#allocation17 + $0x180] ss:$16 sps:$4 sm:$0xff]  }
0x218f   : > { %v8047_v37 = vpop.eup %8046 }
0x2190   : > { %v5007_v38 = vmul.f32 %v8047_v37, %v8045_v47  ;;  %v8049_v42 = vpop.eup %8048  ;;  %v7893_v47 = vld [vmem:[#allocation17 + $0x1e8] ss:$16 sps:$4 sm:$0xff]  }
0x2191   : > { %v5119_v25 = vmul.f32 %v8049_v42, %v8041_v29  ;;  %v8051_v48 = vpop.eup %8050  ;;  %v7899_v37 = vld [vmem:[#allocation17 + $0x1c8] ss:$16 sps:$4 sm:$0xff]  }
0x2192   : > { %v5008_v39 = vpack.c.bf16 %v5007_v38, %v5007_v38  ;;  %v5230_v57 = vmul.f32 %v8051_v48, %v8043_v31  ;;  %v7904_v38 = vld [vmem:[#allocation17 + $0x1a4] ss:$16 sps:$4 sm:$0xff]   ;;  %v7905_v42 = vld [vmem:[#allocation17 + $0x1a8] ss:$16 sps:$4 sm:$0xff]  }
0x2193   : > { %v5120_v46 = vpack.c.bf16 %v5119_v25, %v5119_v25  ;;  %v7913_v25 = vld [vmem:[#allocation17 + $0x18c] ss:$16 sps:$4 sm:$0xff]   ;;  %v7916_v48 = vld [vmem:[#allocation17 + $0x164] ss:$16 sps:$4 sm:$0xff]  }
0x2194   : > { %7379 = vmatmul.mubr.msk.bf16.vlgmr.msra.gmra.mxu1 %vm1571_vm4, %v5008_v39  ;;  %v5231_v58 = vpack.c.bf16 %v5230_v57, %v5230_v57  ;;  %v7902_v39 = vld [vmem:[#allocation17 + $0x1a0] ss:$16 sps:$4 sm:$0xff]  }
0x2195   : > { %7389 = vmatpush3.bf16.msra.mxu1 %v5127_v43  ;;  %7390 = vmatprep.mubr.msk.bf16.mxu1 %vm8575_vm0, %v8574_v0  ;;  %v7910_v43 = vld [vmem:[#allocation17 + $0x184] ss:$16 sps:$4 sm:$0xff]   ;;  %v7914_v57 = vld [vmem:[#allocation17 + $0x160] ss:$16 sps:$4 sm:$0xff]  }
0x2196   : > { %7400 = vmatprep.subr.bf16.mxu1 %v8574_v0 }
0x219c   : > { %7391 = vmatmul.mubr.msk.bf16.vlgmr.msra.gmra.mxu1 %vm1571_vm4, %v5120_v46  ;;  %v7911_v46 = vld [vmem:[#allocation17 + $0x188] ss:$16 sps:$4 sm:$0xff]  }
0x219d   : > { %7401 = vmatpush3.bf16.msra.mxu1 %v5238_v55  ;;  %7402 = vmatprep.mubr.msk.bf16.mxu1 %vm8575_vm0, %v8574_v0  ;;  %v7919_v55 = vld [vmem:[#allocation17 + $0x16c] ss:$16 sps:$4 sm:$0xff]  }
0x21a4   : > { %7403 = vmatmul.mubr.msk.bf16.vlgmr.msra.gmra.mxu1 %vm1571_vm4, %v5231_v58  ;;  %v7917_v58 = vld [vmem:[#allocation17 + $0x168] ss:$16 sps:$4 sm:$0xff]  }
0x21a5   : > { %5689 = vmatprep.mubr.bf16.mxu1 %v8576_v40 }
0x2254   : > { %v5052_v5 = vpop.f32.mrf.mxu1 }
0x2255   : > { %5281 = vrot.lane.b32.xlu0 %v5052_v5, %s8579_s6  ;;  %v7929_v5 = vld [vmem:[#allocation17 + $0x128] ss:$16 sps:$4 sm:$0xff]   ;;  %s6188_s6 = sshll.u32 %s8973_s19, 4  ;;  %s6189_s6 = int_to_ptr.vmem [resolvable:$true] %s6188_s6 }
0x2256   : > { %v7380_v6 = vpop.f32.mrf.mxu1  ;;  %s8403_s11 = scalar_lea.vmem %s6189_s6, 128  ;;  %p8410_p12 = scmp.lt.s32.totalorder %s6189_s6, %s8408_s2 }
0x2257   : > { %v7934_v6 = vld [vmem:[#allocation17 + $0x104] ss:$16 sps:$4 sm:$0xff]   ;;  %p8404_p13 = scmp.ne.s32.totalorder %s6189_s6, %s8403_s11  ;;  %p8411_p4 = scmp.lt.s32.totalorder %s8409_s3, %s8403_s11 }
0x2258   : > { %v5055_v9 = vpop.f32.mrf.mxu1 }
0x2259   : > { %v7932_v9 = vld [vmem:[#allocation17 + $0x100] ss:$16 sps:$4 sm:$0xff]   ;;  %p8405_p1 = pnand %p8404_p13, %p9597_p3  ;;  %p8412_p10 = por %p8411_p4, %p8410_p12 }
0x225a   : > { %v7381_v10 = vpop.f32.mrf.mxu1 }
0x225b   : > { %v7935_v10 = vld [vmem:[#allocation17 + $0x108] ss:$16 sps:$4 sm:$0xff]   ;;  %p8406_p9 = pneg %p8405_p1 }
0x225c   : > { %v5163_v12 = vpop.f32.mrf.mxu1 }
0x225d   : > { %5285 = vrot.lane.b32.xlu1 %v5163_v12, %s8577_s1  ;;  %s6829_s1 = sshll.u32 %s8758_s0, 7  ;;  %p8413_p2 = pnand %p8412_p10, %p8406_p9 }
0x225e   : > { %v7392_v14 = vpop.f32.mrf.mxu1 }
0x2260   : > { %v5166_v15 = vpop.f32.mrf.mxu1 }
0x2262   : > { %v7393_v18 = vpop.f32.mrf.mxu1 }
0x2264   : > { %v5274_v19 = vpop.f32.mrf.mxu1 }
0x2265   : > { %5289 = vrot.lane.b32.xlu0 %v5274_v19, %s8578_s15  ;;  %v6756_v19 = vld [vmem:[%s9594_s18 + $0x1] ss:$0 sm:$0xff]  ;;  %s6186_s15 = scalar_lea.hbm %s9545_s5, %s6829_s1 }
0x2266   : > { %v7404_v20 = vpop.f32.mrf.mxu1 }
0x2268   : > { %v5277_v22 = vpop.f32.mrf.mxu1 }
0x2269   : > { %v6757_v22 = vld [vmem:[%s9596_s17 + $0x1] ss:$0 sm:$0xff] }
0x226a   : > { %v7405_v23 = vpop.f32.mrf.mxu1 }
0x22c7   : > { %v5282_v17 = vpop.permute.xlu0 %5281 }
0x22c8   : > { %v5292_v0 = vsel %vm1516_vm2, %v9386_v60, %v5282_v17  ;;  %v7892_v60 = vld [vmem:[#allocation17 + $0x1e4] ss:$16 sps:$4 sm:$0xff]  }
0x22c9   : > { %5657 = vmatprep.subr.bf16.mxu1 %v7892_v60  ;;  %v7950_v60 = vld [vmem:[#allocation20 + $0x160] sm:$0xff]  }
0x22ca   : > { %5658 = vmatpush1.bf16.msra.mxu1 %v7890_v32  ;;  %v7949_v32 = vld [vmem:[#allocation20 + $0x1a8] sm:$0xff]  }
0x22cf   : > { %v5286_v24 = vpop.permute.xlu1 %5285 }
0x22d0   : > { %v5293_v21 = vsel %vm1177_vm1, %v5292_v0, %v5286_v24 }
0x22d7   : > { %v5290_v49 = vpop.permute.xlu0 %5289 }
0x22d8   : > { %v5294_v26 = vsel %vm1984_vm5, %v5293_v21, %v5290_v49  ;;  %v7938_v21 = vld [vmem:[#allocation20 + $0x178] sm:$0xff]  }
0x22d9   : > { %v5295_v27 = vpack.c.bf16 %v5294_v26, %v5294_v26  ;;  %v7939_v49 = vld [vmem:[#allocation20 + $0x1f8] sm:$0xff]  }
0x22da   : > { %v7940_v26 = vld [vmem:[#allocation20 + $0x138] sm:$0xff]  }
0x22db   : > { %7423 = vmatmul.mubr.bf16.vlgmr.msra.gmra.mxu0 %v5295_v27  ;;  %v7941_v27 = vld [vmem:[#allocation20 + $0x1b8] sm:$0xff]  }
0x22dc   : > { %5730 = vmatprep.mubr.bf16.mxu0 %v8576_v40  ;;  %5699 = vmatpush1.bf16.msra.mxu0 %v7893_v47  ;;  %v7951_v47 = vld [vmem:[#allocation20 + $0x1e0] sm:$0xff]  }
0x22dd   : > { %5700 = vmatprep.subr.bf16.mxu0 %v7901_v36  ;;  %v7958_v36 = vld [vmem:[#allocation20 + $0x150] sm:$0xff]  }
0x22e0   : > { %5701 = vmatpush1.bf16.msra.mxu0 %v7899_v37  ;;  %v7960_v37 = vld [vmem:[#allocation20 + $0x110] sm:$0xff]  }
0x22e1   : > { %5702 = vmatprep.subr.bf16.mxu0 %v7907_v16  ;;  %v7962_v16 = vld [vmem:[#allocation20 + $0x148] sm:$0xff]  }
0x22e4   : > { %5703 = vmatpush1.bf16.msra.mxu0 %v7905_v42  ;;  %v7964_v42 = vld [vmem:[#allocation20 + $0x108] sm:$0xff]  }
0x22e5   : > { %5704 = vmatprep.subr.bf16.mxu0 %v7913_v25  ;;  %v7966_v25 = vld [vmem:[#allocation20 + $0x140] sm:$0xff]  }
0x22e8   : > { %5705 = vmatpush1.bf16.msra.mxu0 %v7911_v46  ;;  %v7968_v46 = vld [vmem:[#allocation20 + $0x100] sm:$0xff]  }
0x22e9   : > { %5706 = vmatprep.subr.bf16.mxu0 %v7919_v55  ;;  %v5475_v55 = vld [vmem:[#allocation19 + $0x4] sm:$0xf] }
0x22ec   : > { %5707 = vmatpush1.bf16.msra.mxu0 %v7917_v58  ;;  %v5488_v58 = vrot.slane %v5475_v55, %v8991_v56 }
0x22ed   : > { %5708 = vmatprep.subr.bf16.mxu0 %v7925_v44  ;;  %v5492_v44 = vrot.slane %v5475_v55, %v3042_v51 }
0x22f0   : > { %5709 = vmatpush1.bf16.msra.mxu0 %v7923_v1 }
0x22f1   : > { %5710 = vmatprep.subr.bf16.mxu0 %v7931_v3 }
0x22f4   : > { %5711 = vmatpush1.bf16.msra.mxu0 %v7929_v5 }
0x22f5   : > { %5712 = vmatprep.subr.bf16.mxu0 %v7937_v8 }
0x22f8   : > { %5713 = vmatpush1.bf16.msra.mxu0 %v7935_v10 }
0x22f9   : > { %7040 = vmatprep.subr.bf16.mxu0 %v7939_v49 }
0x239b   : > { %v5403_v41 = vpop.f32.mrf.mxu0 }
0x239c   : > { %v5404_v11 = vadd.f32 %v6745_v50, %v5403_v41  ;;  %v7942_v50 = vld [vmem:[#allocation20 + $0x170] sm:$0xff]  }
0x239d   : > { %v7424_v28 = vpop.f32.mrf.mxu0  ;;  %v7943_v41 = vld [vmem:[#allocation20 + $0x1f0] sm:$0xff]  }
0x239e   : > { %v5409_v29 = vadd.f32 %v5404_v11, %v9341_v7  ;;  %v7898_v7 = vld [vmem:[#allocation17 + $0x1c4] ss:$16 sps:$4 sm:$0xff]   ;;  %v7944_v11 = vld [vmem:[#allocation20 + $0x130] sm:$0xff]  }
0x239f   : > { %v5406_v30 = vpop.f32.mrf.mxu0  ;;  %5659 = vmatprep.subr.bf16.mxu1 %v7898_v7  ;;  %v7945_v28 = vld [vmem:[#allocation20 + $0x1b0] sm:$0xff]   ;;  %v7957_v7 = vld [vmem:[#allocation20 + $0x198] sm:$0xff]  }
0x23a0   : > { %5414 = vadd.xlane.f32.xlu1 %v5409_v29  ;;  %5660 = vmatpush1.bf16.msra.mxu1 %v7896_v13  ;;  %v7947_v30 = vld [vmem:[#allocation20 + $0x1e8] sm:$0xff]   ;;  %v7959_v13 = vld [vmem:[#allocation20 + $0x1d0] sm:$0xff]  }
0x23a1   : > { %v7425_v31 = vpop.f32.mrf.mxu0  ;;  %5661 = vmatprep.subr.bf16.mxu1 %v7904_v38  ;;  %v7961_v38 = vld [vmem:[#allocation20 + $0x190] sm:$0xff]  }
0x23a2   : > { %v7948_v31 = vld [vmem:[#allocation20 + $0x128] sm:$0xff]  }
0x23a4   : > { %5662 = vmatpush1.bf16.msra.mxu1 %v7902_v39  ;;  %v7963_v39 = vld [vmem:[#allocation20 + $0x1c8] sm:$0xff]  }
0x23a5   : > { %5663 = vmatprep.subr.bf16.mxu1 %v7910_v43  ;;  %v7965_v43 = vld [vmem:[#allocation20 + $0x188] sm:$0xff]  }
0x23a8   : > { %5664 = vmatpush1.bf16.msra.mxu1 %v7908_v45  ;;  %v7967_v45 = vld [vmem:[#allocation20 + $0x1c0] sm:$0xff]  }
0x23a9   : > { %5665 = vmatprep.subr.bf16.mxu1 %v7916_v48  ;;  %v7969_v48 = vld [vmem:[#allocation20 + $0x180] sm:$0xff]  }
0x23ac   : > { %5666 = vmatpush1.bf16.msra.mxu1 %v7914_v57  ;;  %v5480_v57 = vrot.slane %v5475_v55, %v8987_v54 }
0x23ad   : > { %5667 = vmatprep.subr.bf16.mxu1 %v7922_v59  ;;  %v5484_v59 = vrot.slane %v5475_v55, %v8984_v53 }
0x23b0   : > { %5668 = vmatpush1.bf16.msra.mxu1 %v7920_v62 }
0x23b1   : > { %5669 = vmatprep.subr.bf16.mxu1 %v7928_v2 }
0x23b4   : > { %5670 = vmatpush1.bf16.msra.mxu1 %v7926_v4 }
0x23b5   : > { %5671 = vmatprep.subr.bf16.mxu1 %v7934_v6 }
0x23b8   : > { %5672 = vmatpush1.bf16.msra.mxu1 %v7932_v9 }
0x23b9   : > { %7018 = vmatprep.subr.bf16.mxu1 %v7938_v21 }
0x2429   : > { %v5415_v33 = vpop.xlane.xlu1 %5414 }
0x242a   : > { %v5416_v34 = vmul.f32 0.0078125, %v5415_v33  ;;  %v7953_v33 = vld [vmem:[#allocation20 + $0x1a0] sm:$0xff]  }
0x242c   : > { %v9429_v40 = vsub.f32 %v5409_v29, %v5416_v34  ;;  %v7946_v29 = vld [vmem:[#allocation20 + $0x168] sm:$0xff]   ;;  %v7954_v34 = vld [vmem:[#allocation20 + $0x158] sm:$0xff]  }
0x242e   : > { %v5418_v35 = vmul.f32 %v9429_v40, %v9429_v40 }
0x2430   : > { %5419 = vadd.xlane.f32.xlu0 %v5418_v35  ;;  %v7956_v35 = vld [vmem:[#allocation20 + $0x118] sm:$0xff]  }
0x24b9   : > { %v5420_v12 = vpop.xlane.xlu0 %5419 }
0x24ba   : > { %v5421_v14 = vmul.f32 0.0078125, %v5420_v12 }
0x24bc   : > { %v5422_v15 = vadd.f32 1e-12, %v5421_v14 }
0x24be   : > { %8052 = vrsqrt.f32 %v5422_v15 }
0x24cb   : > { %v8053_v18 = vpop.eup %8052 }
0x24cc   : > { %v5424_v20 = vmul.f32 %v8053_v18, %v9429_v40  ;;  %v7955_v40 = vld [vmem:[#allocation20 + $0x1d8] sm:$0xff]  }
0x24ce   : > { %v5431_v23 = vmul.f32 %v6756_v19, %v5424_v20 }
0x24d0   : > { %v5438_v17 = vadd.f32 %v6757_v22, %v5431_v23 }
0x24d2   : > { %v9437_v24 = vmul.f32 %v5438_v17, %v9099_v61 }
0x24d4   : > { %v5440_v0 = vpack.c.bf16 %v9437_v24, %v9437_v24 }
0x24d6   : > { %5690 = vmatmul.mubr.bf16.vlgmr.msra.gmra.mxu1 %v5440_v0  ;;  %5731 = vmatmul.mubr.bf16.vlgmr.msra.gmra.mxu0 %v5440_v0 }
0x24d7   : > { %7019 = vmatpush3.bf16.msra.mxu1 %v7940_v26  ;;  %7041 = vmatpush3.bf16.msra.mxu0 %v7941_v27 }
0x24d8   : > { %7020 = vmatprep.subr.bf16.mxu1 %v7942_v50  ;;  %7042 = vmatprep.subr.bf16.mxu0 %v7943_v41 }
0x24db   : > { %7021 = vmatpush3.bf16.msra.mxu1 %v7944_v11  ;;  %7043 = vmatpush3.bf16.msra.mxu0 %v7945_v28 }
0x24dc   : > { %7022 = vmatprep.subr.bf16.mxu1 %v7946_v29  ;;  %7044 = vmatprep.subr.bf16.mxu0 %v7947_v30 }
0x24df   : > { %7023 = vmatpush3.bf16.msra.mxu1 %v7948_v31  ;;  %7045 = vmatpush3.bf16.msra.mxu0 %v7949_v32 }
0x24e0   : > { %7024 = vmatprep.subr.bf16.mxu1 %v7950_v60  ;;  %7046 = vmatprep.subr.bf16.mxu0 %v7951_v47 }
0x24e3   : > { %7025 = vmatpush3.bf16.msra.mxu1 %v7952_v63  ;;  %7047 = vmatpush3.bf16.msra.mxu0 %v7953_v33 }
0x24e4   : > { %7026 = vmatprep.subr.bf16.mxu1 %v7954_v34  ;;  %7048 = vmatprep.subr.bf16.mxu0 %v7955_v40 }
0x24e7   : > { %7027 = vmatpush3.bf16.msra.mxu1 %v7956_v35  ;;  %7049 = vmatpush3.bf16.msra.mxu0 %v7957_v7 }
0x24e8   : > { %7028 = vmatprep.subr.bf16.mxu1 %v7958_v36  ;;  %7050 = vmatprep.subr.bf16.mxu0 %v7959_v13 }
0x24eb   : > { %7029 = vmatpush3.bf16.msra.mxu1 %v7960_v37  ;;  %7051 = vmatpush3.bf16.msra.mxu0 %v7961_v38 }
0x24ec   : > { %7030 = vmatprep.subr.bf16.mxu1 %v7962_v16  ;;  %7052 = vmatprep.subr.bf16.mxu0 %v7963_v39 }
0x24ef   : > { %7031 = vmatpush3.bf16.msra.mxu1 %v7964_v42  ;;  %7053 = vmatpush3.bf16.msra.mxu0 %v7965_v43 }
0x24f0   : > { %7032 = vmatprep.subr.bf16.mxu1 %v7966_v25  ;;  %7054 = vmatprep.subr.bf16.mxu0 %v7967_v45  ;;  %v6790_v45 = vld [vmem:[#allocation22 + $0x1] ss:$0 sm:$0xff] }
0x24f3   : > { %7033 = vmatpush3.bf16.msra.mxu1 %v7968_v46  ;;  %7055 = vmatpush3.bf16.msra.mxu0 %v7969_v48 }
0x2596   : > { %v5691_v62 = vpop.f32.mrf.mxu1  ;;  %v5732_v1 = vpop.f32.mrf.mxu0 }
0x2597   : > { %v5692_v2 = vadd.f32 %v5691_v62, %v5480_v57  ;;  %v5733_v3 = vadd.f32 %v5732_v1, %v5488_v58 }
0x2598   : > { %v5693_v4 = vpop.f32.mrf.mxu1  ;;  %v5734_v5 = vpop.f32.mrf.mxu0 }
0x2599   : > { %v5739_v6 = vmul.f32 %v5692_v2, %v5692_v2  ;;  %v5741_v8 = vmul.f32 %v5733_v3, %v5733_v3  ;;  %v5694_v9 = vadd.f32 %v5693_v4, %v5484_v59  ;;  %v5735_v10 = vadd.f32 %v5734_v5, %v5492_v44 }
0x259a   : > { %v5695_v12 = vpop.f32.mrf.mxu1  ;;  %v5736_v14 = vpop.f32.mrf.mxu0 }
0x259b   : > { %v5743_v54 = vmul.f32 %v5739_v6, %v5692_v2  ;;  %v5745_v15 = vmul.f32 %v5741_v8, %v5733_v3  ;;  %v5740_v56 = vmul.f32 %v5694_v9, %v5694_v9  ;;  %v5742_v18 = vmul.f32 %v5735_v10, %v5735_v10 }
0x259c   : > { %v5696_v53 = vpop.f32.mrf.mxu1  ;;  %v5737_v19 = vpop.f32.mrf.mxu0 }
0x259d   : > { %v5747_v52 = vmul.f32 0.044715, %v5743_v54  ;;  %v5749_v51 = vmul.f32 0.044715, %v5745_v15  ;;  %v5744_v20 = vmul.f32 %v5740_v56, %v5694_v9  ;;  %v5746_v22 = vmul.f32 %v5742_v18, %v5735_v10 }
0x259f   : > { %v5751_v23 = vadd.f32 %v5747_v52, %v5692_v2  ;;  %v5753_v17 = vadd.f32 %v5749_v51, %v5733_v3  ;;  %v5748_v0 = vmul.f32 0.044715, %v5744_v20  ;;  %v5750_v21 = vmul.f32 0.044715, %v5746_v22 }
0x25a1   : > { %v5755_v49 = vmul.f32 0.7978846, %v5751_v23  ;;  %v5757_v26 = vmul.f32 0.7978846, %v5753_v17  ;;  %v5752_v27 = vadd.f32 %v5748_v0, %v5694_v9  ;;  %v5754_v50 = vadd.f32 %v5750_v21, %v5735_v10 }
0x25a3   : > { %8054 = vtanh.f32 %v5755_v49  ;;  %v5756_v41 = vmul.f32 0.7978846, %v5752_v27  ;;  %v5758_v11 = vmul.f32 0.7978846, %v5754_v50 }
0x25a4   : > { %8056 = vtanh.f32 %v5757_v26 }
0x25a5   : > { %8058 = vtanh.f32 %v5756_v41 }
0x25a6   : > { %8060 = vtanh.f32 %v5758_v11 }
0x25b0   : > { %v8055_v28 = vpop.eup %8054 }
0x25b1   : > { %v8057_v29 = vpop.eup %8056  ;;  %v5763_v30 = vadd.f32 1.0, %v8055_v28 }
0x25b2   : > { %v8059_v31 = vpop.eup %8058  ;;  %v5765_v32 = vadd.f32 1.0, %v8057_v29 }
0x25b3   : > { %v8061_v60 = vpop.eup %8060  ;;  %v5767_v47 = vmul.f32 0.5, %v5763_v30  ;;  %v5764_v63 = vadd.f32 1.0, %v8059_v31 }
0x25b4   : > { %v5766_v33 = vadd.f32 1.0, %v8061_v60  ;;  %v5769_v34 = vmul.f32 0.5, %v5765_v32 }
0x25b5   : > { %v5768_v40 = vmul.f32 0.5, %v5764_v63  ;;  %v5771_v35 = vmul.f32 %v5767_v47, %v5692_v2 }
0x25b6   : > { %v5770_v7 = vmul.f32 0.5, %v5766_v33  ;;  %v5773_v13 = vmul.f32 %v5769_v34, %v5733_v3 }
0x25b7   : > { %v5772_v36 = vmul.f32 %v5768_v40, %v5694_v9  ;;  %v5775_v16 = vpack.c.bf16 %v5771_v35, %v5771_v35 }
0x25b8   : > { %v5774_v37 = vmul.f32 %v5770_v7, %v5735_v10  ;;  %v5777_v42 = vpack.c.bf16 %v5773_v13, %v5773_v13 }
0x25b9   : > { %v5776_v38 = vpack.c.bf16 %v5772_v36, %v5772_v36 }
0x25ba   : > { %v5778_v39 = vpack.c.bf16 %v5774_v37, %v5774_v37 }
0x25bb   : > { %6076 = vmatprep.mubr.bf16.mxu1 %v5776_v38 }
0x25bc   : > { %6116 = vmatprep.mubr.bf16.mxu0 %v5778_v39  ;;  %6077 = vmatmul.mubr.bf16.vlgmr.msra.gmra.mxu1 %v5775_v16 }
0x25bd   : > { %6117 = vmatmul.mubr.bf16.vlgmr.msra.gmra.mxu0 %v5777_v42 }
0x267c   : > { %v7034_v43 = vpop.f32.mrf.mxu1 }
0x267d   : > { %v7056_v25 = vpop.f32.mrf.mxu0 }
0x267e   : > { %v7035_v46 = vpop.f32.mrf.mxu1 }
0x267f   : > { %v7036_v48 = vadd.f32 %v7035_v46, %v7034_v43  ;;  %v7057_v55 = vpop.f32.mrf.mxu0 }
0x2680   : > { %v7037_v57 = vpop.f32.mrf.mxu1  ;;  %v7058_v59 = vadd.f32 %v7057_v55, %v7056_v25 }
0x2681   : > { %v6079_v58 = vadd.f32 %v7036_v48, %v6790_v45  ;;  %v7059_v44 = vpop.f32.mrf.mxu0 }
0x2682   : > { %v7038_v62 = vpop.f32.mrf.mxu1 }
0x2683   : > { %v6119_v1 = vadd.f32 %v7058_v59, %v6079_v58  ;;  %v7060_v2 = vpop.f32.mrf.mxu0 }
0x2685   : > { %v6124_v3 = vadd.f32 %v6119_v1, %v9437_v24 }
0x2687   : > { %6129 = vadd.xlane.f32.xlu0 %v6124_v3 }
0x2710   : > { %v6130_v4 = vpop.xlane.xlu0 %6129 }
0x2711   : > { %v6131_v5 = vmul.f32 0.0078125, %v6130_v4 }
0x2713   : > { %v6132_v6 = vsub.f32 %v6124_v3, %v6131_v5 }
0x2715   : > { %v6133_v8 = vmul.f32 %v6132_v6, %v6132_v6 }
0x2717   : > { %6134 = vadd.xlane.f32.xlu1 %v6133_v8 }
0x2718   : > { %8416 = shalt.err (!%p8413_p2)
}
0x2719   : > { %s8417_s4 = scalar_lea.hbm %s6186_s15, 128  ;;  %s8421_s19 = scalar_lea.hbm %s9545_s5, 256 }
0x271a   : > { %p8418_p6 = scmp.ne.s32.totalorder %s6186_s15, %s8417_s4  ;;  %p8422_p8 = scmp.lt.s32.totalorder %s6186_s15, %s9545_s5 }
0x271b   : > { %p8423_p11 = scmp.lt.s32.totalorder %s8421_s19, %s8417_s4 }
0x271c   : > { %p8419_p5 = pnand %p8418_p6, %p9597_p3 }
0x271d   : > { %p8424_p0 = por %p8423_p11, %p8422_p8 }
0x271e   : > { %p8420_p7 = pneg %p8419_p5 }
0x2720   : > { %p8425_p13 = pnand %p8424_p0, %p8420_p7 }
0x2722   : > { %8428 = shalt.err (!%p8425_p13)
}
0x2723   : > { %s9598_s3 = sld [smem:[#allocation53_spill]]  ;;  %v6825_v14 = vld [vmem:[%s8720_s25 + $0x1] ss:$0 sm:$0xff]  ;;  %s9599_s4 = sshll.u32 %s8964_s16, 3 }
0x2724   : > { %7479 = dma.vmem_to_hbm [thread:$0]  (%p9597_p3), %s6189_s6, 128, %s6186_s15, %s6162_s22   ;;  %v6826_v15 = vld [vmem:[%s8725_s14 + $0x1] ss:$0 sm:$0xff] }
0x2725   : > { %s1119_s2 = scalar_lea.vmem [#allocation23], %s9599_s4  ;;  %s6157_s15 = scalar_lea.sflag [#allocation4], %s8964_s16 }
0x2726   : > { %s6175_s11 = sshll.u32 %s1119_s2, 4  ;;  %s8581_s22 = smov [#allocation23]   ;;  %s6176_s11 = int_to_ptr.vmem [resolvable:$true] %s6175_s11 }
0x2727   : > { %s8429_s6 = scalar_lea.vmem %s6176_s11, 128  ;;  %s8433_s19 = sshll.u32 %s8581_s22, 4  ;;  %s8434_s19 = int_to_ptr.vmem [resolvable:$false] %s8433_s19 }
0x2728   : > { %p8430_p1 = scmp.ne.s32.totalorder %s6176_s11, %s8429_s6  ;;  %s8435_s5 = scalar_lea.vmem %s8434_s19, 256 }
0x2729   : > { %s6173_s7 = scalar_lea.hbm %s9598_s3, %s6829_s1  ;;  %p8436_p4 = scmp.lt.s32.totalorder %s6176_s11, %s8434_s19 }
0x272a   : > { %p8431_p9 = pnand %p8430_p1, %p9597_p3  ;;  %p8437_p10 = scmp.lt.s32.totalorder %s8435_s5, %s8429_s6 }
0x272c   : > { %p8432_p12 = pneg %p8431_p9  ;;  %p8438_p2 = por %p8437_p10, %p8436_p4 }
0x272e   : > { %p8439_p6 = pnand %p8438_p2, %p8432_p12 }
0x27a0   : > { %v6135_v24 = vpop.xlane.xlu1 %6134 }
0x27a1   : > { %v6136_v9 = vmul.f32 0.0078125, %v6135_v24 }
0x27a3   : > { %v6137_v10 = vadd.f32 1e-12, %v6136_v9 }
0x27a5   : > { %8062 = vrsqrt.f32 %v6137_v10 }
0x27b2   : > { %v8063_v12 = vpop.eup %8062 }
0x27b3   : > { %v6139_v54 = vmul.f32 %v8063_v12, %v6132_v6 }
0x27b5   : > { %v6146_v56 = vmul.f32 %v6825_v14, %v6139_v54 }
0x27b7   : > { %v6153_v18 = vadd.f32 %v6826_v15, %v6146_v56 }
0x27b9   : > { %v6154_v53 = vmul.f32 %v6153_v18, %v9099_v61 }
0x27bb   : > { %6155 = vst [vmem:[%s1119_s2] sm:$0xff] %v6154_v53 }
0x27bc   : > { %8442 = shalt.err (!%p8439_p6)
}
0x27bd   : > { %s8443_s4 = scalar_lea.hbm %s6173_s7, 128  ;;  %s8447_s0 = scalar_lea.hbm %s9598_s3, 256 }
0x27be   : > { %p8444_p5 = scmp.ne.s32.totalorder %s6173_s7, %s8443_s4  ;;  %p8448_p11 = scmp.lt.s32.totalorder %s6173_s7, %s9598_s3 }
0x27bf   : > { %p8449_p0 = scmp.lt.s32.totalorder %s8447_s0, %s8443_s4 }
0x27c0   : > { %p8445_p7 = pnand %p8444_p5, %p9597_p3 }
0x27c1   : > { %p8450_p13 = por %p8449_p0, %p8448_p11 }
0x27c2   : > { %p8446_p8 = pneg %p8445_p7 }
0x27c4   : > { %p8451_p1 = pnand %p8450_p13, %p8446_p8 }
0x27c6   : > { %8454 = shalt.err (!%p8451_p1)
}
0x27c7   : > { %7478 = dma.vmem_to_hbm [thread:$0]  (%p9597_p3), %s6176_s11, 128, %s6173_s7, %s6157_s15  }
0x27c8 PF: > { %s9600_s5 = sld [smem:[#allocation57_spill]] }
0x27c9   : > { %s9601_s16 = sld [smem:[#allocation55_spill]] }
0x27ca   : > { %s9602_s1 = sld [smem:[#allocation60_spill]] }
0x27ce   : > { %p7555_p9 = scmp.ge.s32.totalorder %s9600_s5, 2 }
0x27cf   : > { %s6200_s2 = sand.u32 1, %s9601_s16  }
0x27d0   : > { %p9603_p12 = scmp.ne.s32.totalorder %s9602_s1, 0  ;;  %s6201_s6 = scalar_lea.sflag [#allocation4], %s6200_s2 }
0x27d2   : > { %p7523_p4 = pnand %p7555_p9, %p9603_p12 }
0x27d4   : > { %p7524_p10 = pneg %p7523_p4 }
0x27d6   : > { %8500 = dma.done.wait (%p7524_p10), %s6201_s6, 128  }
0x27d7   : > { %8502 = vsyncadd (%p7524_p10), %s6201_s6, 4294967168  ;;  %s6210_s22 = scalar_lea.sflag [#allocation25], %s6200_s2 }
0x27d8   : > { %8504 = dma.done.wait (%p7524_p10), %s6210_s22, 128  }
0x27d9   : > { %8506 = vsyncadd (%p7524_p10), %s6210_s22, 4294967168  ;;  %s9604_s15 = sld [smem:[#allocation58_spill]]  ;;  %s9607_s7 = smov %s8513_s10 }
0x27da   : > { %s9605_s19 = sld [smem:[#allocation56_spill]] }
0x27db   : > { %s9606_s11 = sld [smem:[#allocation59_spill]] }
0x27df   : > { %p80_p3 = scmp.ge.s32.totalorder %s9604_s15, 4  }
0x27e0   : > { %s9608_s10 = smov %s9605_s19 }
0x27e1   :  { %82 = sbr.rel (!%p80_p3) target bundleno = 66 (0x42), region = 295 }
0x27e6   :  { %6215 = vsyncpa [#allocation3], 1 }
0x27e7   :  { %6217 = vsyncpa [#allocation3 + $0x1], 1 }
0x27e8   :  { %6218 = vsyncpa [#allocation6], 1 }
0x27e9   :  { %6219 = vsyncpa [#allocation9], 1 }
0x27ea   :  { %6220 = vsyncpa [#allocation12], 1 }
0x27eb   :  { %6221 = vsyncpa [#allocation15], 1 }
0x27ec   :  { %6222 = vsyncpa [#allocation18], 1 }
0x27ed   :  { %6223 = vsyncpa [#allocation21], 1 }
0x27ee   :  { %6224 = vsyncpa [#allocation4], 1 }
0x27ef   :  { %6226 = vsyncpa [#allocation4 + $0x1], 1 }
0x27f0   :  { %6227 = vsyncpa [#allocation25], 1 }
0x27f1   :  { %6229 = vsyncpa [#allocation25 + $0x1], 1 }

</bundles_post_ra>
